<compile_context>
chip_gen: v6e
topology: v6e:2x2x1
jax: 0.10.0
libtpu: 0.0.40
codegen_flags: <defaults>
</compile_context>

<pallas_src>
import jax
import jax.numpy as jnp
from jax.experimental import pallas as pl
from jax.experimental.pallas import tpu as pltpu

N_EMBD = 384
HIDDEN = 4 * N_EMBD  # 1536


def _round_up(x, m):
    return (x + m - 1) // m * m


def _ffwd_kernel(x_ref, w1_ref, b1_ref, w2_ref, b2_ref, o_ref, acc_ref):
    # x_ref:  (tm, C)  bf16
    # w1_ref: (C, th)  bf16     b1_ref: (1, th) f32
    # w2_ref: (th, C)  bf16     b2_ref: (1, C)  f32
    # o_ref:  (tm, C)  out dtype
    # acc_ref:(tm, C)  f32 scratch, accumulated over the H-chunk grid axis
    hk = pl.program_id(1)

    @pl.when(hk == 0)
    def _init():
        acc_ref[...] = jnp.zeros_like(acc_ref)

    # Linear 1 chunk (bf16 MXU operands, f32 accumulate) + bias + ReLU.
    h = jnp.dot(x_ref[...], w1_ref[...], preferred_element_type=jnp.float32)
    h = jnp.maximum(h + b1_ref[...], 0.0)

    # Linear 2 chunk, accumulated in f32 scratch.
    acc_ref[...] += jnp.dot(h.astype(w2_ref.dtype), w2_ref[...],
                            preferred_element_type=jnp.float32)

    @pl.when(hk == pl.num_programs(1) - 1)
    def _finalize():
        # Dropout(p=0.25) in eval mode == identity.
        o_ref[...] = (acc_ref[...] + b2_ref[...]).astype(o_ref.dtype)


def feedforward(x, w1, b1, w2, b2, *, tm=None, th=512):
    """x: (B, T, C); w1: (C, 4C); b1: (4C,) or (1, 4C); w2: (4C, C); b2: (C,) or (1, C)."""
    B, T, C = x.shape
    assert C == w1.shape[0] and w1.shape[1] == w2.shape[0] and w2.shape[1] == C
    H = w1.shape[1]
    M = B * T
    out_dtype = x.dtype

    # bf16 operands into the MXU; f32 accumulation; f32 biases.
    cdt = jnp.bfloat16
    x2d = x.reshape(M, C).astype(cdt)
    w1 = w1.astype(cdt)
    w2 = w2.astype(cdt)
    b1 = b1.reshape(1, H).astype(jnp.float32)
    b2 = b2.reshape(1, C).astype(jnp.float32)

    # Fixed, 256-aligned row tile; pad M up to a multiple of it.
    if tm is None:
        tm = min(512, _round_up(M, 256))
    Mp = _round_up(M, tm)
    if Mp != M:
        x2d = jnp.pad(x2d, ((0, Mp - M), (0, 0)))

    # Hidden-chunk tile (256-aligned for v6e/v7x MXU); fall back to full H.
    if H % th != 0:
        th = H
    grid = (Mp // tm, H // th)

    cost = pl.CostEstimate(
        flops=4 * Mp * C * H,
        transcendentals=0,
        bytes_accessed=(x2d.size * x2d.dtype.itemsize
                        + Mp * C * jnp.dtype(out_dtype).itemsize
                        + w1.size * w1.dtype.itemsize
                        + w2.size * w2.dtype.itemsize
                        + b1.size * b1.dtype.itemsize
                        + b2.size * b2.dtype.itemsize),
    )

    out2d = pl.pallas_call(
        _ffwd_kernel,
        out_shape=jax.ShapeDtypeStruct((Mp, C), out_dtype),
        grid_spec=pltpu.PrefetchScalarGridSpec(
            num_scalar_prefetch=0,
            grid=grid,                                        # (row tiles, H chunks)
            in_specs=[
                pl.BlockSpec((tm, C), lambda i, h: (i, 0)),   # x rows (resident across h)
                pl.BlockSpec((C, th), lambda i, h: (0, h)),   # W1 chunk
                pl.BlockSpec((1, th), lambda i, h: (0, h)),   # b1 chunk
                pl.BlockSpec((th, C), lambda i, h: (h, 0)),   # W2 chunk
                pl.BlockSpec((1, C), lambda i, h: (0, 0)),    # b2 (constant)
            ],
            out_specs=pl.BlockSpec((tm, C), lambda i, h: (i, 0)),
            scratch_shapes=[pltpu.VMEM((tm, C), jnp.float32)],
        ),
        compiler_params=pltpu.CompilerParams(
            dimension_semantics=("parallel", "arbitrary"),
            # ~6 MiB used at tm=512/th=512; 32 MiB leaves headroom for larger
            # tm on v5e/v6e while staying safely under v7x's 64 MiB physical.
            vmem_limit_bytes=32 * 1024 * 1024,
        ),
        cost_estimate=cost,
    )(x2d, w1, b1, w2, b2)

    return out2d[:M].reshape(B, T, C)


def _reference(x, w1, b1, w2, b2):
    # Same mixed precision as the kernel: bf16 MXU operands, f32 accumulation.
    cdt = jnp.bfloat16
    h = jnp.dot(x.astype(cdt), w1.astype(cdt),
                preferred_element_type=jnp.float32) + b1.astype(jnp.float32)
    h = jnp.maximum(h, 0.0)
    y = jnp.dot(h.astype(cdt), w2.astype(cdt),
                preferred_element_type=jnp.float32) + b2.astype(jnp.float32)
    return y.astype(x.dtype)


if __name__ == "__main__":
    key = jax.random.PRNGKey(0)
    kx, k1, k2, k3, k4 = jax.random.split(key, 5)

    B, T, C = 2, 8, N_EMBD
    H = HIDDEN

    x = jax.random.normal(kx, (B, T, C), dtype=jnp.float32)

    # Deterministic parameter init (uniform, like nn.Linear's default scale).
    bound1 = 1.0 / (C ** 0.5)
    bound2 = 1.0 / (H ** 0.5)
    w1 = jax.random.uniform(k1, (C, H), jnp.float32, -bound1, bound1)
    b1 = jax.random.uniform(k2, (1, H), jnp.float32, -bound1, bound1)
    w2 = jax.random.uniform(k3, (H, C), jnp.float32, -bound2, bound2)
    b2 = jax.random.uniform(k4, (1, C), jnp.float32, -bound2, bound2)

    y = feedforward(x, w1, b1, w2, b2)
    y = jax.block_until_ready(y)

    y_ref = _reference(x, w1, b1, w2, b2)
    assert y.shape == (B, T, C)
    assert jnp.allclose(y, y_ref, atol=2e-2, rtol=2e-2), "mismatch vs reference"

    print("KERNEL_OK")
</pallas_src>

<mosaic_0001>
module attributes {stable_mosaic.version = 11 : i64} {
  func.func @_ffwd_kernel(%arg0: i32, %arg1: i32, %arg2: memref<256x384xbf16, #tpu.memory_space<vmem>>, %arg3: memref<384x512xbf16, #tpu.memory_space<vmem>>, %arg4: memref<1x512xf32, #tpu.memory_space<vmem>>, %arg5: memref<512x384xbf16, #tpu.memory_space<vmem>>, %arg6: memref<1x384xf32, #tpu.memory_space<vmem>>, %arg7: memref<256x384xf32, #tpu.memory_space<vmem>>, %arg8: memref<256x384xf32, #tpu.memory_space<vmem>>) attributes {dimension_semantics = [#tpu.dimension_semantics<parallel>, #tpu.dimension_semantics<arbitrary>], iteration_bounds = array<i64: 1, 3>, scalar_prefetch = 0 : i64, scratch_operands = 1 : i64, tpu.core_type = #tpu.core_type<tc>, window_params = [{transform_indices = @transform_0, window_bounds = array<i64: 256, 384>}, {transform_indices = @transform_1, window_bounds = array<i64: 384, 512>}, {transform_indices = @transform_2, window_bounds = array<i64: 1, 512>}, {transform_indices = @transform_3, window_bounds = array<i64: 512, 384>}, {pipeline_mode = #tpu.pipeline_mode<synchronous>, transform_indices = @transform_4, window_bounds = array<i64: 1, 384>}, {transform_indices = @transform_5, window_bounds = array<i64: 256, 384>}]} {
    %c0_i32 = arith.constant 0 : i32
    %0 = arith.cmpi eq, %arg1, %c0_i32 : i32
    %1 = arith.extui %0 : i1 to i32
    %c0_i32_0 = arith.constant 0 : i32
    %2 = arith.cmpi ne, %1, %c0_i32_0 : i32
    scf.if %2 {
      %cst_15 = arith.constant 0.000000e+00 : f32
      %20 = vector.broadcast %cst_15 : f32 to vector<256x384xf32>
      %c0_16 = arith.constant 0 : index
      %c0_17 = arith.constant 0 : index
      %21 = vector.load %arg8[%c0_16, %c0_17] : memref<256x384xf32, #tpu.memory_space<vmem>>, vector<256x384xf32>
      tpu.vector_store %arg8[%c0_16, %c0_17], %20 {strides = array<i32>} : memref<256x384xf32, #tpu.memory_space<vmem>>, vector<256x384xf32>,
    } else {
    }
    %c0 = arith.constant 0 : index
    %c0_1 = arith.constant 0 : index
    %3 = vector.load %arg2[%c0, %c0_1] : memref<256x384xbf16, #tpu.memory_space<vmem>>, vector<256x384xbf16>
    %c0_2 = arith.constant 0 : index
    %c0_3 = arith.constant 0 : index
    %4 = vector.load %arg3[%c0_2, %c0_3] : memref<384x512xbf16, #tpu.memory_space<vmem>>, vector<384x512xbf16>
    %cst = arith.constant dense<0.000000e+00> : vector<256x512xf32>
    %5 = tpu.matmul %3, %4, %cst {dimension_numbers = #tpu.dot_dimension_numbers<[1], [0], [0], [1], [0, 0, 1, 1], [], []>} : vector<256x384xbf16>, vector<384x512xbf16>, vector<256x512xf32> -> vector<256x512xf32>
    %c0_4 = arith.constant 0 : index
    %c0_5 = arith.constant 0 : index
    %6 = vector.load %arg4[%c0_4, %c0_5] : memref<1x512xf32, #tpu.memory_space<vmem>>, vector<1x512xf32>
    %7 = vector.broadcast %6 : vector<1x512xf32> to vector<256x512xf32>
    %8 = arith.addf %5, %7 : vector<256x512xf32>
    %cst_6 = arith.constant 0.000000e+00 : f32
    %9 = vector.broadcast %cst_6 : f32 to vector<256x512xf32>
    %10 = arith.maximumf %8, %9 : vector<256x512xf32>
    %c0_7 = arith.constant 0 : index
    %c0_8 = arith.constant 0 : index
    %11 = vector.load %arg8[%c0_7, %c0_8] : memref<256x384xf32, #tpu.memory_space<vmem>>, vector<256x384xf32>
    %12 = arith.truncf %10 : vector<256x512xf32> to vector<256x512xbf16>
    %c0_9 = arith.constant 0 : index
    %c0_10 = arith.constant 0 : index
    %13 = vector.load %arg5[%c0_9, %c0_10] : memref<512x384xbf16, #tpu.memory_space<vmem>>, vector<512x384xbf16>
    %cst_11 = arith.constant dense<0.000000e+00> : vector<256x384xf32>
    %14 = tpu.matmul %12, %13, %cst_11 {dimension_numbers = #tpu.dot_dimension_numbers<[1], [0], [0], [1], [0, 0, 1, 1], [], []>} : vector<256x512xbf16>, vector<512x384xbf16>, vector<256x384xf32> -> vector<256x384xf32>
    %15 = arith.addf %11, %14 : vector<256x384xf32>
    %c0_12 = arith.constant 0 : index
    %c0_13 = arith.constant 0 : index
    %16 = vector.load %arg8[%c0_12, %c0_13] : memref<256x384xf32, #tpu.memory_space<vmem>>, vector<256x384xf32>
    tpu.vector_store %arg8[%c0_12, %c0_13], %15 {strides = array<i32>} : memref<256x384xf32, #tpu.memory_space<vmem>>, vector<256x384xf32>,
    %c2_i32 = arith.constant 2 : i32
    %17 = arith.cmpi eq, %arg1, %c2_i32 : i32
    %18 = arith.extui %17 : i1 to i32
    %c0_i32_14 = arith.constant 0 : i32
    %19 = arith.cmpi ne, %18, %c0_i32_14 : i32
    scf.if %19 {
      %c0_15 = arith.constant 0 : index
      %c0_16 = arith.constant 0 : index
      %20 = vector.load %arg8[%c0_15, %c0_16] : memref<256x384xf32, #tpu.memory_space<vmem>>, vector<256x384xf32>
      %c0_17 = arith.constant 0 : index
      %c0_18 = arith.constant 0 : index
      %21 = vector.load %arg6[%c0_17, %c0_18] : memref<1x384xf32, #tpu.memory_space<vmem>>, vector<1x384xf32>
      %22 = vector.broadcast %21 : vector<1x384xf32> to vector<256x384xf32>
      %23 = arith.addf %20, %22 : vector<256x384xf32>
      %c0_19 = arith.constant 0 : index
      %c0_20 = arith.constant 0 : index
      %24 = vector.load %arg7[%c0_19, %c0_20] : memref<256x384xf32, #tpu.memory_space<vmem>>, vector<256x384xf32>
      tpu.vector_store %arg7[%c0_19, %c0_20], %23 {strides = array<i32>} : memref<256x384xf32, #tpu.memory_space<vmem>>, vector<256x384xf32>,
    } else {
    }
    return
  }
  func.func @transform_0(%arg0: i32, %arg1: i32) -> (i32, i32) {
    %c0_i32 = arith.constant 0 : i32
    %c0_i32_0 = arith.constant 0 : i32
    return %arg0, %c0_i32 : i32, i32
  }
  func.func @transform_1(%arg0: i32, %arg1: i32) -> (i32, i32) {
    %c0_i32 = arith.constant 0 : i32
    %c0_i32_0 = arith.constant 0 : i32
    return %c0_i32, %arg1 : i32, i32
  }
  func.func @transform_2(%arg0: i32, %arg1: i32) -> (i32, i32) {
    %c0_i32 = arith.constant 0 : i32
    %c0_i32_0 = arith.constant 0 : i32
    return %c0_i32, %arg1 : i32, i32
  }
  func.func @transform_3(%arg0: i32, %arg1: i32) -> (i32, i32) {
    %c0_i32 = arith.constant 0 : i32
    %c0_i32_0 = arith.constant 0 : i32
    return %arg1, %c0_i32 : i32, i32
  }
  func.func @transform_4(%arg0: i32, %arg1: i32) -> (i32, i32) {
    %c0_i32 = arith.constant 0 : i32
    %c0_i32_0 = arith.constant 0 : i32
    %c0_i32_1 = arith.constant 0 : i32
    return %c0_i32, %c0_i32_0 : i32, i32
  }
  func.func @transform_5(%arg0: i32, %arg1: i32) -> (i32, i32) {
    %c0_i32 = arith.constant 0 : i32
    %c0_i32_0 = arith.constant 0 : i32
    return %arg0, %c0_i32 : i32, i32
  }
}

</mosaic_0001>

<bundles_post_ra>
// kernel: tpu_custom_call.1
= control target key start
LH: loop header
LB: loop body
LE: loop exit
PB: predicated region body
PF: predicated region fallthrough
CT: control target
= control target key end

     0   :  { %s7616_s0 = inlined_call_operand.hbm [shape: bf16[256,384], index: 0, kind: input, shape index: {}]   ;;  %s7617_s1 = inlined_call_operand.hbm [shape: bf16[384,1536], index: 1, kind: input, shape index: {}]   ;;  %s7618_s2 = inlined_call_operand.hbm [shape: f32[1,1536], index: 2, kind: input, shape index: {}]   ;;  %s7619_s3 = inlined_call_operand.hbm [shape: bf16[1536,384], index: 3, kind: input, shape index: {}]   ;;  %s7620_s4 = inlined_call_operand.hbm [shape: f32[1,384], index: 4, kind: input, shape index: {}]   ;;  %s7621_s5 = inlined_call_operand.hbm [shape: f32[256,384], index: 5, kind: output, shape index: {}]  }
   0x1   :  { %7657 = sst [smem:[#allocation40_spill]] %s7617_s1 }
   0x2   :  { %7658 = sst [smem:[#allocation41_spill]] %s7620_s4 }
   0x3   :  { %10 = vsyncpa [#allocation4], 0 }
   0x4   :  { %11 = vsyncpa [#allocation7], 0 }
   0x5   :  { %13 = vsyncpa [#allocation7 + $0x1], 0 }
   0x6   :  { %14 = vsyncpa [#allocation10], 0 }
   0x7   :  { %16 = vsyncpa [#allocation10 + $0x1], 0 }
   0x8   :  { %17 = vsyncpa [#allocation5], 0  ;;  %s5655_s18 = smov 0   ;;  %s5657_s19 = smov 0  }
   0x9   :  { %s5659_s20 = smov 0   ;;  %s5661_s21 = smov 0  }
   0xa   :  { %s5663_s22 = smov 0   ;;  %s5665_s23 = smov 0  }
   0xb LB: > { %s5684_s24 = sadd.s32 4294967295, %s5608_s23   ;;  %s68_s25 = sadd.s32 1, %s5596_s20  ;;  %s5608_s23 = sphi %s5665_s23, %s23_s23   ;;  %s5604_s22 = sphi %s5663_s22, %s7759_s22   ;;  %s5600_s21 = sphi %s5661_s21, %s7758_s21   ;;  %s5596_s20 = sphi %s5659_s20, %s7757_s20   ;;  %s5592_s19 = sphi %s5657_s19, %s7756_s19   ;;  %s5588_s18 = sphi %s5655_s18, %s7755_s18  }
   0xc   : > { %p75_p0 = scmp.ne.s32.totalorder %s5596_s20, %s5592_s19  ;;  %p76_p1 = scmp.eq.s32.totalorder %s5608_s23, 0 }
   0xd   : > { %p81_p2 = scmp.ne.s32.totalorder %s5592_s19, %s5588_s18  ;;  %p7622_p3 = scmp.eq.s32.totalorder %s5684_s24, 0 }
   0xe   : > { %p77_p4 = por %p76_p1, %p75_p0  ;;  %p4434_p5 = scmp.ge.s32.totalorder %s5608_s23, 1 }
   0xf   : > { %p5695_p6 = por %p7622_p3, %p81_p2  ;;  %p191_p7 = scmp.lt.s32.totalorder %s5608_s23, 4 }
  0x10   : > { %s5610_s28 = smov [#allocation11]   ;;  %p4979_p10 = scmp.lt.s32.totalorder %s5608_s23, 3 }
  0x11   : > { %p5700_p8 = pnand %p4434_p5, %p191_p7  ;;  %s221_s29 = sshll.u32 %s5610_s28, 4  ;;  %s222_s29 = int_to_ptr.vmem [resolvable:$true] %s221_s29 }
  0x12   : > { %s7623_s30 = sand.u32 1, %s5608_s23   ;;  %p5714_p12 = pnand %p4979_p10, %p77_p4 }
  0x13   : > { %p4960_p9 = pneg %p5700_p8  ;;  %s5393_s8 = scalar_lea.vmem %s222_s29, 48 }
  0x14   : > { %p5394_p0 = scmp.ne.s32.totalorder %s222_s29, %s5393_s8  ;;  %s5400_s9 = scalar_lea.vmem %s222_s29, 64 }
  0x15   : > { %p5710_p11 = pnand %p4960_p9, %p7622_p3  ;;  %p5401_p5 = scmp.lt.s32.totalorder %s222_s29, %s222_s29 }
  0x16   : > { %p5402_p7 = scmp.lt.s32.totalorder %s5400_s9, %s5393_s8 }
  0x17   : > { %p5384_p13 = pneg %p5710_p11 }
  0x18   : > { %p5403_p9 = por %p5402_p7, %p5401_p5 }
  0x19   : > { %p5396_p1 = pnand %p5394_p0, %p5384_p13 }
  0x1b   : > { %p5397_p2 = pneg %p5396_p1 }
  0x1d   : > { %p5404_p3 = pnand %p5403_p9, %p5397_p2 }
  0x1f   : > { %5407 = shalt.err (!%p5404_p3)
}
  0x20   : > { %s7663_s4 = sld [smem:[#allocation41_spill]]  ;;  %s32_s12 = sadd.s32 1, %s5604_s22 }
  0x21   : > { %s7624_s13 = sand.u32 1, %s5596_s20   ;;  %p33_p4 = scmp.ge.s32.totalorder %s32_s12, 3 }
  0x22   : > { %s5732_s14 = smul.u32 768, %s7624_s13  ;;  %s4696_s15 = sshll.u32 %s5604_s22, 8 }
  0x23   : > { %s7761_s12 = smov (%p33_p4, %s32_s12), 0  ;;  %s7665_s1 = sld [smem:[#allocation40_spill]] }
  0x24   : > { %7664 = sst [smem:[#allocation18_spill]] %s7761_s12  ;;  %s65_s28 = ssub.s32 %s5604_s22, %s7761_s12 }
  0x25   : > { %s236_s8 = scalar_lea.vmem [#allocation6], %s5732_s14  ;;  %p66_p3 = scmp.eq.s32.totalorder %s65_s28, 0 }
  0x26   : > { %4966 = dma.hbm_to_vmem [thread:$0]  (!%p5710_p11), %s7663_s4, 48, %s222_s29, [#allocation10]  }
  0x27   : > { %s243_s29 = sshll.u32 %s236_s8, 4  ;;  %s5752_s10 = scalar_lea.sflag [#allocation7], %s7623_s30  ;;  %s244_s29 = int_to_ptr.vmem [resolvable:$true] %s243_s29 }
  0x28   : > { %s5748_s9 = scalar_select %p66_p3, %s5596_s20, %s68_s25  }
  0x29   : > { %s5740_s18 = scalar_lea.hbm %s7665_s1, %s4696_s15  ;;  %p5410_p10 = pneg %p5714_p12 }
  0x2a   : > { %7666 = sst [smem:[#allocation19_spill]] %s5748_s9  ;;  %s5421_s11 = scalar_lea.vmem %s244_s29, 12288 }
  0x2b   : > { %p5422_p0 = scmp.ne.s32.totalorder %s244_s29, %s5421_s11  ;;  %s5611_s15 = smov [#allocation6]  }
  0x2c   : > { %s5426_s16 = sshll.u32 %s5611_s15, 4  ;;  %s5427_s16 = int_to_ptr.vmem [resolvable:$false] %s5426_s16 }
  0x2d   : > { %p5424_p1 = pnand %p5422_p0, %p5410_p10  ;;  %s5428_s17 = scalar_lea.vmem %s5427_s16, 24576 }
  0x2e   : > { %p5429_p5 = scmp.lt.s32.totalorder %s244_s29, %s5427_s16  ;;  %p5430_p7 = scmp.lt.s32.totalorder %s5428_s17, %s5421_s11 }
  0x2f   : > { %p5425_p2 = pneg %p5424_p1 }
  0x30   : > { %p5431_p9 = por %p5430_p7, %p5429_p5 }
  0x32   : > { %p5432_p4 = pnand %p5431_p9, %p5425_p2 }
  0x34   : > { %5435 = shalt.err (!%p5432_p4)
}
  0x35   : > { %s5612_s25 = smov 768   ;;  %s5613_s28 = smov 256  }
  0x36   : > { %s5614_s8 = smov 16   ;;  %s5615_s30 = smov [#allocation3]  }
  0x37   : > { %4970 = dma.hbm_to_vmem [thread:$0]  (!%p5714_p12), %s5740_s18, 12288, %s244_s29, %s5752_s10, %s5612_s25, %s5613_s28, %s5614_s8  }
  0x38   : > { %s207_s13 = sshll.u32 %s5615_s30, 4  ;;  %s7667_s15 = sand.u32 1, %s5596_s20   ;;  %s208_s13 = int_to_ptr.vmem [resolvable:$true] %s207_s13 }
  0x39   : > { %s4440_s1 = sshll.u32 %s7667_s15, 2  ;;  %s5447_s16 = scalar_lea.vmem %s208_s13, 6144 }
  0x3a   : > { %p5448_p3 = scmp.ne.s32.totalorder %s208_s13, %s5447_s16  ;;  %p5455_p2 = scmp.lt.s32.totalorder %s208_s13, %s208_s13 }
  0x3b   : > { %p5456_p5 = scmp.lt.s32.totalorder %s5447_s16, %s5447_s16 }
  0x3c   : > { %p5450_p0 = pnand %p5448_p3, %p5384_p13 }
  0x3d   : > { %p5457_p7 = por %p5456_p5, %p5455_p2 }
  0x3e   : > { %p5451_p1 = pneg %p5450_p0 }
  0x40   : > { %p5458_p9 = pnand %p5457_p7, %p5451_p1 }
  0x42   : > { %5461 = shalt.err (!%p5458_p9)
}
  0x43   : > { %s5616_s11 = smov 192   ;;  %s5617_s18 = smov 12  }
  0x44   : > { %4963 = dma.hbm_to_vmem [thread:$0]  (!%p5710_p11), %s7616_s0, 6144, %s208_s13, [#allocation4], %s5616_s11, %s5616_s11, %s5617_s18  }
  0x45   : > { %s4697_s17 = sshll.u32 %s5604_s22, 6  ;;  %s257_s15 = scalar_lea.vmem [#allocation8], %s4440_s1 }
  0x46   : > { %s263_s8 = scalar_lea.hbm %s7618_s2, %s4697_s17  ;;  %s265_s16 = sshll.u32 %s257_s15, 4  ;;  %s266_s16 = int_to_ptr.vmem [resolvable:$true] %s265_s16 }
  0x47   : > { %s5475_s4 = scalar_lea.vmem %s266_s16, 64  ;;  %s5618_s6 = smov [#allocation8]  }
  0x48   : > { %p5476_p13 = scmp.ne.s32.totalorder %s266_s16, %s5475_s4  ;;  %s5480_s12 = sshll.u32 %s5618_s6, 4  ;;  %s5481_s12 = int_to_ptr.vmem [resolvable:$false] %s5480_s12 }
  0x49   : > { %s5482_s9 = scalar_lea.vmem %s5481_s12, 128  ;;  %p5483_p0 = scmp.lt.s32.totalorder %s266_s16, %s5481_s12 }
  0x4a   : > { %p5478_p4 = pnand %p5476_p13, %p5410_p10  ;;  %p5484_p11 = scmp.lt.s32.totalorder %s5482_s9, %s5475_s4 }
  0x4c   : > { %p5479_p3 = pneg %p5478_p4  ;;  %p5485_p1 = por %p5484_p11, %p5483_p0 }
  0x4e   : > { %p5486_p2 = pnand %p5485_p1, %p5479_p3 }
  0x50   : > { %5489 = shalt.err (!%p5486_p2)
}
  0x51   : > { %4973 = dma.hbm_to_vmem [thread:$0]  (!%p5714_p12), %s263_s8, 64, %s266_s16, %s5752_s10  }
  0x52   : > { %s4940_s1 = smul.u32 12288, %s5604_s22  ;;  %s276_s13 = scalar_lea.vmem [#allocation9], %s5732_s14 }
  0x53   : > { %s284_s30 = sshll.u32 %s276_s13, 4  ;;  %s7668_s4 = sand.u32 1, %s5608_s23   ;;  %s285_s30 = int_to_ptr.vmem [resolvable:$true] %s284_s30 }
  0x54   : > { %s283_s25 = scalar_lea.hbm %s7619_s3, %s4940_s1  ;;  %s273_s12 = scalar_lea.sflag [#allocation10], %s7668_s4 }
  0x55   : > { %s5503_s9 = scalar_lea.vmem %s285_s30, 12288  ;;  %s5619_s28 = smov [#allocation9]  }
  0x56   : > { %p5504_p5 = scmp.ne.s32.totalorder %s285_s30, %s5503_s9  ;;  %s5508_s15 = sshll.u32 %s5619_s28, 4  ;;  %s5509_s15 = int_to_ptr.vmem [resolvable:$false] %s5508_s15 }
  0x57   : > { %s5510_s10 = scalar_lea.vmem %s5509_s15, 24576  ;;  %p5511_p13 = scmp.lt.s32.totalorder %s285_s30, %s5509_s15 }
  0x58   : > { %p5506_p7 = pnand %p5504_p5, %p5410_p10  ;;  %p5512_p4 = scmp.lt.s32.totalorder %s5510_s10, %s5503_s9 }
  0x5a   : > { %p5507_p9 = pneg %p5506_p7  ;;  %p5513_p3 = por %p5512_p4, %p5511_p13 }
  0x5c   : > { %p5514_p0 = pnand %p5513_p3, %p5507_p9 }
  0x5e   : > { %5517 = shalt.err (!%p5514_p0)
}
  0x5f   : > { %4976 = dma.hbm_to_vmem [thread:$0]  (!%p5714_p12), %s283_s25, 12288, %s285_s30, %s273_s12, %s5616_s11, %s5616_s11, %s5617_s18  }
  0x60   : > { %296 = sbr.rel (%p5700_p8) target bundleno = 1081 (0x439), region = 40 }
  0x65   : > { %p7669_p10 = scmp.eq.s32.totalorder %s5684_s24, 0 }
  0x67   : > { %5567 = dma.done.wait (%p7669_p10), [#allocation4], 6144   ;;  %p7670_p11 = pmov %p7669_p10 }
  0x68   : > { %s302_s14 = sand.u32 1, %s5684_s24   ;;  %s304_s8 = sand.u32 1, %s5592_s19  }
  0x69   : > { %5569 = vsyncadd (%p7670_p11), [#allocation4], 4294961152  ;;  %s4941_s16 = smul.u32 768, %s304_s8  ;;  %s303_s7 = scalar_lea.sflag [#allocation7], %s302_s14 }
  0x6b   : > { %s5809_s6 = scalar_lea.vmem [#allocation6], %s4941_s16 }
  0x6c   : > { %5571 = dma.done.wait (%p5695_p6), %s303_s7, 12352  }
  0x6d   : > { %5573 = vsyncadd (%p5695_p6), %s303_s7, 4294954944  ;;  %s5815_s27 = sshll.u32 %s304_s8, 2  ;;  %s321_s18 = scalar_lea.sflag [#allocation10], %s302_s14 }
  0x6e   : > { %s315_s11 = scalar_lea.vmem [#allocation8], %s5815_s27  ;;  %s5818_s1 = scalar_lea.vmem [#allocation9], %s4941_s16 }
  0x6f   : > { %5575 = dma.done.wait (%p5695_p6), %s321_s18, 12288  }
  0x70   : > { %5577 = vsyncadd (%p5695_p6), %s321_s18, 4294955008  ;;  %p7671_p8 = pmov %p7669_p10 }
  0x72   : > { %5579 = dma.done.wait (%p7671_p8), [#allocation10], 48   ;;  %p7672_p12 = pmov %p7671_p8 }
  0x73   : > { %p4450_p1 = scmp.ne.s32.totalorder %s5600_s21, 0 }
  0x74   : > { %5581 = vsyncadd (%p7672_p12), [#allocation10], 4294967248 }
  0x75   : > { %369 = sbr.rel (%p4450_p1) target bundleno = 171 (0xab), region = 64 }
  0x7a   : > { %v5620_v0 = vmov 0.0  }
  0x7b   : > { %370 = vst [vmem:[#allocation2 + $0x2b0] sm:$0xff] %v5620_v0  ;;  %371 = vst [vmem:[#allocation2 + $0xd0] sm:$0xff] %v5620_v0 }
  0x7c   : > { %372 = vst [vmem:[#allocation2 + $0x10] sm:$0xff] %v5620_v0  ;;  %373 = vst [vmem:[#allocation2 + $0x48] sm:$0xff] %v5620_v0 }
  0x7d   : > { %374 = vst [vmem:[#allocation2 + $0x30] sm:$0xff] %v5620_v0  ;;  %375 = vst [vmem:[#allocation2 + $0xf0] sm:$0xff] %v5620_v0 }
  0x7e   : > { %376 = vst [vmem:[#allocation2 + $0xf8] sm:$0xff] %v5620_v0  ;;  %377 = vst [vmem:[#allocation2 + $0x78] sm:$0xff] %v5620_v0 }
  0x7f   : > { %378 = vst [vmem:[#allocation2 + $0x128] sm:$0xff] %v5620_v0  ;;  %379 = vst [vmem:[#allocation2 + $0xe0] sm:$0xff] %v5620_v0 }
  0x80   : > { %380 = vst [vmem:[#allocation2 + $0x2f8] sm:$0xff] %v5620_v0  ;;  %381 = vst [vmem:[#allocation2 + $0x2b8] sm:$0xff] %v5620_v0 }
  0x81   : > { %382 = vst [vmem:[#allocation2 + $0x2a0] sm:$0xff] %v5620_v0  ;;  %383 = vst [vmem:[#allocation2 + $0x168] sm:$0xff] %v5620_v0 }
  0x82   : > { %384 = vst [vmem:[#allocation2 + $0x178] sm:$0xff] %v5620_v0  ;;  %385 = vst [vmem:[#allocation2 + $0x40] sm:$0xff] %v5620_v0 }
  0x83   : > { %386 = vst [vmem:[#allocation2] sm:$0xff] %v5620_v0  ;;  %387 = vst [vmem:[#allocation2 + $0x248] sm:$0xff] %v5620_v0 }
  0x84   : > { %388 = vst [vmem:[#allocation2 + $0xe8] sm:$0xff] %v5620_v0  ;;  %389 = vst [vmem:[#allocation2 + $0x68] sm:$0xff] %v5620_v0 }
  0x85   : > { %390 = vst [vmem:[#allocation2 + $0x228] sm:$0xff] %v5620_v0  ;;  %391 = vst [vmem:[#allocation2 + $0xa8] sm:$0xff] %v5620_v0 }
  0x86   : > { %392 = vst [vmem:[#allocation2 + $0x20] sm:$0xff] %v5620_v0  ;;  %393 = vst [vmem:[#allocation2 + $0x1b0] sm:$0xff] %v5620_v0 }
  0x87   : > { %394 = vst [vmem:[#allocation2 + $0x220] sm:$0xff] %v5620_v0  ;;  %395 = vst [vmem:[#allocation2 + $0x258] sm:$0xff] %v5620_v0 }
  0x88   : > { %396 = vst [vmem:[#allocation2 + $0x238] sm:$0xff] %v5620_v0  ;;  %397 = vst [vmem:[#allocation2 + $0x130] sm:$0xff] %v5620_v0 }
  0x89   : > { %398 = vst [vmem:[#allocation2 + $0x158] sm:$0xff] %v5620_v0  ;;  %399 = vst [vmem:[#allocation2 + $0x98] sm:$0xff] %v5620_v0 }
  0x8a   : > { %400 = vst [vmem:[#allocation2 + $0x2e0] sm:$0xff] %v5620_v0  ;;  %401 = vst [vmem:[#allocation2 + $0x1a8] sm:$0xff] %v5620_v0 }
  0x8b   : > { %402 = vst [vmem:[#allocation2 + $0x1b8] sm:$0xff] %v5620_v0  ;;  %403 = vst [vmem:[#allocation2 + $0x80] sm:$0xff] %v5620_v0 }
  0x8c   : > { %404 = vst [vmem:[#allocation2 + $0x188] sm:$0xff] %v5620_v0  ;;  %405 = vst [vmem:[#allocation2 + $0x208] sm:$0xff] %v5620_v0 }
  0x8d   : > { %406 = vst [vmem:[#allocation2 + $0x38] sm:$0xff] %v5620_v0  ;;  %407 = vst [vmem:[#allocation2 + $0x190] sm:$0xff] %v5620_v0 }
  0x8e   : > { %408 = vst [vmem:[#allocation2 + $0x218] sm:$0xff] %v5620_v0  ;;  %409 = vst [vmem:[#allocation2 + $0x250] sm:$0xff] %v5620_v0 }
  0x8f   : > { %410 = vst [vmem:[#allocation2 + $0x1c8] sm:$0xff] %v5620_v0  ;;  %411 = vst [vmem:[#allocation2 + $0x280] sm:$0xff] %v5620_v0 }
  0x90   : > { %412 = vst [vmem:[#allocation2 + $0x100] sm:$0xff] %v5620_v0  ;;  %413 = vst [vmem:[#allocation2 + $0xb8] sm:$0xff] %v5620_v0 }
  0x91   : > { %414 = vst [vmem:[#allocation2 + $0x288] sm:$0xff] %v5620_v0  ;;  %415 = vst [vmem:[#allocation2 + $0x60] sm:$0xff] %v5620_v0 }
  0x92   : > { %416 = vst [vmem:[#allocation2 + $0x210] sm:$0xff] %v5620_v0  ;;  %417 = vst [vmem:[#allocation2 + $0x50] sm:$0xff] %v5620_v0 }
  0x93   : > { %418 = vst [vmem:[#allocation2 + $0x1e8] sm:$0xff] %v5620_v0  ;;  %419 = vst [vmem:[#allocation2 + $0x2d0] sm:$0xff] %v5620_v0 }
  0x94   : > { %420 = vst [vmem:[#allocation2 + $0x1f0] sm:$0xff] %v5620_v0  ;;  %421 = vst [vmem:[#allocation2 + $0x28] sm:$0xff] %v5620_v0 }
  0x95   : > { %422 = vst [vmem:[#allocation2 + $0x138] sm:$0xff] %v5620_v0  ;;  %423 = vst [vmem:[#allocation2 + $0xc8] sm:$0xff] %v5620_v0 }
  0x96   : > { %424 = vst [vmem:[#allocation2 + $0x58] sm:$0xff] %v5620_v0  ;;  %425 = vst [vmem:[#allocation2 + $0x1c0] sm:$0xff] %v5620_v0 }
  0x97   : > { %426 = vst [vmem:[#allocation2 + $0x298] sm:$0xff] %v5620_v0  ;;  %427 = vst [vmem:[#allocation2 + $0x70] sm:$0xff] %v5620_v0 }
  0x98   : > { %428 = vst [vmem:[#allocation2 + $0x18] sm:$0xff] %v5620_v0  ;;  %429 = vst [vmem:[#allocation2 + $0x120] sm:$0xff] %v5620_v0 }
  0x99   : > { %430 = vst [vmem:[#allocation2 + $0x240] sm:$0xff] %v5620_v0  ;;  %431 = vst [vmem:[#allocation2 + $0x180] sm:$0xff] %v5620_v0 }
  0x9a   : > { %432 = vst [vmem:[#allocation2 + $0x1f8] sm:$0xff] %v5620_v0  ;;  %433 = vst [vmem:[#allocation2 + $0x1a0] sm:$0xff] %v5620_v0 }
  0x9b   : > { %434 = vst [vmem:[#allocation2 + $0xa0] sm:$0xff] %v5620_v0  ;;  %435 = vst [vmem:[#allocation2 + $0x278] sm:$0xff] %v5620_v0 }
  0x9c   : > { %436 = vst [vmem:[#allocation2 + $0x8] sm:$0xff] %v5620_v0  ;;  %437 = vst [vmem:[#allocation2 + $0x2c0] sm:$0xff] %v5620_v0 }
  0x9d   : > { %438 = vst [vmem:[#allocation2 + $0x270] sm:$0xff] %v5620_v0  ;;  %439 = vst [vmem:[#allocation2 + $0x290] sm:$0xff] %v5620_v0 }
  0x9e   : > { %440 = vst [vmem:[#allocation2 + $0x2a8] sm:$0xff] %v5620_v0  ;;  %441 = vst [vmem:[#allocation2 + $0x2f0] sm:$0xff] %v5620_v0 }
  0x9f   : > { %442 = vst [vmem:[#allocation2 + $0x1e0] sm:$0xff] %v5620_v0  ;;  %443 = vst [vmem:[#allocation2 + $0x150] sm:$0xff] %v5620_v0 }
  0xa0   : > { %444 = vst [vmem:[#allocation2 + $0x2c8] sm:$0xff] %v5620_v0  ;;  %445 = vst [vmem:[#allocation2 + $0x1d0] sm:$0xff] %v5620_v0 }
  0xa1   : > { %446 = vst [vmem:[#allocation2 + $0x140] sm:$0xff] %v5620_v0  ;;  %447 = vst [vmem:[#allocation2 + $0x230] sm:$0xff] %v5620_v0 }
  0xa2   : > { %448 = vst [vmem:[#allocation2 + $0x160] sm:$0xff] %v5620_v0  ;;  %449 = vst [vmem:[#allocation2 + $0x2d8] sm:$0xff] %v5620_v0 }
  0xa3   : > { %450 = vst [vmem:[#allocation2 + $0xc0] sm:$0xff] %v5620_v0  ;;  %451 = vst [vmem:[#allocation2 + $0x170] sm:$0xff] %v5620_v0 }
  0xa4   : > { %452 = vst [vmem:[#allocation2 + $0x90] sm:$0xff] %v5620_v0  ;;  %453 = vst [vmem:[#allocation2 + $0xb0] sm:$0xff] %v5620_v0 }
  0xa5   : > { %454 = vst [vmem:[#allocation2 + $0x200] sm:$0xff] %v5620_v0  ;;  %455 = vst [vmem:[#allocation2 + $0xd8] sm:$0xff] %v5620_v0 }
  0xa6   : > { %456 = vst [vmem:[#allocation2 + $0x1d8] sm:$0xff] %v5620_v0  ;;  %457 = vst [vmem:[#allocation2 + $0x2e8] sm:$0xff] %v5620_v0 }
  0xa7   : > { %458 = vst [vmem:[#allocation2 + $0x260] sm:$0xff] %v5620_v0  ;;  %459 = vst [vmem:[#allocation2 + $0x268] sm:$0xff] %v5620_v0 }
  0xa8   : > { %460 = vst [vmem:[#allocation2 + $0x88] sm:$0xff] %v5620_v0  ;;  %461 = vst [vmem:[#allocation2 + $0x110] sm:$0xff] %v5620_v0 }
  0xa9   : > { %462 = vst [vmem:[#allocation2 + $0x108] sm:$0xff] %v5620_v0  ;;  %463 = vst [vmem:[#allocation2 + $0x198] sm:$0xff] %v5620_v0 }
  0xaa   : > { %464 = vst [vmem:[#allocation2 + $0x148] sm:$0xff] %v5620_v0  ;;  %465 = vst [vmem:[#allocation2 + $0x118] sm:$0xff] %v5620_v0 }
  0xab PF: > { %v5044_v1 = vld [vmem:[%s5809_s6 + $0xe4] ss:$16 sps:$4 sm:$0xff]   ;;  %v5621_v3 = vmov 0   ;;  %v5048_v4 = vld [vmem:[%s5809_s6 + $0xe0] ss:$16 sps:$4 sm:$0xff]   ;;  %p4691_p6 = scmp.ne.s32.totalorder %s5600_s21, 2 }
  0xac   : > { %v5046_v2 = vld [vmem:[%s5809_s6 + $0x2e4] ss:$16 sps:$4 sm:$0xff]   ;;  %1609 = vmatprep.mubr.bf16.mxu1 %v5621_v3  ;;  %1384 = vmatprep.subr.bf16.mxu0 %v5044_v1  ;;  %v5049_v5 = vld [vmem:[%s5809_s6 + $0x2e0] ss:$16 sps:$4 sm:$0xff]   ;;  %v5120_v40 = vld [vmem:[%s5809_s6 + $0xe8] ss:$16 sps:$4 sm:$0xff]  }
  0xad   : > { %1577 = vmatprep.subr.bf16.mxu1 %v5046_v2  ;;  %v5050_v6 = vld [vmem:[%s5809_s6 + $0xc4] ss:$16 sps:$4 sm:$0xff]   ;;  %1385 = vmatpush1.bf16.msra.mxu0 %v5048_v4  ;;  %v5054_v8 = vld [vmem:[%s5809_s6 + $0xc0] ss:$16 sps:$4 sm:$0xff]   ;;  %v5122_v41 = vld [vmem:[%s5809_s6 + $0xec] ss:$16 sps:$4 sm:$0xff]  }
  0xae   : > { %1578 = vmatpush1.bf16.msra.mxu1 %v5049_v5  ;;  %v5052_v7 = vld [vmem:[%s5809_s6 + $0x2c4] ss:$16 sps:$4 sm:$0xff]   ;;  %1386 = vmatprep.subr.bf16.mxu0 %v5050_v6  ;;  %v5055_v9 = vld [vmem:[%s5809_s6 + $0x2c0] ss:$16 sps:$4 sm:$0xff]   ;;  %v5130_v46 = vld [vmem:[%s5809_s6 + $0xc8] ss:$16 sps:$4 sm:$0xff]  }
  0xaf   : > { %1579 = vmatprep.subr.bf16.mxu1 %v5052_v7  ;;  %v5056_v10 = vld [vmem:[%s5809_s6 + $0xa4] ss:$16 sps:$4 sm:$0xff]   ;;  %v5060_v12 = vld [vmem:[%s5809_s6 + $0xa0] ss:$16 sps:$4 sm:$0xff]   ;;  %v5132_v47 = vld [vmem:[%s5809_s6 + $0xcc] ss:$16 sps:$4 sm:$0xff]  }
  0xb0   : > { %v5058_v11 = vld [vmem:[%s5809_s6 + $0x2a4] ss:$16 sps:$4 sm:$0xff]   ;;  %v5061_v13 = vld [vmem:[%s5809_s6 + $0x2a0] ss:$16 sps:$4 sm:$0xff]   ;;  %v5139_v50 = vld [vmem:[%s5809_s6 + $0xac] ss:$16 sps:$4 sm:$0xff]  }
  0xb1   : > { %1387 = vmatpush1.bf16.msra.mxu0 %v5054_v8  ;;  %v5062_v14 = vld [vmem:[%s5809_s6 + $0x84] ss:$16 sps:$4 sm:$0xff]   ;;  %v5066_v16 = vld [vmem:[%s5809_s6 + $0x80] ss:$16 sps:$4 sm:$0xff]   ;;  %v5137_v51 = vld [vmem:[%s5809_s6 + $0xa8] ss:$16 sps:$4 sm:$0xff]  }
  0xb2   : > { %1580 = vmatpush1.bf16.msra.mxu1 %v5055_v9  ;;  %1388 = vmatprep.subr.bf16.mxu0 %v5056_v10  ;;  %v5064_v15 = vld [vmem:[%s5809_s6 + $0x284] ss:$16 sps:$4 sm:$0xff]   ;;  %v5067_v17 = vld [vmem:[%s5809_s6 + $0x280] ss:$16 sps:$4 sm:$0xff]   ;;  %v5147_v55 = vld [vmem:[%s5809_s6 + $0x88] ss:$16 sps:$4 sm:$0xff]  }
  0xb3   : > { %1581 = vmatprep.subr.bf16.mxu1 %v5058_v11  ;;  %v5068_v18 = vld [vmem:[%s5809_s6 + $0x64] ss:$16 sps:$4 sm:$0xff]   ;;  %v5072_v20 = vld [vmem:[%s5809_s6 + $0x60] ss:$16 sps:$4 sm:$0xff]   ;;  %v5149_v56 = vld [vmem:[%s5809_s6 + $0x8c] ss:$16 sps:$4 sm:$0xff]  }
  0xb4   : > { %v5070_v19 = vld [vmem:[%s5809_s6 + $0x264] ss:$16 sps:$4 sm:$0xff]   ;;  %v5073_v21 = vld [vmem:[%s5809_s6 + $0x260] ss:$16 sps:$4 sm:$0xff]   ;;  %v5154_v59 = vld [vmem:[%s5809_s6 + $0x68] ss:$16 sps:$4 sm:$0xff]  }
  0xb5   : > { %1389 = vmatpush1.bf16.msra.mxu0 %v5060_v12  ;;  %v5074_v22 = vld [vmem:[%s5809_s6 + $0x44] ss:$16 sps:$4 sm:$0xff]   ;;  %v5078_v24 = vld [vmem:[%s5809_s6 + $0x40] ss:$16 sps:$4 sm:$0xff]   ;;  %v5156_v60 = vld [vmem:[%s5809_s6 + $0x6c] ss:$16 sps:$4 sm:$0xff]  }
  0xb6   : > { %1582 = vmatpush1.bf16.msra.mxu1 %v5061_v13  ;;  %1390 = vmatprep.subr.bf16.mxu0 %v5062_v14  ;;  %v5076_v23 = vld [vmem:[%s5809_s6 + $0x244] ss:$16 sps:$4 sm:$0xff]   ;;  %v5079_v25 = vld [vmem:[%s5809_s6 + $0x240] ss:$16 sps:$4 sm:$0xff]   ;;  %v5164_v0 = vld [vmem:[%s5809_s6 + $0x48] ss:$16 sps:$4 sm:$0xff]  }
  0xb7   : > { %1583 = vmatprep.subr.bf16.mxu1 %v5064_v15  ;;  %v5080_v26 = vld [vmem:[%s5809_s6 + $0x24] ss:$16 sps:$4 sm:$0xff]   ;;  %v5084_v28 = vld [vmem:[%s5809_s6 + $0x20] ss:$16 sps:$4 sm:$0xff]   ;;  %v5166_v1 = vld [vmem:[%s5809_s6 + $0x4c] ss:$16 sps:$4 sm:$0xff]  }
  0xb8   : > { %v5082_v27 = vld [vmem:[%s5809_s6 + $0x224] ss:$16 sps:$4 sm:$0xff]   ;;  %v5085_v29 = vld [vmem:[%s5809_s6 + $0x220] ss:$16 sps:$4 sm:$0xff]   ;;  %v5129_v6 = vld [vmem:[%s5809_s6 + $0x2ec] ss:$16 sps:$4 sm:$0xff]  }
  0xb9   : > { %1391 = vmatpush1.bf16.msra.mxu0 %v5066_v16  ;;  %v5086_v30 = vld [vmem:[%s5809_s6 + $0x4] ss:$16 sps:$4 sm:$0xff]   ;;  %v5090_v32 = vld [vmem:[%s5809_s6] ss:$16 sps:$4 sm:$0xff]   ;;  %v5171_v7 = vld [vmem:[%s5809_s6 + $0x28] ss:$16 sps:$4 sm:$0xff]  }
  0xba   : > { %1584 = vmatpush1.bf16.msra.mxu1 %v5067_v17  ;;  %1392 = vmatprep.subr.bf16.mxu0 %v5068_v18  ;;  %v5088_v31 = vld [vmem:[%s5809_s6 + $0x204] ss:$16 sps:$4 sm:$0xff]   ;;  %v5091_v33 = vld [vmem:[%s5809_s6 + $0x200] ss:$16 sps:$4 sm:$0xff]   ;;  %v5173_v8 = vld [vmem:[%s5809_s6 + $0x2c] ss:$16 sps:$4 sm:$0xff]  }
  0xbb   : > { %1585 = vmatprep.subr.bf16.mxu1 %v5070_v19  ;;  %v5092_v34 = vld [vmem:[%s5809_s6 + $0x1e4] ss:$16 sps:$4 sm:$0xff]   ;;  %v5095_v36 = vld [vmem:[%s5809_s6 + $0x1e0] ss:$16 sps:$4 sm:$0xff]   ;;  %v5127_v9 = vld [vmem:[%s5809_s6 + $0x2e8] ss:$16 sps:$4 sm:$0xff]  }
  0xbc   : > { %v5094_v35 = vld [vmem:[#allocation3 + $0x8] ss:$12 sps:$4 sm:$0xff]   ;;  %v5098_v38 = vld [vmem:[%s5809_s6 + $0x1c0] ss:$16 sps:$4 sm:$0xff]   ;;  %v5978_v52 = vld [vmem:[#allocation3 + $0x38] ss:$12 sps:$4 sm:$0xff]  }
  0xbd   : > { %1393 = vmatpush1.bf16.msra.mxu0 %v5072_v20  ;;  %v5096_v37 = vld [vmem:[%s5809_s6 + $0x1c4] ss:$16 sps:$4 sm:$0xff]   ;;  %v5101_v43 = vld [vmem:[#allocation3 + $0x20] ss:$12 sps:$4 sm:$0xff]   ;;  %v5990_v61 = vld [vmem:[#allocation3 + $0x50] ss:$12 sps:$4 sm:$0xff]  }
  0xbe   : > { %1586 = vmatpush1.bf16.msra.mxu1 %v5073_v21  ;;  %1394 = vmatprep.subr.bf16.mxu0 %v5074_v22  ;;  %v5099_v39 = vld [vmem:[%s5809_s6 + $0x1a4] ss:$16 sps:$4 sm:$0xff]   ;;  %v5102_v44 = vld [vmem:[%s5809_s6 + $0x1a0] ss:$16 sps:$4 sm:$0xff]   ;;  %v6007_v10 = vld [vmem:[#allocation3 + $0x1c] ss:$12 sps:$4 sm:$0xff]  }
  0xbf   : > { %1587 = vmatprep.subr.bf16.mxu1 %v5076_v23  ;;  %v5966_v42 = vld [vmem:[#allocation3 + $0x4] ss:$12 sps:$4 sm:$0xff]   ;;  %v5999_v4 = vld [vmem:[#allocation3] ss:$12 sps:$4 sm:$0xff]   ;;  %v6001_v5 = vld [vmem:[#allocation3 + $0x68] ss:$12 sps:$4 sm:$0xff]  }
  0xc0   : > { %v5103_v45 = vld [vmem:[%s5809_s6 + $0x184] ss:$16 sps:$4 sm:$0xff]   ;;  %1416 = vmatprep.mubr.bf16.mxu0 %v5966_v42  ;;  %v5105_v48 = vld [vmem:[%s5809_s6 + $0x180] ss:$16 sps:$4 sm:$0xff]   ;;  %v5146_v11 = vld [vmem:[%s5809_s6 + $0x2cc] ss:$16 sps:$4 sm:$0xff]  }
  0xc1   : > { %1395 = vmatpush1.bf16.msra.mxu0 %v5078_v24  ;;  %v5106_v49 = vld [vmem:[%s5809_s6 + $0x164] ss:$16 sps:$4 sm:$0xff]   ;;  %v5109_v53 = vld [vmem:[%s5809_s6 + $0x160] ss:$16 sps:$4 sm:$0xff]   ;;  %v5144_v12 = vld [vmem:[%s5809_s6 + $0x2c8] ss:$16 sps:$4 sm:$0xff]  }
  0xc2   : > { %1588 = vmatpush1.bf16.msra.mxu1 %v5079_v25  ;;  %1396 = vmatprep.subr.bf16.mxu0 %v5080_v26  ;;  %v5110_v54 = vld [vmem:[%s5809_s6 + $0x144] ss:$16 sps:$4 sm:$0xff]   ;;  %v5112_v57 = vld [vmem:[%s5809_s6 + $0x140] ss:$16 sps:$4 sm:$0xff]   ;;  %v5181_v13 = vld [vmem:[%s5809_s6 + $0x8] ss:$16 sps:$4 sm:$0xff]  }
  0xc3   : > { %1589 = vmatprep.subr.bf16.mxu1 %v5082_v27  ;;  %v5113_v58 = vld [vmem:[%s5809_s6 + $0x124] ss:$16 sps:$4 sm:$0xff]   ;;  %v5116_v62 = vld [vmem:[%s5809_s6 + $0x120] ss:$16 sps:$4 sm:$0xff]   ;;  %v5183_v14 = vld [vmem:[%s5809_s6 + $0xc] ss:$16 sps:$4 sm:$0xff]  }
  0xc4   : > { %v5117_v63 = vld [vmem:[%s5809_s6 + $0x104] ss:$16 sps:$4 sm:$0xff]   ;;  %v5119_v2 = vld [vmem:[%s5809_s6 + $0x100] ss:$16 sps:$4 sm:$0xff]   ;;  %v5163_v16 = vld [vmem:[%s5809_s6 + $0x2ac] ss:$16 sps:$4 sm:$0xff]  }
  0xc5   : > { %1397 = vmatpush1.bf16.msra.mxu0 %v5084_v28  ;;  %v6017_v15 = vld [vmem:[#allocation3 + $0x18] ss:$12 sps:$4 sm:$0xff]   ;;  %v6020_v17 = vld [vmem:[#allocation3 + $0x80] ss:$12 sps:$4 sm:$0xff]   ;;  %v6034_v25 = vld [vmem:[#allocation3 + $0x30] ss:$12 sps:$4 sm:$0xff]  }
  0xc6   : > { %1590 = vmatpush1.bf16.msra.mxu1 %v5085_v29  ;;  %1398 = vmatprep.subr.bf16.mxu0 %v5086_v30  ;;  %v6022_v18 = vld [vmem:[#allocation3 + $0x34] ss:$12 sps:$4 sm:$0xff]   ;;  %v5190_v19 = vld [vmem:[%s5809_s6 + $0x1ec] ss:$16 sps:$4 sm:$0xff]   ;;  %v5161_v20 = vld [vmem:[%s5809_s6 + $0x2a8] ss:$16 sps:$4 sm:$0xff]  }
  0xc7   : > { %1591 = vmatprep.subr.bf16.mxu1 %v5088_v31  ;;  %v5188_v21 = vld [vmem:[%s5809_s6 + $0x1e8] ss:$16 sps:$4 sm:$0xff]   ;;  %v5180_v22 = vld [vmem:[%s5809_s6 + $0x28c] ss:$16 sps:$4 sm:$0xff]  }
  0xc8   : > { %v5178_v23 = vld [vmem:[%s5809_s6 + $0x288] ss:$16 sps:$4 sm:$0xff]   ;;  %v5200_v24 = vld [vmem:[%s5809_s6 + $0x1cc] ss:$16 sps:$4 sm:$0xff]  }
  0xc9   : > { %1399 = vmatpush1.bf16.msra.mxu0 %v5090_v32  ;;  %v5198_v26 = vld [vmem:[%s5809_s6 + $0x1c8] ss:$16 sps:$4 sm:$0xff]   ;;  %v5197_v27 = vld [vmem:[%s5809_s6 + $0x26c] ss:$16 sps:$4 sm:$0xff]  }
  0xca   : > { %1592 = vmatpush1.bf16.msra.mxu1 %v5091_v33  ;;  %1400 = vmatprep.subr.bf16.mxu0 %v5092_v34  ;;  %v6038_v28 = vld [vmem:[#allocation3 + $0x98] ss:$12 sps:$4 sm:$0xff]   ;;  %v5207_v30 = vld [vmem:[%s5809_s6 + $0x1ac] ss:$16 sps:$4 sm:$0xff]   ;;  %v6050_v34 = vld [vmem:[#allocation3 + $0x48] ss:$12 sps:$4 sm:$0xff]  }
  0xcb   : > { %1770 = vmatprep.subr.bf16.mxu1 %v5122_v41  ;;  %v6040_v29 = vld [vmem:[#allocation3 + $0x4c] ss:$12 sps:$4 sm:$0xff]  }
  0xcc   : > { %v5195_v31 = vld [vmem:[%s5809_s6 + $0x268] ss:$16 sps:$4 sm:$0xff]   ;;  %v5210_v33 = vld [vmem:[%s5809_s6 + $0x18c] ss:$16 sps:$4 sm:$0xff]  }
  0xcd   : > { %1610 = vmatmul.mubr.bf16.vlgmr.msra.gmra.mxu1 %v5094_v35  ;;  %1401 = vmatpush2.bf16.msra.mxu0 %v5095_v36  ;;  %v5205_v32 = vld [vmem:[%s5809_s6 + $0x1a8] ss:$16 sps:$4 sm:$0xff]   ;;  %v5217_v36 = vld [vmem:[%s5809_s6 + $0x16c] ss:$16 sps:$4 sm:$0xff]  }
  0xce   : > { %1619 = vmatprep.mubr.bf16.mxu1 %v5621_v3  ;;  %1402 = vmatprep.subr.bf16.mxu0 %v5096_v37  ;;  %v5208_v35 = vld [vmem:[%s5809_s6 + $0x188] ss:$16 sps:$4 sm:$0xff]  }
  0xcf   : > { %1771 = vmatpush1.bf16.msra.mxu1 %v5120_v40  ;;  %v5218_v37 = vld [vmem:[%s5809_s6 + $0x248] ss:$16 sps:$4 sm:$0xff]   ;;  %v6058_v40 = vld [vmem:[#allocation3 + $0x64] ss:$12 sps:$4 sm:$0xff]  }
  0xd0   : > { %1772 = vmatprep.subr.bf16.mxu1 %v5132_v47  ;;  %v5215_v41 = vld [vmem:[%s5809_s6 + $0x168] ss:$16 sps:$4 sm:$0xff]   ;;  %v5230_v47 = vld [vmem:[%s5809_s6 + $0x12c] ss:$16 sps:$4 sm:$0xff]  }
  0xd1   : > { %1403 = vmatpush2.bf16.msra.mxu0 %v5098_v38  ;;  %v5220_v38 = vld [vmem:[%s5809_s6 + $0x24c] ss:$16 sps:$4 sm:$0xff]  }
  0xd2   : > { %1404 = vmatprep.subr.bf16.mxu0 %v5099_v39  ;;  %v6056_v39 = vld [vmem:[#allocation3 + $0xb0] ss:$12 sps:$4 sm:$0xff]  }
  0xd3   : > { %1773 = vmatpush1.bf16.msra.mxu1 %v5130_v46  ;;  %v6069_v46 = vld [vmem:[#allocation3 + $0xc8] ss:$12 sps:$4 sm:$0xff]  }
  0xd4   : > { %1774 = vmatprep.subr.bf16.mxu1 %v5139_v50  ;;  %v6074_v50 = vld [vmem:[#allocation3 + $0x7c] ss:$12 sps:$4 sm:$0xff]  }
  0xd5   : > { %1620 = vmatmul.mubr.bf16.gmra.mxu1 %v5101_v43  ;;  %1405 = vmatpush2.bf16.msra.mxu0 %v5102_v44  ;;  %v5223_v43 = vld [vmem:[%s5809_s6 + $0x14c] ss:$16 sps:$4 sm:$0xff]  }
  0xd6   : > { %1629 = vmatprep.mubr.bf16.mxu1 %v5621_v3  ;;  %1406 = vmatprep.subr.bf16.mxu0 %v5103_v45  ;;  %v6066_v44 = vld [vmem:[#allocation3 + $0x60] ss:$12 sps:$4 sm:$0xff]   ;;  %v5221_v45 = vld [vmem:[%s5809_s6 + $0x148] ss:$16 sps:$4 sm:$0xff]  }
  0xd7   : > { %1775 = vmatpush1.bf16.msra.mxu1 %v5137_v51  ;;  %v5228_v51 = vld [vmem:[%s5809_s6 + $0x128] ss:$16 sps:$4 sm:$0xff]  }
  0xd8   : > { %1776 = vmatprep.subr.bf16.mxu1 %v5149_v56  ;;  %v5231_v56 = vld [vmem:[%s5809_s6 + $0x108] ss:$16 sps:$4 sm:$0xff]  }
  0xd9   : > { %1407 = vmatpush2.bf16.msra.mxu0 %v5105_v48  ;;  %v5237_v48 = vld [vmem:[%s5809_s6 + $0x228] ss:$16 sps:$4 sm:$0xff]  }
  0xda   : > { %1408 = vmatprep.subr.bf16.mxu0 %v5106_v49  ;;  %v5239_v49 = vld [vmem:[%s5809_s6 + $0x22c] ss:$16 sps:$4 sm:$0xff]  }
  0xdb   : > { %1777 = vmatpush1.bf16.msra.mxu1 %v5147_v55  ;;  %v5248_v55 = vld [vmem:[%s5809_s6 + $0x20c] ss:$16 sps:$4 sm:$0xff]  }
  0xdc   : > { %1778 = vmatprep.subr.bf16.mxu1 %v5156_v60  ;;  %v6090_v60 = vld [vmem:[#allocation3 + $0x94] ss:$12 sps:$4 sm:$0xff]  }
  0xdd   : > { %1630 = vmatmul.mubr.bf16.gmra.mxu1 %v5978_v52  ;;  %1409 = vmatpush2.bf16.msra.mxu0 %v5109_v53  ;;  %v5233_v53 = vld [vmem:[%s5809_s6 + $0x10c] ss:$16 sps:$4 sm:$0xff]  }
  0xde   : > { %1639 = vmatprep.mubr.bf16.mxu1 %v5621_v3  ;;  %1410 = vmatprep.subr.bf16.mxu0 %v5110_v54  ;;  %v5246_v54 = vld [vmem:[%s5809_s6 + $0x208] ss:$16 sps:$4 sm:$0xff]  }
  0xdf   : > { %1779 = vmatpush1.bf16.msra.mxu1 %v5154_v59  ;;  %v6088_v59 = vld [vmem:[#allocation3 + $0xe0] ss:$12 sps:$4 sm:$0xff]  }
  0xe0   : > { %1780 = vmatprep.subr.bf16.mxu1 %v5166_v1  ;;  %v6106_v1 = vld [vmem:[#allocation3 + $0xa8] ss:$12 sps:$4 sm:$0xff]  }
  0xe1   : > { %1411 = vmatpush2.bf16.msra.mxu0 %v5112_v57  ;;  %v6085_v57 = vld [vmem:[#allocation3 + $0x78] ss:$12 sps:$4 sm:$0xff]  }
  0xe2   : > { %1412 = vmatprep.subr.bf16.mxu0 %v5113_v58  ;;  %v5254_v58 = vld [vmem:[%s5818_s1 + $0xac] ss:$12 sps:$4 sm:$0xff]  }
  0xe3   : > { %1781 = vmatpush1.bf16.msra.mxu1 %v5164_v0  ;;  %v6100_v0 = vld [vmem:[#allocation3 + $0xac] ss:$12 sps:$4 sm:$0xff]  }
  0xe4   : > { %1782 = vmatprep.subr.bf16.mxu1 %v5173_v8  ;;  %v6118_v8 = vld [vmem:[#allocation3 + $0x128] ss:$12 sps:$4 sm:$0xff]  }
  0xe5   : > { %1640 = vmatmul.mubr.bf16.gmra.mxu1 %v5990_v61  ;;  %1413 = vmatpush2.bf16.msra.mxu0 %v5116_v62  ;;  %v6096_v62 = vld [vmem:[#allocation3 + $0x90] ss:$12 sps:$4 sm:$0xff]  }
  0xe6   : > { %1649 = vmatprep.mubr.bf16.mxu1 %v5621_v3  ;;  %1414 = vmatprep.subr.bf16.mxu0 %v5117_v63  ;;  %v6098_v63 = vld [vmem:[#allocation3 + $0xf8] ss:$12 sps:$4 sm:$0xff]  }
  0xe7   : > { %1783 = vmatpush1.bf16.msra.mxu1 %v5171_v7  ;;  %v6116_v7 = vld [vmem:[#allocation3 + $0xc0] ss:$12 sps:$4 sm:$0xff]  }
  0xe8   : > { %1784 = vmatprep.subr.bf16.mxu1 %v5183_v14  ;;  %v6136_v14 = vld [vmem:[#allocation3 + $0xf0] ss:$12 sps:$4 sm:$0xff]  }
  0xe9   : > { %1415 = vmatpush2.bf16.msra.mxu0 %v5119_v2  ;;  %v6108_v2 = vld [vmem:[#allocation3 + $0x110] ss:$12 sps:$4 sm:$0xff]  }
  0xea   : > { %1963 = vmatprep.subr.bf16.mxu0 %v5129_v6  ;;  %v6110_v6 = vld [vmem:[#allocation3 + $0xc4] ss:$12 sps:$4 sm:$0xff]  }
  0xeb   : > { %1785 = vmatpush1.bf16.msra.mxu1 %v5181_v13  ;;  %v6130_v13 = vld [vmem:[#allocation3 + $0xf4] ss:$12 sps:$4 sm:$0xff]  }
  0xec   : > { %1417 = vmatmul.mubr.bf16.vlgmr.msra.gmra.mxu0 %v5999_v4  ;;  %1786 = vmatprep.subr.bf16.mxu1 %v5190_v19  ;;  %v6140_v19 = vld [vmem:[#allocation3 + $0x10c] ss:$12 sps:$4 sm:$0xff]  }
  0xed   : > { %1650 = vmatmul.mubr.bf16.gmra.mxu1 %v6001_v5  ;;  %1964 = vmatpush1.bf16.msra.mxu0 %v5127_v9  ;;  %v6120_v9 = vld [vmem:[#allocation3 + $0xdc] ss:$12 sps:$4 sm:$0xff]  }
  0xee   : > { %1426 = vmatprep.mubr.bf16.mxu0 %v6007_v10  ;;  %1659 = vmatprep.mubr.bf16.mxu1 %v5621_v3 }
  0xef   : > { %1965 = vmatprep.subr.bf16.mxu0 %v5146_v11  ;;  %1787 = vmatpush2.bf16.msra.mxu1 %v5188_v21  ;;  %v6126_v11 = vld [vmem:[#allocation3 + $0xd8] ss:$12 sps:$4 sm:$0xff]   ;;  %v6148_v21 = vld [vmem:[#allocation3 + $0x170] ss:$12 sps:$4 sm:$0xff]  }
  0xf0   : > { %1788 = vmatprep.subr.bf16.mxu1 %v5200_v24  ;;  %v6157_v24 = vld [vmem:[#allocation3 + $0x120] ss:$12 sps:$4 sm:$0xff]  }
  0xf1   : > { %1966 = vmatpush1.bf16.msra.mxu0 %v5144_v12  ;;  %v6128_v12 = vld [vmem:[#allocation3 + $0x140] ss:$12 sps:$4 sm:$0xff]  }
  0xf2   : > { %1967 = vmatprep.subr.bf16.mxu0 %v5163_v16  ;;  %v6138_v16 = vld [vmem:[#allocation3 + $0x158] ss:$12 sps:$4 sm:$0xff]  }
  0xf3   : > { %1789 = vmatpush2.bf16.msra.mxu1 %v5198_v26  ;;  %v6159_v26 = vld [vmem:[#allocation3 + $0x13c] ss:$12 sps:$4 sm:$0xff]  }
  0xf4   : > { %1427 = vmatmul.mubr.bf16.gmra.mxu0 %v6017_v15  ;;  %1790 = vmatprep.subr.bf16.mxu1 %v5207_v30  ;;  %v5257_v30 = vld [vmem:[%s5818_s1 + $0x94] ss:$12 sps:$4 sm:$0xff]  }
  0xf5   : > { %1660 = vmatmul.mubr.bf16.gmra.mxu1 %v6020_v17  ;;  %1436 = vmatprep.mubr.bf16.mxu0 %v6022_v18 }
  0xf6   : > { %1669 = vmatprep.mubr.bf16.mxu1 %v5621_v3  ;;  %1968 = vmatpush1.bf16.msra.mxu0 %v5161_v20  ;;  %v6146_v20 = vld [vmem:[#allocation3 + $0x108] ss:$12 sps:$4 sm:$0xff]  }
  0xf7   : > { %1969 = vmatprep.subr.bf16.mxu0 %v5180_v22  ;;  %1791 = vmatpush2.bf16.msra.mxu1 %v5205_v32  ;;  %v6150_v22 = vld [vmem:[#allocation3 + $0x124] ss:$12 sps:$4 sm:$0xff]  }
  0xf8   : > { %1792 = vmatprep.subr.bf16.mxu1 %v5210_v33  ;;  %v6169_v32 = vld [vmem:[#allocation3 + $0x138] ss:$12 sps:$4 sm:$0xff]   ;;  %v6171_v33 = vld [vmem:[#allocation3 + $0x154] ss:$12 sps:$4 sm:$0xff]  }
  0xfa   : > { %1970 = vmatpush1.bf16.msra.mxu0 %v5178_v23  ;;  %v5290_v23 = vld [vmem:[%s5818_s1 + $0x22c] ss:$12 sps:$4 sm:$0xff]  }
  0xfb   : > { %1971 = vmatprep.subr.bf16.mxu0 %v5197_v27  ;;  %1793 = vmatpush2.bf16.msra.mxu1 %v5208_v35  ;;  %v5252_v27 = vld [vmem:[%s5818_s1 + $0xa8] ss:$12 sps:$4 sm:$0xff]   ;;  %v5258_v35 = vld [vmem:[%s5818_s1 + $0x78] ss:$12 sps:$4 sm:$0xff]  }
  0xfc   : > { %1437 = vmatmul.mubr.bf16.gmra.mxu0 %v6034_v25  ;;  %1794 = vmatprep.subr.bf16.mxu1 %v5217_v36  ;;  %v5266_v36 = vld [vmem:[%s5818_s1 + $0x4c] ss:$12 sps:$4 sm:$0xff]  }
  0xfd   : > { %1670 = vmatmul.mubr.bf16.gmra.mxu1 %v6038_v28  ;;  %1446 = vmatprep.mubr.bf16.mxu0 %v6040_v29 }
  0xfe   : > { %1679 = vmatprep.mubr.bf16.mxu1 %v5621_v3  ;;  %1972 = vmatpush1.bf16.msra.mxu0 %v5195_v31  ;;  %v5255_v31 = vld [vmem:[%s5818_s1 + $0x90] ss:$12 sps:$4 sm:$0xff]  }
  0xff   : > { %1973 = vmatprep.subr.bf16.mxu0 %v5220_v38  ;;  %1795 = vmatpush2.bf16.msra.mxu1 %v5215_v41  ;;  %v6183_v38 = vld [vmem:[#allocation3 + $0x16c] ss:$12 sps:$4 sm:$0xff]   ;;  %v5264_v41 = vld [vmem:[%s5818_s1 + $0x48] ss:$12 sps:$4 sm:$0xff]  }
 0x100   : > { %1796 = vmatprep.subr.bf16.mxu1 %v5223_v43  ;;  %v5272_v43 = vld [vmem:[%s5818_s1 + $0x1c] ss:$12 sps:$4 sm:$0xff]  }
 0x102   : > { %1974 = vmatpush1.bf16.msra.mxu0 %v5218_v37  ;;  %v6181_v37 = vld [vmem:[#allocation3 + $0x150] ss:$12 sps:$4 sm:$0xff]  }
 0x103   : > { %1797 = vmatpush2.bf16.msra.mxu1 %v5221_v45  ;;  %1975 = vmatprep.subr.bf16.mxu0 %v5239_v49  ;;  %v6193_v45 = vld [vmem:[#allocation3 + $0x168] ss:$12 sps:$4 sm:$0xff]   ;;  %v5276_v49 = vld [vmem:[%s5818_s1 + $0x168] ss:$12 sps:$4 sm:$0xff]  }
 0x104   : > { %1447 = vmatmul.mubr.bf16.gmra.mxu0 %v6050_v34  ;;  %1798 = vmatprep.subr.bf16.mxu1 %v5230_v47  ;;  %v5270_v47 = vld [vmem:[%s5818_s1 + $0x18] ss:$12 sps:$4 sm:$0xff]  }
 0x105   : > { %1680 = vmatmul.mubr.bf16.gmra.mxu1 %v6056_v39  ;;  %1456 = vmatprep.mubr.bf16.mxu0 %v6058_v40 }
 0x106   : > { %1689 = vmatprep.mubr.bf16.mxu1 %v5621_v3  ;;  %1976 = vmatpush1.bf16.msra.mxu0 %v5237_v48  ;;  %v5278_v48 = vld [vmem:[%s5818_s1 + $0x16c] ss:$12 sps:$4 sm:$0xff]  }
 0x107   : > { %1799 = vmatpush2.bf16.msra.mxu1 %v5228_v51  ;;  %1977 = vmatprep.subr.bf16.mxu0 %v5248_v55  ;;  %v5288_v51 = vld [vmem:[%s5818_s1 + $0x228] ss:$12 sps:$4 sm:$0xff]   ;;  %v5297_v55 = vld [vmem:[%s5818_s1 + $0x210] ss:$12 sps:$4 sm:$0xff]  }
 0x108   : > { %1800 = vmatprep.subr.bf16.mxu1 %v5233_v53  ;;  %v5281_v53 = vld [vmem:[%s5818_s1 + $0x154] ss:$12 sps:$4 sm:$0xff]  }
 0x10a   : > { %1978 = vmatpush1.bf16.msra.mxu0 %v5246_v54  ;;  %v5299_v54 = vld [vmem:[%s5818_s1 + $0x214] ss:$12 sps:$4 sm:$0xff]  }
 0x10b   : > { %1801 = vmatpush2.bf16.msra.mxu1 %v5231_v56  ;;  %3277 = vmatprep.subr.bf16.mxu0 %v5290_v23  ;;  %v5284_v56 = vld [vmem:[%s5818_s1 + $0x13c] ss:$12 sps:$4 sm:$0xff]   ;;  %v5306_v23 = vld [vmem:[%s5818_s1 + $0x1f8] ss:$12 sps:$4 sm:$0xff]  }
 0x10c   : > { %1457 = vmatmul.mubr.bf16.gmra.mxu0 %v6066_v44  ;;  %3084 = vmatprep.subr.bf16.mxu1 %v5254_v58  ;;  %v5308_v58 = vld [vmem:[%s5818_s1 + $0x1fc] ss:$12 sps:$4 sm:$0xff]  }
 0x10d   : > { %1690 = vmatmul.mubr.bf16.gmra.mxu1 %v6069_v46  ;;  %1466 = vmatprep.mubr.bf16.mxu0 %v6074_v50 }
 0x10e   : > { %1699 = vmatprep.mubr.bf16.mxu1 %v5621_v3 }
 0x114   : > { %1467 = vmatmul.mubr.bf16.gmra.mxu0 %v6085_v57 }
 0x115   : > { %1700 = vmatmul.mubr.bf16.gmra.mxu1 %v6088_v59  ;;  %1476 = vmatprep.mubr.bf16.mxu0 %v6090_v60 }
 0x116   : > { %1709 = vmatprep.mubr.bf16.mxu1 %v5621_v3 }
 0x11c   : > { %1477 = vmatmul.mubr.bf16.gmra.mxu0 %v6096_v62 }
 0x11d   : > { %1710 = vmatmul.mubr.bf16.gmra.mxu1 %v6098_v63  ;;  %1486 = vmatprep.mubr.bf16.mxu0 %v6100_v0 }
 0x11e   : > { %1719 = vmatprep.mubr.bf16.mxu1 %v5621_v3 }
 0x124   : > { %1487 = vmatmul.mubr.bf16.gmra.mxu0 %v6106_v1 }
 0x125   : > { %1720 = vmatmul.mubr.bf16.gmra.mxu1 %v6108_v2  ;;  %1496 = vmatprep.mubr.bf16.mxu0 %v6110_v6 }
 0x126   : > { %1729 = vmatprep.mubr.bf16.mxu1 %v5621_v3 }
 0x12c   : > { %1497 = vmatmul.mubr.bf16.gmra.mxu0 %v6116_v7 }
 0x12d   : > { %1730 = vmatmul.mubr.bf16.gmra.mxu1 %v6118_v8  ;;  %1506 = vmatprep.mubr.bf16.mxu0 %v6120_v9 }
 0x12e   : > { %1739 = vmatprep.mubr.bf16.mxu1 %v5621_v3 }
 0x134   : > { %1507 = vmatmul.mubr.bf16.gmra.mxu0 %v6126_v11 }
 0x135   : > { %1740 = vmatmul.mubr.bf16.gmra.mxu1 %v6128_v12  ;;  %1516 = vmatprep.mubr.bf16.mxu0 %v6130_v13 }
 0x136   : > { %1749 = vmatprep.mubr.bf16.mxu1 %v5621_v3 }
 0x13c   : > { %1517 = vmatmul.mubr.bf16.gmra.mxu0 %v6136_v14 }
 0x13d   : > { %1750 = vmatmul.mubr.bf16.gmra.mxu1 %v6138_v16  ;;  %1526 = vmatprep.mubr.bf16.mxu0 %v6140_v19 }
 0x13e   : > { %1759 = vmatprep.mubr.bf16.mxu1 %v5621_v3 }
 0x144   : > { %1527 = vmatmul.mubr.bf16.gmra.mxu0 %v6146_v20 }
 0x145   : > { %1760 = vmatmul.mubr.bf16.gmra.mxu1 %v6148_v21  ;;  %1536 = vmatprep.mubr.bf16.mxu0 %v6150_v22 }
 0x146   : > { %1802 = vmatprep.mubr.bf16.mxu1 %v5966_v42  ;;  %v5260_v42 = vld [vmem:[%s5818_s1 + $0x7c] ss:$12 sps:$4 sm:$0xff]  }
 0x14c   : > { %1537 = vmatmul.mubr.bf16.gmra.mxu0 %v6157_v24 }
 0x14d   : > { %1803 = vmatmul.mubr.bf16.vlgmr.msra.gmra.mxu1 %v5999_v4  ;;  %1546 = vmatprep.mubr.bf16.mxu0 %v6159_v26  ;;  %v5263_v4 = vld [vmem:[%s5818_s1 + $0x64] ss:$12 sps:$4 sm:$0xff]  }
 0x14e   : > { %1812 = vmatprep.mubr.bf16.mxu1 %v6007_v10  ;;  %3085 = vmatpush1.bf16.msra.mxu1 %v5252_v27  ;;  %v5261_v10 = vld [vmem:[%s5818_s1 + $0x60] ss:$12 sps:$4 sm:$0xff]   ;;  %v5311_v27 = vld [vmem:[%s5818_s1 + $0x1e4] ss:$12 sps:$4 sm:$0xff]  }
 0x14f   : > { %3086 = vmatprep.subr.bf16.mxu1 %v5257_v30  ;;  %v5381_v30 = vld [vmem:[#allocation3 + $0x20] ss:$12 sps:$4 sm:$0xff]  }
 0x152   : > { %3087 = vmatpush1.bf16.msra.mxu1 %v5255_v31  ;;  %v5285_v31 = vld [vmem:[%s5818_s1 + $0x120] ss:$12 sps:$4 sm:$0xff]  }
 0x153   : > { %3088 = vmatprep.subr.bf16.mxu1 %v5260_v42  ;;  %v5309_v42 = vld [vmem:[%s5818_s1 + $0x1e0] ss:$12 sps:$4 sm:$0xff]  }
 0x154   : > { %1547 = vmatmul.mubr.bf16.gmra.mxu0 %v6169_v32 }
 0x155   : > { %1813 = vmatmul.mubr.bf16.gmra.mxu1 %v6017_v15  ;;  %1556 = vmatprep.mubr.bf16.mxu0 %v6171_v33  ;;  %v5269_v15 = vld [vmem:[%s5818_s1 + $0x34] ss:$12 sps:$4 sm:$0xff]  }
 0x156   : > { %1822 = vmatprep.mubr.bf16.mxu1 %v6022_v18  ;;  %3089 = vmatpush1.bf16.msra.mxu1 %v5258_v35  ;;  %v5267_v18 = vld [vmem:[%s5818_s1 + $0x30] ss:$12 sps:$4 sm:$0xff]   ;;  %v5293_v35 = vld [vmem:[%s5818_s1 + $0x10c] ss:$12 sps:$4 sm:$0xff]  }
 0x157   : > { %3090 = vmatprep.subr.bf16.mxu1 %v5263_v4  ;;  %v5314_v4 = vld [vmem:[%s5818_s1 + $0x1cc] ss:$12 sps:$4 sm:$0xff]  }
 0x15a   : > { %3091 = vmatpush1.bf16.msra.mxu1 %v5261_v10  ;;  %v5312_v10 = vld [vmem:[%s5818_s1 + $0x1c8] ss:$12 sps:$4 sm:$0xff]  }
 0x15b   : > { %3092 = vmatprep.subr.bf16.mxu1 %v5266_v36  ;;  %v5317_v36 = vld [vmem:[%s5818_s1 + $0x1b4] ss:$12 sps:$4 sm:$0xff]  }
 0x15c   : > { %1557 = vmatmul.mubr.bf16.gmra.mxu0 %v6181_v37 }
 0x15d   : > { %1823 = vmatmul.mubr.bf16.gmra.mxu1 %v6034_v25  ;;  %1566 = vmatprep.mubr.bf16.mxu0 %v6183_v38  ;;  %v5275_v25 = vld [vmem:[%s5818_s1 + $0x4] ss:$12 sps:$4 sm:$0xff]  }
 0x15e   : > { %1832 = vmatprep.mubr.bf16.mxu1 %v6040_v29  ;;  %3093 = vmatpush1.bf16.msra.mxu1 %v5264_v41  ;;  %v5273_v29 = vld [vmem:[%s5818_s1] ss:$12 sps:$4 sm:$0xff]   ;;  %v5294_v41 = vld [vmem:[%s5818_s1 + $0xf0] ss:$12 sps:$4 sm:$0xff]  }
 0x15f   : > { %3094 = vmatprep.subr.bf16.mxu1 %v5269_v15  ;;  %v5315_v15 = vld [vmem:[%s5818_s1 + $0x1b0] ss:$12 sps:$4 sm:$0xff]  }
 0x162   : > { %3095 = vmatpush1.bf16.msra.mxu1 %v5267_v18  ;;  %v5302_v18 = vld [vmem:[%s5818_s1 + $0xdc] ss:$12 sps:$4 sm:$0xff]  }
 0x163   : > { %3096 = vmatprep.subr.bf16.mxu1 %v5272_v43  ;;  %v5320_v43 = vld [vmem:[%s5818_s1 + $0x19c] ss:$12 sps:$4 sm:$0xff]  }
 0x164   : > { %1567 = vmatmul.mubr.bf16.gmra.mxu0 %v6193_v45 }
 0x165   : > { %1833 = vmatmul.mubr.bf16.gmra.mxu1 %v6050_v34  ;;  %1995 = vmatprep.mubr.bf16.mxu0 %v5621_v3  ;;  %v5380_v34 = vld [vmem:[#allocation3 + $0x8] ss:$12 sps:$4 sm:$0xff]  }
 0x166   : > { %1842 = vmatprep.mubr.bf16.mxu1 %v6058_v40  ;;  %3097 = vmatpush1.bf16.msra.mxu1 %v5270_v47  ;;  %v5279_v40 = vld [vmem:[%s5818_s1 + $0x150] ss:$12 sps:$4 sm:$0xff]  }
 0x167   : > { %3098 = vmatprep.subr.bf16.mxu1 %v5275_v25  ;;  %v5323_v47 = vld [vmem:[%s5818_s1 + $0x184] ss:$12 sps:$4 sm:$0xff]   ;;  %v5303_v25 = vld [vmem:[%s5818_s1 + $0xc0] ss:$12 sps:$4 sm:$0xff]  }
 0x16a   : > { %3099 = vmatpush1.bf16.msra.mxu1 %v5273_v29  ;;  %v5321_v29 = vld [vmem:[%s5818_s1 + $0x180] ss:$12 sps:$4 sm:$0xff]  }
 0x16b   : > { %3100 = vmatprep.subr.bf16.mxu1 %v5278_v48  ;;  %v5326_v48 = vld [vmem:[%s5818_s1 + $0x2ec] ss:$12 sps:$4 sm:$0xff]  }
 0x16c   : > { %1996 = vmatmul.mubr.bf16.vlgmr.msra.gmra.mxu0 %v5380_v34 }
 0x16d   : > { %1843 = vmatmul.mubr.bf16.gmra.mxu1 %v6066_v44  ;;  %2005 = vmatprep.mubr.bf16.mxu0 %v5621_v3  ;;  %v5282_v44 = vld [vmem:[%s5818_s1 + $0x138] ss:$12 sps:$4 sm:$0xff]  }
 0x16e   : > { %1852 = vmatprep.mubr.bf16.mxu1 %v6074_v50  ;;  %3101 = vmatpush2.bf16.msra.mxu1 %v5276_v49  ;;  %v5287_v50 = vld [vmem:[%s5818_s1 + $0x124] ss:$12 sps:$4 sm:$0xff]   ;;  %v5324_v49 = vld [vmem:[%s5818_s1 + $0x2e8] ss:$12 sps:$4 sm:$0xff]  }
 0x16f   : > { %3278 = vmatpush1.bf16.msra.mxu0 %v5288_v51  ;;  %3102 = vmatprep.subr.bf16.mxu1 %v5281_v53  ;;  %v5327_v51 = vld [vmem:[%s5818_s1 + $0x2d0] ss:$12 sps:$4 sm:$0xff]  }
 0x170   : > { %3279 = vmatprep.subr.bf16.mxu0 %v5299_v54  ;;  %v5332_v53 = vld [vmem:[%s5818_s1 + $0x2bc] ss:$12 sps:$4 sm:$0xff]  }
 0x172   : > { %3103 = vmatpush2.bf16.msra.mxu1 %v5279_v40  ;;  %v5333_v40 = vld [vmem:[%s5818_s1 + $0x2a0] ss:$12 sps:$4 sm:$0xff]  }
 0x173   : > { %3280 = vmatpush1.bf16.msra.mxu0 %v5297_v55  ;;  %3104 = vmatprep.subr.bf16.mxu1 %v5284_v56  ;;  %v5335_v55 = vld [vmem:[%s5818_s1 + $0x2a4] ss:$12 sps:$4 sm:$0xff]  }
 0x174   : > { %3281 = vmatprep.subr.bf16.mxu0 %v5308_v58  ;;  %2006 = vmatmul.mubr.bf16.gmra.mxu0 %v5381_v30  ;;  %v5343_v30 = vld [vmem:[%s5818_s1 + $0x274] ss:$12 sps:$4 sm:$0xff]  }
 0x175   : > { %1853 = vmatmul.mubr.bf16.gmra.mxu1 %v6085_v57  ;;  %2015 = vmatprep.mubr.bf16.mxu0 %v5621_v3  ;;  %v5291_v57 = vld [vmem:[%s5818_s1 + $0x108] ss:$12 sps:$4 sm:$0xff]  }
 0x176   : > { %1862 = vmatprep.mubr.bf16.mxu1 %v6090_v60  ;;  %3105 = vmatpush2.bf16.msra.mxu1 %v5282_v44  ;;  %v5296_v60 = vld [vmem:[%s5818_s1 + $0xf4] ss:$12 sps:$4 sm:$0xff]   ;;  %v5338_v44 = vld [vmem:[%s5818_s1 + $0x28c] ss:$12 sps:$4 sm:$0xff]  }
 0x177   : > { %3282 = vmatpush1.bf16.msra.mxu0 %v5306_v23  ;;  %3106 = vmatprep.subr.bf16.mxu1 %v5287_v50  ;;  %v5339_v23 = vld [vmem:[%s5818_s1 + $0x170] ss:$12 sps:$4 sm:$0xff]  }
 0x178   : > { %3283 = vmatprep.subr.bf16.mxu0 %v5311_v27 }
 0x17a   : > { %3107 = vmatpush2.bf16.msra.mxu1 %v5285_v31 }
 0x17b   : > { %3284 = vmatpush1.bf16.msra.mxu0 %v5309_v42  ;;  %3108 = vmatprep.subr.bf16.mxu1 %v5293_v35  ;;  %v628_v35 = vlaneseq }
 0x17c   : > { %3285 = vmatprep.subr.bf16.mxu0 %v5314_v4  ;;  %2016 = vmatmul.mubr.bf16.gmra.mxu0 %v5978_v52  ;;  %v5318_v52 = vld [vmem:[%s5818_s1 + $0x198] ss:$12 sps:$4 sm:$0xff]  }
 0x17d   : > { %1863 = vmatmul.mubr.bf16.gmra.mxu1 %v6096_v62  ;;  %2025 = vmatprep.mubr.bf16.mxu0 %v5621_v3  ;;  %v5300_v62 = vld [vmem:[%s5818_s1 + $0xd8] ss:$12 sps:$4 sm:$0xff]  }
 0x17e   : > { %1872 = vmatprep.mubr.bf16.mxu1 %v6100_v0  ;;  %3109 = vmatpush2.bf16.msra.mxu1 %v5291_v57  ;;  %v5305_v0 = vld [vmem:[%s5818_s1 + $0xc4] ss:$12 sps:$4 sm:$0xff]   ;;  %v6316_v57 = vshrl.u32 %v628_v35, 7 }
 0x17f   : > { %3286 = vmatpush1.bf16.msra.mxu0 %v5312_v10  ;;  %3110 = vmatprep.subr.bf16.mxu1 %v5296_v60  ;;  %v5344_v10 = vld [vmem:[%s5818_s1 + $0x258] ss:$12 sps:$4 sm:$0xff]   ;;  %v5346_v60 = vld [vmem:[%s5818_s1 + $0x25c] ss:$12 sps:$4 sm:$0xff]  }
 0x180   : > { %3287 = vmatprep.subr.bf16.mxu0 %v5317_v36  ;;  %7673 = vst [vmem:[#allocation20_spill] sm:$0xff] %v6316_v57 }
 0x182   : > { %3111 = vmatpush2.bf16.msra.mxu1 %v5294_v41 }
 0x183   : > { %3288 = vmatpush1.bf16.msra.mxu0 %v5315_v15  ;;  %3112 = vmatprep.subr.bf16.mxu1 %v5302_v18 }
 0x184   : > { %3289 = vmatprep.subr.bf16.mxu0 %v5320_v43  ;;  %2026 = vmatmul.mubr.bf16.gmra.mxu0 %v5990_v61 }
 0x185   : > { %1873 = vmatmul.mubr.bf16.gmra.mxu1 %v6106_v1  ;;  %2035 = vmatprep.mubr.bf16.mxu0 %v5621_v3  ;;  %v5329_v1 = vld [vmem:[%s5818_s1 + $0x2d4] ss:$12 sps:$4 sm:$0xff]  }
 0x186   : > { %1882 = vmatprep.mubr.bf16.mxu1 %v6110_v6  ;;  %3113 = vmatpush2.bf16.msra.mxu1 %v5300_v62 }
 0x187   : > { %3290 = vmatpush1.bf16.msra.mxu0 %v5318_v52  ;;  %3114 = vmatprep.subr.bf16.mxu1 %v5305_v0  ;;  %v5349_v52 = vld [vmem:[%s5818_s1 + $0x240] ss:$12 sps:$4 sm:$0xff]   ;;  %v5351_v0 = vld [vmem:[%s5818_s1 + $0x244] ss:$12 sps:$4 sm:$0xff]  }
 0x188   : > { %3291 = vmatprep.subr.bf16.mxu0 %v5323_v47 }
 0x18a   : > { %3115 = vmatpush2.bf16.msra.mxu1 %v5303_v25 }
 0x18b   : > { %3292 = vmatpush1.bf16.msra.mxu0 %v5321_v29  ;;  %4698 = vmatprep.subr.bf16.mxu1 %v5339_v23 }
 0x18c   : > { %3293 = vmatprep.subr.bf16.mxu0 %v5326_v48  ;;  %2036 = vmatmul.mubr.bf16.gmra.mxu0 %v6001_v5 }
 0x18d   : > { %v6250_v61 = vpop.f32.mrf.mxu1  ;;  %1883 = vmatmul.mubr.bf16.gmra.mxu1 %v6116_v7  ;;  %2045 = vmatprep.mubr.bf16.mxu0 %v5621_v3  ;;  %v5330_v7 = vld [vmem:[%s5818_s1 + $0x2b8] ss:$12 sps:$4 sm:$0xff]  }
 0x18e   : > { %1892 = vmatprep.mubr.bf16.mxu1 %v6120_v9 }
 0x18f   : > { %v6256_v6 = vpop.f32.mrf.mxu1  ;;  %3294 = vmatpush2.bf16.msra.mxu0 %v5324_v49 }
 0x190   : > { %3295 = vmatprep.subr.bf16.mxu0 %v5329_v1 }
 0x191   : > { %v6260_v54 = vpop.f32.mrf.mxu1 }
 0x193   : > { %v6262_v34 = vpop.f32.mrf.mxu1  ;;  %3296 = vmatpush2.bf16.msra.mxu0 %v5327_v51 }
 0x194   : > { %3297 = vmatprep.subr.bf16.mxu0 %v5332_v53  ;;  %2046 = vmatmul.mubr.bf16.gmra.mxu0 %v6020_v17 }
 0x195   : > { %v6265_v5 = vpop.f32.mrf.mxu1  ;;  %1893 = vmatmul.mubr.bf16.gmra.mxu1 %v6126_v11  ;;  %2055 = vmatprep.mubr.bf16.mxu0 %v5621_v3 }
 0x196   : > { %1902 = vmatprep.mubr.bf16.mxu1 %v6130_v13  ;;  %v5336_v13 = vld [vmem:[%s5818_s1 + $0x288] ss:$12 sps:$4 sm:$0xff]  }
 0x197   : > { %v6271_v9 = vpop.f32.mrf.mxu1  ;;  %3298 = vmatpush2.bf16.msra.mxu0 %v5330_v7 }
 0x198   : > { %3299 = vmatprep.subr.bf16.mxu0 %v5335_v55 }
 0x199   : > { %v6275_v56 = vpop.f32.mrf.mxu1 }
 0x19b   : > { %v6277_v58 = vpop.f32.mrf.mxu1  ;;  %3300 = vmatpush2.bf16.msra.mxu0 %v5333_v40 }
 0x19c   : > { %2056 = vmatmul.mubr.bf16.gmra.mxu0 %v6038_v28  ;;  %3301 = vmatprep.subr.bf16.mxu0 %v5338_v44 }
 0x19d   : > { %v6279_v11 = vpop.f32.mrf.mxu1  ;;  %1903 = vmatmul.mubr.bf16.gmra.mxu1 %v6136_v14  ;;  %2065 = vmatprep.mubr.bf16.mxu0 %v5621_v3 }
 0x19e   : > { %1912 = vmatprep.mubr.bf16.mxu1 %v6140_v19  ;;  %v5341_v19 = vld [vmem:[%s5818_s1 + $0x270] ss:$12 sps:$4 sm:$0xff]  }
 0x19f   : > { %v6285_v17 = vpop.f32.mrf.mxu1  ;;  %3302 = vmatpush2.bf16.msra.mxu0 %v5336_v13 }
 0x1a0   : > { %3303 = vmatprep.subr.bf16.mxu0 %v5343_v30 }
 0x1a1   : > { %v6290_v50 = vpop.f32.mrf.mxu1 }
 0x1a3   : > { %v6292_v27 = vpop.f32.mrf.mxu1  ;;  %3304 = vmatpush2.bf16.msra.mxu0 %v5341_v19 }
 0x1a4   : > { %2066 = vmatmul.mubr.bf16.gmra.mxu0 %v6056_v39  ;;  %3305 = vmatprep.subr.bf16.mxu0 %v5346_v60 }
 0x1a5   : > { %v6294_v14 = vpop.f32.mrf.mxu1  ;;  %1913 = vmatmul.mubr.bf16.gmra.mxu1 %v6146_v20  ;;  %2075 = vmatprep.mubr.bf16.mxu0 %v5621_v3 }
 0x1a6   : > { %1922 = vmatprep.mubr.bf16.mxu1 %v6150_v22 }
 0x1a7   : > { %v6300_v28 = vpop.f32.mrf.mxu1  ;;  %3306 = vmatpush2.bf16.msra.mxu0 %v5344_v10 }
 0x1a8   : > { %3307 = vmatprep.subr.bf16.mxu0 %v5351_v0 }
 0x1a9   : > { %v6304_v31 = vpop.f32.mrf.mxu1 }
 0x1ab   : > { %v6306_v42 = vpop.f32.mrf.mxu1  ;;  %3308 = vmatpush2.bf16.msra.mxu0 %v5349_v52 }
 0x1ac   : > { %v1418_v20 = vpop.f32.mrf.mxu0  ;;  %2076 = vmatmul.mubr.bf16.gmra.mxu0 %v6069_v46 }
 0x1ad   : > { %v6308_v4 = vpop.f32.mrf.mxu1  ;;  %1923 = vmatmul.mubr.bf16.gmra.mxu1 %v6157_v24  ;;  %2085 = vmatprep.mubr.bf16.mxu0 %v5621_v3  ;;  %v7626_v24 = vsub.s32 1, %v6316_v57 }
 0x1ae   : > { %1932 = vmatprep.mubr.bf16.mxu1 %v6159_v26  ;;  %v1420_v39 = vpop.f32.mrf.mxu0  ;;  %v6327_v26 = vld [vmem:[%s315_s11] sm:$0xf] }
 0x1af   : > { %v6314_v22 = vpop.f32.mrf.mxu1  ;;  %v6336_v62 = vrot.slane %v6327_v26, %v7626_v24 }
 0x1b0   : > { %v1422_v36 = vpop.f32.mrf.mxu0 }
 0x1b1   : > { %v6320_v41 = vpop.f32.mrf.mxu1  ;;  %v1421_v49 = vadd.f32 %v1420_v39, %v6336_v62 }
 0x1b2   : > { %v1424_v46 = vpop.f32.mrf.mxu0 }
 0x1b3   : > { %v6323_v15 = vpop.f32.mrf.mxu1  ;;  %v1425_v29 = vadd.f32 %v1424_v46, %v6336_v62  ;;  %v1614_v55 = vadd.f32 %v6256_v6, %v1421_v49 }
 0x1b4   : > { %v1428_v18 = vpop.f32.mrf.mxu0  ;;  %2086 = vmatmul.mubr.bf16.gmra.mxu0 %v6088_v59 }
 0x1b5   : > { %v6329_v43 = vpop.f32.mrf.mxu1  ;;  %1933 = vmatmul.mubr.bf16.gmra.mxu1 %v6169_v32  ;;  %2095 = vmatprep.mubr.bf16.mxu0 %v5621_v3  ;;  %v7627_v32 = vsub.s32 0, %v6316_v57  ;;  %v1618_v51 = vadd.f32 %v6262_v34, %v1425_v29  ;;  %v6367_v34 = vld [vmem:[%s5818_s1 + $0x2f0] ss:$12 sps:$4 sm:$0xff]  }
 0x1b6   : > { %1942 = vmatprep.mubr.bf16.mxu1 %v6171_v33  ;;  %v1430_v47 = vpop.f32.mrf.mxu0  ;;  %4810 = vmatprep.subr.bf16.mxu0 %v6367_v34 }
 0x1b7   : > { %v6342_v25 = vpop.f32.mrf.mxu1  ;;  %v6355_v53 = vrot.slane %v6327_v26, %v7627_v32  ;;  %v2161_v19 = vmax.f32 %v1618_v51, 0.0  ;;  %v1431_v35 = vadd.f32 %v1430_v47, %v6336_v62 }
 0x1b8   : > { %v1432_v59 = vpop.f32.mrf.mxu0 }
 0x1b9   : > { %v6346_v48 = vpop.f32.mrf.mxu1  ;;  %v1423_v13 = vadd.f32 %v1422_v36, %v6355_v53  ;;  %v1624_v47 = vadd.f32 %v6271_v9, %v1431_v35 }
 0x1ba   : > { %v1434_v33 = vpop.f32.mrf.mxu0 }
 0x1bb   : > { %v6349_v1 = vpop.f32.mrf.mxu1  ;;  %v1435_v30 = vadd.f32 %v1434_v33, %v6336_v62  ;;  %v1616_v39 = vadd.f32 %v6260_v54, %v1423_v13 }
 0x1bc   : > { %v6357_v7 = vpop.f32.mrf.mxu0  ;;  %2096 = vmatmul.mubr.bf16.gmra.mxu0 %v6098_v63  ;;  %v1419_v63 = vadd.f32 %v1418_v20, %v6355_v53 }
 0x1bd   : > { %v6359_v40 = vpop.f32.mrf.mxu1  ;;  %1943 = vmatmul.mubr.bf16.gmra.mxu1 %v6181_v37  ;;  %2105 = vmatprep.mubr.bf16.mxu0 %v5621_v3  ;;  %v1628_v36 = vadd.f32 %v6277_v58, %v1435_v30  ;;  %v2160_v54 = vmax.f32 %v1616_v39, 0.0  ;;  %v1433_v58 = vadd.f32 %v1432_v59, %v6355_v53 }
 0x1be   : > { %1952 = vmatprep.mubr.bf16.mxu1 %v6183_v38  ;;  %v1440_v44 = vpop.f32.mrf.mxu0  ;;  %v2157_v38 = vmax.f32 %v1614_v55, 0.0  ;;  %v1612_v52 = vadd.f32 %v6250_v61, %v1419_v63  ;;  %v2165_v55 = vmax.f32 %v1624_v47, 0.0 }
 0x1bf   : > { %v6370_v23 = vpop.f32.mrf.mxu1  ;;  %v2169_v49 = vmax.f32 %v1628_v36, 0.0  ;;  %v1441_v13 = vadd.f32 %v1440_v44, %v6336_v62  ;;  %v1626_v59 = vadd.f32 %v6275_v56, %v1433_v58 }
 0x1c0   : > { %v1442_v37 = vpop.f32.mrf.mxu0  ;;  %v6382_v46 = vpack.c.bf16 %v2161_v19, %v2157_v38  ;;  %v5340_v38 = vld [vmem:[%s5818_s1 + $0xb0] ss:$12 sps:$4 sm:$0xff]  }
 0x1c1   : > { %v6375_v6 = vpop.f32.mrf.mxu1  ;;  %v6409_v39 = vpack.c.bf16 %v2169_v49, %v2165_v55  ;;  %v1634_v56 = vadd.f32 %v6285_v17, %v1441_v13  ;;  %v5352_v49 = vld [vmem:[%s5818_s1 + $0x140] ss:$12 sps:$4 sm:$0xff]  }
 0x1c2   : > { %v1444_v10 = vpop.f32.mrf.mxu0 }
 0x1c3   : > { %v6379_v60 = vpop.f32.mrf.mxu1  ;;  %v1445_v33 = vadd.f32 %v1444_v10, %v6336_v62 }
 0x1c4   : > { %v6385_v0 = vpop.f32.mrf.mxu0  ;;  %2106 = vmatmul.mubr.bf16.gmra.mxu0 %v6108_v2  ;;  %v1429_v2 = vadd.f32 %v1428_v18, %v6355_v53  ;;  %v5347_v18 = vld [vmem:[%s5818_s1 + $0x158] ss:$12 sps:$4 sm:$0xff]  }
 0x1c5   : > { %v6387_v20 = vpop.f32.mrf.mxu1  ;;  %1953 = vmatmul.mubr.bf16.gmra.mxu1 %v6193_v45  ;;  %2115 = vmatprep.mubr.bf16.mxu0 %v5621_v3  ;;  %v2156_v45 = vmax.f32 %v1612_v52, 0.0  ;;  %v1638_v35 = vadd.f32 %v6292_v27, %v1445_v33  ;;  %v2168_v27 = vmax.f32 %v1626_v59, 0.0  ;;  %v1443_v52 = vadd.f32 %v1442_v37, %v6355_v53 }
 0x1c6   : > { %3116 = vmatprep.mubr.bf16.mxu1 %v6382_v46  ;;  %v1450_v29 = vpop.f32.mrf.mxu0  ;;  %v1622_v10 = vadd.f32 %v6265_v5, %v1429_v2  ;;  %v1439_v33 = vadd.f32 %v6357_v7, %v6355_v53  ;;  %v2173_v37 = vmax.f32 %v1634_v56, 0.0  ;;  %v5354_v7 = vld [vmem:[%s5818_s1 + $0x128] ss:$12 sps:$4 sm:$0xff]  }
 0x1c7   : > { %v6395_v61 = vpop.f32.mrf.mxu1  ;;  %v6402_v19 = vpack.c.bf16 %v2160_v54, %v2156_v45  ;;  %v5348_v54 = vld [vmem:[%s5818_s1 + $0x98] ss:$12 sps:$4 sm:$0xff]   ;;  %v2177_v58 = vmax.f32 %v1638_v35, 0.0  ;;  %v1451_v55 = vadd.f32 %v1450_v29, %v6336_v62  ;;  %v1636_v59 = vadd.f32 %v6290_v50, %v1443_v52 }
 0x1c8   : > { %v1452_v51 = vpop.f32.mrf.mxu0  ;;  %v2164_v17 = vmax.f32 %v1622_v10, 0.0  ;;  %v1632_v56 = vadd.f32 %v6279_v11, %v1439_v33 }
 0x1c9   : > { %v6399_v9 = vpop.f32.mrf.mxu1  ;;  %v6440_v10 = vpack.c.bf16 %v2177_v58, %v2173_v37  ;;  %v1644_v50 = vadd.f32 %v6300_v28, %v1451_v55 }
 0x1ca   : > { %v1454_v30 = vpop.f32.mrf.mxu0  ;;  %v6433_v13 = vpack.c.bf16 %v2168_v27, %v2164_v17  ;;  %v1453_v27 = vadd.f32 %v1452_v51, %v6355_v53  ;;  %v2172_v28 = vmax.f32 %v1632_v56, 0.0 }
 0x1cb   : > { %v6405_v63 = vpop.f32.mrf.mxu1  ;;  %v2181_v51 = vmax.f32 %v1644_v50, 0.0 }
 0x1cc   : > { %v6413_v36 = vpop.f32.mrf.mxu0  ;;  %2116 = vmatmul.mubr.bf16.gmra.mxu0 %v6118_v8  ;;  %v1455_v8 = vadd.f32 %v1454_v30, %v6336_v62  ;;  %v5353_v30 = vld [vmem:[%s5818_s1 + $0x80] ss:$12 sps:$4 sm:$0xff]  }
 0x1cd   : > { %v6415_v44 = vpop.f32.mrf.mxu1  ;;  %3117 = vmatmul.mubr.bf16.vlgmr.msra.gmra.mxu1 %v6402_v19  ;;  %2125 = vmatprep.mubr.bf16.mxu0 %v5621_v3 }
 0x1ce   : > { %3126 = vmatprep.mubr.bf16.mxu1 %v6409_v39  ;;  %v1460_v47 = vpop.f32.mrf.mxu0  ;;  %4699 = vmatpush3.bf16.msra.mxu1 %v5340_v38 }
 0x1cf   : > { %v6423_v5 = vpop.f32.mrf.mxu1  ;;  %4700 = vmatprep.subr.bf16.mxu1 %v5347_v18  ;;  %v1648_v18 = vadd.f32 %v6306_v42, %v1455_v8  ;;  %v2176_v42 = vmax.f32 %v1636_v59, 0.0  ;;  %v5358_v8 = vld [vmem:[%s5818_s1 + $0x110] ss:$12 sps:$4 sm:$0xff]   ;;  %v1461_v37 = vadd.f32 %v1460_v47, %v6336_v62  ;;  %v1646_v59 = vadd.f32 %v6304_v31, %v1453_v27 }
 0x1d0   : > { %v1462_v45 = vpop.f32.mrf.mxu0 }
 0x1d1   : > { %v6430_v2 = vpop.f32.mrf.mxu1  ;;  %v2185_v58 = vmax.f32 %v1648_v18, 0.0  ;;  %v6464_v55 = vpack.c.bf16 %v2176_v42, %v2172_v28  ;;  %v1654_v31 = vadd.f32 %v6314_v22, %v1461_v37  ;;  %v1463_v42 = vadd.f32 %v1462_v45, %v6355_v53 }
 0x1d2   : > { %v1464_v38 = vpop.f32.mrf.mxu0  ;;  %4701 = vmatpush3.bf16.msra.mxu1 %v5348_v54  ;;  %v5355_v54 = vld [vmem:[%s5818_s1 + $0x68] ss:$12 sps:$4 sm:$0xff]  }
 0x1d3   : > { %v6436_v35 = vpop.f32.mrf.mxu1  ;;  %4702 = vmatprep.subr.bf16.mxu1 %v5352_v49  ;;  %v1449_v49 = vadd.f32 %v6385_v0, %v6355_v53  ;;  %v6471_v56 = vpack.c.bf16 %v2185_v58, %v2181_v51  ;;  %v5360_v0 = vld [vmem:[%s5818_s1 + $0xf8] ss:$12 sps:$4 sm:$0xff]   ;;  %v2189_v45 = vmax.f32 %v1654_v31, 0.0  ;;  %v1656_v37 = vadd.f32 %v6320_v41, %v1463_v42 }
 0x1d4   : > { %v6444_v24 = vpop.f32.mrf.mxu0  ;;  %2126 = vmatmul.mubr.bf16.gmra.mxu0 %v6128_v12  ;;  %v1465_v12 = vadd.f32 %v1464_v38, %v6336_v62  ;;  %v5359_v38 = vld [vmem:[%s5818_s1 + $0x50] ss:$12 sps:$4 sm:$0xff]  }
 0x1d5   : > { %v6446_v29 = vpop.f32.mrf.mxu1  ;;  %3127 = vmatmul.mubr.bf16.gmra.mxu1 %v6433_v13  ;;  %2135 = vmatprep.mubr.bf16.mxu0 %v5621_v3  ;;  %v1642_v50 = vadd.f32 %v6294_v14, %v1449_v49 }
 0x1d6   : > { %3136 = vmatprep.mubr.bf16.mxu1 %v6440_v10  ;;  %v1470_v52 = vpop.f32.mrf.mxu0  ;;  %4703 = vmatpush3.bf16.msra.mxu1 %v5353_v30 }
 0x1d7   : > { %v6454_v11 = vpop.f32.mrf.mxu1  ;;  %4704 = vmatprep.subr.bf16.mxu1 %v5354_v7  ;;  %v1658_v7 = vadd.f32 %v6323_v15, %v1465_v12  ;;  %v2184_v15 = vmax.f32 %v1646_v59, 0.0  ;;  %v5362_v12 = vld [vmem:[%s5818_s1 + $0xe0] ss:$12 sps:$4 sm:$0xff]   ;;  %v2180_v22 = vmax.f32 %v1642_v50, 0.0  ;;  %v1471_v49 = vadd.f32 %v1470_v52, %v6336_v62 }
 0x1d8   : > { %v1472_v17 = vpop.f32.mrf.mxu0 }
 0x1d9   : > { %v6461_v33 = vpop.f32.mrf.mxu1  ;;  %v2193_v58 = vmax.f32 %v1658_v7, 0.0  ;;  %v6495_v51 = vpack.c.bf16 %v2184_v15, %v2180_v22  ;;  %v1664_v41 = vadd.f32 %v6342_v25, %v1471_v49  ;;  %v1473_v15 = vadd.f32 %v1472_v17, %v6355_v53 }
 0x1da   : > { %v1474_v30 = vpop.f32.mrf.mxu0  ;;  %4705 = vmatpush3.bf16.msra.mxu1 %v5355_v54  ;;  %v5361_v54 = vld [vmem:[%s5818_s1 + $0x38] ss:$12 sps:$4 sm:$0xff]  }
 0x1db   : > { %v6467_v18 = vpop.f32.mrf.mxu1  ;;  %4706 = vmatprep.subr.bf16.mxu1 %v5358_v8  ;;  %v1459_v8 = vadd.f32 %v6413_v36, %v6355_v53  ;;  %v5364_v36 = vld [vmem:[%s5818_s1 + $0xc8] ss:$12 sps:$4 sm:$0xff]   ;;  %v1666_v49 = vadd.f32 %v6346_v48, %v1473_v15 }
 0x1dc   : > { %v6475_v32 = vpop.f32.mrf.mxu0  ;;  %2136 = vmatmul.mubr.bf16.gmra.mxu0 %v6138_v16  ;;  %v1475_v16 = vadd.f32 %v1474_v30, %v6336_v62  ;;  %v5363_v30 = vld [vmem:[%s5818_s1 + $0x20] ss:$12 sps:$4 sm:$0xff]  }
 0x1dd   : > { %v6477_v47 = vpop.f32.mrf.mxu1  ;;  %3137 = vmatmul.mubr.bf16.gmra.mxu1 %v6464_v55  ;;  %2145 = vmatprep.mubr.bf16.mxu0 %v5621_v3  ;;  %v1652_v50 = vadd.f32 %v6308_v4, %v1459_v8  ;;  %v5365_v4 = vld [vmem:[%s5818_s1 + $0x8] ss:$12 sps:$4 sm:$0xff]   ;;  %v2197_v8 = vmax.f32 %v1664_v41, 0.0  ;;  %v2200_v48 = vmax.f32 %v1666_v49, 0.0 }
 0x1de   : > { %3146 = vmatprep.mubr.bf16.mxu1 %v6471_v56  ;;  %v1480_v27 = vpop.f32.mrf.mxu0  ;;  %4707 = vmatpush3.bf16.msra.mxu1 %v5359_v38  ;;  %v1668_v7 = vadd.f32 %v6349_v1, %v1475_v16  ;;  %v2192_v1 = vmax.f32 %v1656_v37, 0.0 }
 0x1df   : > { %v6485_v14 = vpop.f32.mrf.mxu1  ;;  %4708 = vmatprep.subr.bf16.mxu1 %v5360_v0  ;;  %v6502_v0 = vpack.c.bf16 %v2193_v58, %v2189_v45  ;;  %v1481_v45 = vadd.f32 %v1480_v27, %v6336_v62 }
 0x1e0   : > { %v1482_v3 = vpop.f32.mrf.mxu0  ;;  %v2201_v58 = vmax.f32 %v1668_v7, 0.0 }
 0x1e1   : > { %v6492_v28 = vpop.f32.mrf.mxu1  ;;  %7674 = vst [vmem:[#allocation21_spill] sm:$0xff] %v6502_v0  ;;  %v1674_v27 = vadd.f32 %v6370_v23, %v1481_v45  ;;  %v1483_v41 = vadd.f32 %v1482_v3, %v6355_v53 }
 0x1e2   : > { %v1484_v59 = vpop.f32.mrf.mxu0  ;;  %4709 = vmatpush3.bf16.msra.mxu1 %v5361_v54  ;;  %v6530_v7 = vpack.c.bf16 %v2201_v58, %v2197_v8 }
 0x1e3   : > { %v6498_v38 = vpop.f32.mrf.mxu1  ;;  %4710 = vmatprep.subr.bf16.mxu1 %v5362_v12  ;;  %v1485_v16 = vadd.f32 %v1484_v59, %v6336_v62  ;;  %v2188_v12 = vmax.f32 %v1652_v50, 0.0  ;;  %v1676_v3 = vadd.f32 %v6375_v6, %v1483_v41 }
 0x1e4   : > { %v6506_v31 = vpop.f32.mrf.mxu0  ;;  %2146 = vmatmul.mubr.bf16.gmra.mxu0 %v6148_v21  ;;  %v1469_v21 = vadd.f32 %v6444_v24, %v6355_v53  ;;  %7676 = vst [vmem:[#allocation23_spill] sm:$0xff] %v6530_v7 }
 0x1e5   : > { %v6508_v52 = vpop.f32.mrf.mxu1  ;;  %3147 = vmatmul.mubr.bf16.gmra.mxu1 %v6495_v51  ;;  %v6524_v17 = vpack.c.bf16 %v2192_v1, %v2188_v12  ;;  %v1678_v59 = vadd.f32 %v6379_v60, %v1485_v16  ;;  %v2205_v12 = vmax.f32 %v1674_v27, 0.0  ;;  %v2208_v27 = vmax.f32 %v1676_v3, 0.0 }
 0x1e6   : > { %3156 = vmatprep.mubr.bf16.mxu1 %v6502_v0  ;;  %v1490_v42 = vpop.f32.mrf.mxu0  ;;  %4711 = vmatpush3.bf16.msra.mxu1 %v5363_v30  ;;  %v1662_v24 = vadd.f32 %v6329_v43, %v1469_v21  ;;  %v1479_v43 = vadd.f32 %v6475_v32, %v6355_v53 }
 0x1e7   : > { %v6515_v54 = vpop.f32.mrf.mxu1  ;;  %4712 = vmatprep.subr.bf16.mxu1 %v5364_v36  ;;  %7675 = vst [vmem:[#allocation22_spill] sm:$0xff] %v6524_v17  ;;  %v2209_v15 = vmax.f32 %v1678_v59, 0.0  ;;  %v1491_v23 = vadd.f32 %v1490_v42, %v6336_v62 }
 0x1e8   : > { %v1492_v22 = vpop.f32.mrf.mxu0  ;;  %v1672_v59 = vadd.f32 %v6359_v40, %v1479_v43  ;;  %v1489_v40 = vadd.f32 %v6506_v31, %v6355_v53 }
 0x1e9   : > { %v6521_v25 = vpop.f32.mrf.mxu1  ;;  %v1684_v42 = vadd.f32 %v6395_v61, %v1491_v23  ;;  %v1493_v6 = vadd.f32 %v1492_v22, %v6355_v53 }
 0x1ea   : > { %v1494_v37 = vpop.f32.mrf.mxu0  ;;  %4713 = vmatpush3.bf16.msra.mxu1 %v5365_v4  ;;  %v2196_v4 = vmax.f32 %v1662_v24, 0.0 }
 0x1eb   : > { %v6527_v30 = vpop.f32.mrf.mxu1  ;;  %4922 = vmatprep.subr.bf16.mxu1 %v6367_v34  ;;  %v1495_v34 = vadd.f32 %v1494_v37, %v6336_v62  ;;  %v6554_v37 = vpack.c.bf16 %v2209_v15, %v2205_v12  ;;  %v2213_v12 = vmax.f32 %v1684_v42, 0.0  ;;  %v1686_v22 = vadd.f32 %v6399_v9, %v1493_v6 }
 0x1ec   : > { %v1498_v36 = vpop.f32.mrf.mxu0  ;;  %v6548_v21 = vpack.c.bf16 %v2200_v48, %v2196_v4 }
 0x1ed   : > { %v6534_v50 = vpop.f32.mrf.mxu1  ;;  %3157 = vmatmul.mubr.bf16.gmra.mxu1 %v6524_v17  ;;  %v1688_v49 = vadd.f32 %v6405_v63, %v1495_v34  ;;  %7678 = vst [vmem:[#allocation25_spill] sm:$0xff] %v6554_v37  ;;  %v2204_v34 = vmax.f32 %v1672_v59, 0.0  ;;  %v1682_v59 = vadd.f32 %v6387_v20, %v1489_v40  ;;  %v2216_v42 = vmax.f32 %v1686_v22, 0.0 }
 0x1ee   : > { %3166 = vmatprep.mubr.bf16.mxu1 %v6530_v7  ;;  %v1500_v1 = vpop.f32.mrf.mxu0  ;;  %7677 = vst [vmem:[#allocation24_spill] sm:$0xff] %v6548_v21  ;;  %v1499_v20 = vadd.f32 %v1498_v36, %v6355_v53 }
 0x1ef   : > { %v6540_v60 = vpop.f32.mrf.mxu1  ;;  %v2217_v63 = vmax.f32 %v1688_v49, 0.0  ;;  %v1501_v61 = vadd.f32 %v1500_v1, %v6336_v62  ;;  %v6571_v23 = vpack.c.bf16 %v2208_v27, %v2204_v34 }
 0x1f0   : > { %v1502_v58 = vpop.f32.mrf.mxu0 }
 0x1f1   : > { %v6545_v16 = vpop.f32.mrf.mxu1  ;;  %7679 = vst [vmem:[#allocation26_spill] sm:$0xff] %v6571_v23  ;;  %v1694_v1 = vadd.f32 %v6423_v5, %v1501_v61  ;;  %v1503_v9 = vadd.f32 %v1502_v58, %v6355_v53 }
 0x1f2   : > { %v1504_v8 = vpop.f32.mrf.mxu0 }
 0x1f3   : > { %v6551_v45 = vpop.f32.mrf.mxu1  ;;  %v1505_v15 = vadd.f32 %v1504_v8, %v6336_v62  ;;  %v6577_v8 = vpack.c.bf16 %v2217_v63, %v2213_v12  ;;  %v2221_v12 = vmax.f32 %v1694_v1, 0.0  ;;  %v1696_v22 = vadd.f32 %v6430_v2, %v1503_v9 }
 0x1f4   : > { %v1508_v32 = vpop.f32.mrf.mxu0 }
 0x1f5   : > { %v6557_v24 = vpop.f32.mrf.mxu1  ;;  %3167 = vmatmul.mubr.bf16.gmra.mxu1 %v6548_v21  ;;  %v1698_v49 = vadd.f32 %v6436_v35, %v1505_v15  ;;  %7680 = vst [vmem:[#allocation27_spill] sm:$0xff] %v6577_v8  ;;  %v2212_v15 = vmax.f32 %v1682_v59, 0.0  ;;  %v2224_v1 = vmax.f32 %v1696_v22, 0.0 }
 0x1f6   : > { %3176 = vmatprep.mubr.bf16.mxu1 %v6554_v37  ;;  %v1510_v48 = vpop.f32.mrf.mxu0 }
 0x1f7   : > { %v6563_v41 = vpop.f32.mrf.mxu1  ;;  %v2225_v35 = vmax.f32 %v1698_v49, 0.0  ;;  %v1511_v5 = vadd.f32 %v1510_v48, %v6336_v62  ;;  %v6593_v61 = vpack.c.bf16 %v2216_v42, %v2212_v15 }
 0x1f8   : > { %v1512_v4 = vpop.f32.mrf.mxu0 }
 0x1f9   : > { %v6568_v43 = vpop.f32.mrf.mxu1  ;;  %7681 = vst [vmem:[#allocation28_spill] sm:$0xff] %v6593_v61  ;;  %v1704_v48 = vadd.f32 %v6454_v11, %v1511_v5  ;;  %v1513_v2 = vadd.f32 %v1512_v4, %v6355_v53 }
 0x1fa   : > { %v1514_v3 = vpop.f32.mrf.mxu0 }
 0x1fb   : > { %v6574_v37 = vpop.f32.mrf.mxu1  ;;  %v1515_v63 = vadd.f32 %v1514_v3, %v6336_v62  ;;  %v1692_v3 = vadd.f32 %v6415_v44, %v1499_v20  ;;  %v1509_v44 = vadd.f32 %v1508_v32, %v6355_v53  ;;  %v1706_v22 = vadd.f32 %v6461_v33, %v1513_v2 }
 0x1fc   : > { %v1518_v31 = vpop.f32.mrf.mxu0 }
 0x1fd   : > { %v6580_v21 = vpop.f32.mrf.mxu1  ;;  %3177 = vmatmul.mubr.bf16.gmra.mxu1 %v6571_v23  ;;  %v1708_v49 = vadd.f32 %v6467_v18, %v1515_v63  ;;  %v6599_v23 = vpack.c.bf16 %v2225_v35, %v2221_v12  ;;  %v2220_v63 = vmax.f32 %v1692_v3, 0.0  ;;  %v2229_v12 = vmax.f32 %v1704_v48, 0.0 }
 0x1fe   : > { %3186 = vmatprep.mubr.bf16.mxu1 %v6577_v8  ;;  %v1520_v27 = vpop.f32.mrf.mxu0  ;;  %v2232_v48 = vmax.f32 %v1706_v22, 0.0 }
 0x1ff   : > { %v6586_v6 = vpop.f32.mrf.mxu1  ;;  %7682 = vst [vmem:[#allocation29_spill] sm:$0xff] %v6599_v23  ;;  %v2233_v18 = vmax.f32 %v1708_v49, 0.0  ;;  %v1521_v11 = vadd.f32 %v1520_v27, %v6336_v62  ;;  %v6615_v5 = vpack.c.bf16 %v2224_v1, %v2220_v63 }
 0x200   : > { %v1522_v34 = vpop.f32.mrf.mxu0 }
 0x201   : > { %v6590_v40 = vpop.f32.mrf.mxu1  ;;  %7683 = vst [vmem:[#allocation30_spill] sm:$0xff] %v6615_v5  ;;  %v1714_v27 = vadd.f32 %v6485_v14, %v1521_v11  ;;  %v1523_v33 = vadd.f32 %v1522_v34, %v6355_v53 }
 0x202   : > { %v1524_v58 = vpop.f32.mrf.mxu0 }
 0x203   : > { %v6596_v8 = vpop.f32.mrf.mxu1  ;;  %v1525_v35 = vadd.f32 %v1524_v58, %v6336_v62  ;;  %v1702_v58 = vadd.f32 %v6446_v29, %v1509_v44  ;;  %v1519_v29 = vadd.f32 %v1518_v31, %v6355_v53  ;;  %v1716_v22 = vadd.f32 %v6492_v28, %v1523_v33 }
 0x204   : > { %v1528_v36 = vpop.f32.mrf.mxu0 }
 0x205   : > { %v6602_v59 = vpop.f32.mrf.mxu1  ;;  %3187 = vmatmul.mubr.bf16.gmra.mxu1 %v6593_v61  ;;  %v1718_v49 = vadd.f32 %v6498_v38, %v1525_v35  ;;  %v6621_v61 = vpack.c.bf16 %v2233_v18, %v2229_v12  ;;  %v2228_v35 = vmax.f32 %v1702_v58, 0.0  ;;  %v2237_v12 = vmax.f32 %v1714_v27, 0.0 }
 0x206   : > { %3196 = vmatprep.mubr.bf16.mxu1 %v6599_v23  ;;  %v1530_v42 = vpop.f32.mrf.mxu0  ;;  %v2240_v27 = vmax.f32 %v1716_v22, 0.0 }
 0x207   : > { %v6608_v9 = vpop.f32.mrf.mxu1  ;;  %7684 = vst [vmem:[#allocation31_spill] sm:$0xff] %v6621_v61  ;;  %v2241_v38 = vmax.f32 %v1718_v49, 0.0  ;;  %v1531_v14 = vadd.f32 %v1530_v42, %v6336_v62  ;;  %v6637_v11 = vpack.c.bf16 %v2232_v48, %v2228_v35 }
 0x208   : > { %v1532_v15 = vpop.f32.mrf.mxu0 }
 0x209   : > { %v6612_v20 = vpop.f32.mrf.mxu1  ;;  %7685 = vst [vmem:[#allocation32_spill] sm:$0xff] %v6637_v11  ;;  %v1724_v42 = vadd.f32 %v6515_v54, %v1531_v14  ;;  %v1533_v28 = vadd.f32 %v1532_v15, %v6355_v53 }
 0x20a   : > { %v1534_v4 = vpop.f32.mrf.mxu0 }
 0x20b   : > { %v6618_v23 = vpop.f32.mrf.mxu1  ;;  %v1535_v18 = vadd.f32 %v1534_v4, %v6336_v62  ;;  %v1712_v4 = vadd.f32 %v6477_v47, %v1519_v29  ;;  %v1529_v47 = vadd.f32 %v1528_v36, %v6355_v53  ;;  %v1726_v22 = vadd.f32 %v6521_v25, %v1533_v28 }
 0x20c   : > { %v1538_v32 = vpop.f32.mrf.mxu0 }
 0x20d   : > { %v6624_v3 = vpop.f32.mrf.mxu1  ;;  %3197 = vmatmul.mubr.bf16.gmra.mxu1 %v6615_v5  ;;  %v1728_v49 = vadd.f32 %v6527_v30, %v1535_v18  ;;  %v6643_v5 = vpack.c.bf16 %v2241_v38, %v2237_v12  ;;  %v2236_v18 = vmax.f32 %v1712_v4, 0.0  ;;  %v2245_v12 = vmax.f32 %v1724_v42, 0.0 }
 0x20e   : > { %3206 = vmatprep.mubr.bf16.mxu1 %v6621_v61  ;;  %v1540_v1 = vpop.f32.mrf.mxu0  ;;  %v2248_v25 = vmax.f32 %v1726_v22, 0.0 }
 0x20f   : > { %v6630_v2 = vpop.f32.mrf.mxu1  ;;  %7686 = vst [vmem:[#allocation33_spill] sm:$0xff] %v6643_v5  ;;  %v2249_v30 = vmax.f32 %v1728_v49, 0.0  ;;  %v1541_v54 = vadd.f32 %v1540_v1, %v6336_v62  ;;  %v6659_v14 = vpack.c.bf16 %v2240_v27, %v2236_v18 }
 0x210   : > { %v1542_v63 = vpop.f32.mrf.mxu0 }
 0x211   : > { %v6634_v44 = vpop.f32.mrf.mxu1  ;;  %7687 = vst [vmem:[#allocation34_spill] sm:$0xff] %v6659_v14  ;;  %v1734_v1 = vadd.f32 %v6540_v60, %v1541_v54  ;;  %v1543_v42 = vadd.f32 %v1542_v63, %v6355_v53 }
 0x212   : > { %v1544_v34 = vpop.f32.mrf.mxu0 }
 0x213   : > { %v6640_v61 = vpop.f32.mrf.mxu1  ;;  %v1545_v38 = vadd.f32 %v1544_v34, %v6336_v62  ;;  %v1722_v34 = vadd.f32 %v6508_v52, %v1529_v47  ;;  %v1736_v22 = vadd.f32 %v6545_v16, %v1543_v42 }
 0x214   : > { %v1548_v31 = vpop.f32.mrf.mxu0 }
 0x215   : > { %v6646_v58 = vpop.f32.mrf.mxu1  ;;  %3207 = vmatmul.mubr.bf16.gmra.mxu1 %v6637_v11  ;;  %v1738_v49 = vadd.f32 %v6551_v45, %v1545_v38  ;;  %v6665_v11 = vpack.c.bf16 %v2249_v30, %v2245_v12  ;;  %v2244_v52 = vmax.f32 %v1722_v34, 0.0  ;;  %v1539_v38 = vadd.f32 %v1538_v32, %v6355_v53 }
 0x216   : > { %3216 = vmatprep.mubr.bf16.mxu1 %v6643_v5  ;;  %v1550_v48 = vpop.f32.mrf.mxu0  ;;  %v2253_v12 = vmax.f32 %v1734_v1, 0.0  ;;  %v2256_v1 = vmax.f32 %v1736_v22, 0.0  ;;  %v7691_v22 = vsub.s32 2, %v6316_v57 }
 0x217   : > { %v6652_v33 = vpop.f32.mrf.mxu1  ;;  %7688 = vst [vmem:[#allocation35_spill] sm:$0xff] %v6665_v11  ;;  %v2257_v45 = vmax.f32 %v1738_v49, 0.0  ;;  %v1551_v60 = vadd.f32 %v1550_v48, %v6336_v62  ;;  %v6683_v54 = vpack.c.bf16 %v2248_v25, %v2244_v52 }
 0x218   : > { %v1552_v35 = vpop.f32.mrf.mxu0 }
 0x219   : > { %v6656_v29 = vpop.f32.mrf.mxu1  ;;  %7689 = vst [vmem:[#allocation36_spill] sm:$0xff] %v6683_v54  ;;  %v1744_v48 = vadd.f32 %v6563_v41, %v1551_v60  ;;  %v1553_v25 = vadd.f32 %v1552_v35, %v6355_v53  ;;  %v6712_v35 = vrot.slane %v6327_v26, %v7691_v22 }
 0x21a   : > { %v1554_v15 = vpop.f32.mrf.mxu0 }
 0x21b   : > { %v6662_v5 = vpop.f32.mrf.mxu1  ;;  %v1555_v30 = vadd.f32 %v1554_v15, %v6336_v62  ;;  %v1732_v15 = vadd.f32 %v6534_v50, %v1539_v38  ;;  %v642_v50 = vsub.s32 3, %v6316_v57  ;;  %v1549_v38 = vadd.f32 %v1548_v31, %v6355_v53 }
 0x21c   : > { %v6668_v36 = vpop.f32.mrf.mxu0  ;;  %v2261_v60 = vmax.f32 %v1744_v48, 0.0 }
 0x21d   : > { %v6670_v4 = vpop.f32.mrf.mxu1  ;;  %3217 = vmatmul.mubr.bf16.gmra.mxu1 %v6659_v14  ;;  %v1748_v49 = vadd.f32 %v6574_v37, %v1555_v30  ;;  %v6689_v14 = vpack.c.bf16 %v2257_v45, %v2253_v12  ;;  %v2252_v52 = vmax.f32 %v1732_v15, 0.0  ;;  %v6720_v31 = vrot.slane %v6327_v26, %v642_v50 }
 0x21e   : > { %3226 = vmatprep.mubr.bf16.mxu1 %v6665_v11  ;;  %v1560_v27 = vpop.f32.mrf.mxu0 }
 0x21f   : > { %v6676_v28 = vpop.f32.mrf.mxu1  ;;  %7690 = vst [vmem:[#allocation37_spill] sm:$0xff] %v6689_v14  ;;  %v2265_v45 = vmax.f32 %v1748_v49, 0.0  ;;  %v1561_v16 = vadd.f32 %v1560_v27, %v6336_v62  ;;  %v1746_v49 = vadd.f32 %v6568_v43, %v1553_v25  ;;  %v1742_v27 = vadd.f32 %v6557_v24, %v1549_v38 }
 0x220   : > { %v1562_v18 = vpop.f32.mrf.mxu0  ;;  %v1805_v43 = vadd.f32 %v6624_v3, %v6712_v35  ;;  %v1807_v24 = vadd.f32 %v6630_v2, %v6720_v31  ;;  %v1559_v3 = vadd.f32 %v6668_v36, %v6355_v53 }
 0x221   : > { %v6680_v47 = vpop.f32.mrf.mxu1  ;;  %v6723_v48 = vpack.c.bf16 %v2265_v45, %v2261_v60  ;;  %v2264_v26 = vmax.f32 %v1746_v49, 0.0  ;;  %v1563_v25 = vadd.f32 %v1562_v18, %v6355_v53  ;;  %v1809_v45 = vadd.f32 %v6634_v44, %v6712_v35 }
 0x222   : > { %v1564_v63 = vpop.f32.mrf.mxu0  ;;  %v1752_v17 = vadd.f32 %v6580_v21, %v1559_v3 }
 0x223   : > { %v6686_v11 = vpop.f32.mrf.mxu1  ;;  %v1565_v30 = vadd.f32 %v1564_v63, %v6336_v62  ;;  %7693 = vst [vmem:[#allocation39_spill] sm:$0xff] %v6723_v48  ;;  %v1756_v44 = vadd.f32 %v6590_v40, %v1563_v25 }
 0x224   : > { %v6692_v32 = vpop.f32.mrf.mxu0 }
 0x225   : > { %v6694_v34 = vpop.f32.mrf.mxu1  ;;  %3227 = vmatmul.mubr.bf16.gmra.mxu1 %v6683_v54  ;;  %v1758_v15 = vadd.f32 %v6596_v8, %v1565_v30 }
 0x226   : > { %3236 = vmatprep.mubr.bf16.mxu1 %v6689_v14  ;;  %v1570_v37 = vpop.f32.mrf.mxu0  ;;  %v6714_v14 = vpack.c.bf16 %v2256_v1, %v2252_v52  ;;  %v1754_v1 = vadd.f32 %v6586_v6, %v1561_v16  ;;  %v1811_v16 = vadd.f32 %v6640_v61, %v6720_v31  ;;  %v2260_v52 = vmax.f32 %v1742_v27, 0.0 }
 0x227   : > { %v6701_v42 = vpop.f32.mrf.mxu1  ;;  %v2273_v30 = vmax.f32 %v1758_v15, 0.0  ;;  %v1571_v49 = vadd.f32 %v1570_v37, %v6336_v62 }
 0x228   : > { %v1572_v12 = vpop.f32.mrf.mxu0  ;;  %7692 = vst [vmem:[#allocation38_spill] sm:$0xff] %v6714_v14  ;;  %v2269_v60 = vmax.f32 %v1754_v1, 0.0 }
 0x229   : > { %v6706_v41 = vpop.f32.mrf.mxu1  ;;  %v1764_v40 = vadd.f32 %v6608_v9, %v1571_v49  ;;  %v1573_v21 = vadd.f32 %v1572_v12, %v6355_v53  ;;  %v1819_v9 = vadd.f32 %v6656_v29, %v6712_v35 }
 0x22a   : > { %v1574_v54 = vpop.f32.mrf.mxu0  ;;  %v6754_v36 = vpack.c.bf16 %v2273_v30, %v2269_v60  ;;  %v1569_v30 = vadd.f32 %v6692_v32, %v6355_v53 }
 0x22b   : > { %v6717_v63 = vpop.f32.mrf.mxu1  ;;  %v1575_v6 = vadd.f32 %v1574_v54, %v6336_v62  ;;  %v2277_v29 = vmax.f32 %v1764_v40, 0.0  ;;  %v1766_v53 = vadd.f32 %v6612_v20, %v1573_v21  ;;  %v6806_v20 = vld [vmem:[%s5818_s1 + $0x2c0] ss:$12 sps:$4 sm:$0xff]   ;;  %v1827_v21 = vadd.f32 %v6676_v28, %v6720_v31 }
 0x22c   : > { %v1997_v22 = vpop.f32.mrf.mxu0  ;;  %v1831_v28 = vadd.f32 %v6686_v11, %v6720_v31 }
 0x22d   : > { %v6726_v57 = vpop.f32.mrf.mxu1  ;;  %3237 = vmatmul.mubr.bf16.gmra.mxu1 %v6714_v14  ;;  %v6748_v14 = vpack.c.bf16 %v2264_v26, %v2260_v52  ;;  %v1998_v54 = vadd.f32 %v1997_v22, %v1805_v43  ;;  %v1768_v27 = vadd.f32 %v6618_v23, %v1575_v6  ;;  %v1815_v23 = vadd.f32 %v6646_v58, %v6712_v35  ;;  %v6783_v52 = vld [vmem:[%s5818_s1 + $0x2d8] ss:$12 sps:$4 sm:$0xff]  }
 0x22e   : > { %3246 = vmatprep.mubr.bf16.mxu1 %v6723_v48  ;;  %v1999_v50 = vpop.f32.mrf.mxu0  ;;  %v2272_v43 = vmax.f32 %v1756_v44, 0.0  ;;  %v2268_v58 = vmax.f32 %v1752_v17, 0.0  ;;  %v6798_v44 = vld [vmem:[%s5818_s1 + $0x218] ss:$12 sps:$4 sm:$0xff]  }
 0x22f   : > { %v6734_v8 = vpop.f32.mrf.mxu1  ;;  %v2000_v2 = vadd.f32 %v1999_v50, %v1807_v24  ;;  %v1817_v50 = vadd.f32 %v6652_v33, %v6720_v31  ;;  %v1821_v33 = vadd.f32 %v6662_v5, %v6720_v31 }
 0x230   : > { %v2001_v38 = vpop.f32.mrf.mxu0  ;;  %v6788_v17 = vpack.c.bf16 %v2272_v43, %v2268_v58 }
 0x231   : > { %v6745_v18 = vpop.f32.mrf.mxu1  ;;  %v2002_v48 = vadd.f32 %v2001_v38, %v1809_v45  ;;  %v2159_v37 = vmax.f32 %v2000_v2, 0.0  ;;  %v6774_v45 = vld [vmem:[%s5818_s1 + $0x230] ss:$12 sps:$4 sm:$0xff]  }
 0x232   : > { %v2003_v61 = vpop.f32.mrf.mxu0 }
 0x233   : > { %v6751_v15 = vpop.f32.mrf.mxu1  ;;  %v2004_v7 = vadd.f32 %v2003_v61, %v1811_v16  ;;  %v2162_v1 = vmax.f32 %v2002_v48, 0.0  ;;  %v2158_v48 = vmax.f32 %v1998_v54, 0.0  ;;  %v1762_v54 = vadd.f32 %v6602_v59, %v1569_v30  ;;  %v6829_v30 = vld [vmem:[%s5818_s1 + $0x2a8] ss:$12 sps:$4 sm:$0xff]  }
 0x234   : > { %v2007_v62 = vpop.f32.mrf.mxu0  ;;  %v2280_v59 = vmax.f32 %v1766_v53, 0.0 }
 0x235   : > { %v6757_v0 = vpop.f32.mrf.mxu1  ;;  %3247 = vmatmul.mubr.bf16.gmra.mxu1 %v6748_v14  ;;  %v2163_v22 = vmax.f32 %v2004_v7, 0.0  ;;  %v2281_v7 = vmax.f32 %v1768_v27, 0.0  ;;  %v6778_v12 = vpack.c.bf16 %v2162_v1, %v2158_v48  ;;  %v2008_v32 = vadd.f32 %v2007_v62, %v1815_v23 }
 0x236   : > { %3256 = vmatprep.mubr.bf16.mxu1 %v6754_v36  ;;  %v2009_v25 = vpop.f32.mrf.mxu0  ;;  %v1829_v48 = vadd.f32 %v6680_v47, %v6712_v35 }
 0x237   : > { %v6765_v26 = vpop.f32.mrf.mxu1  ;;  %v6771_v24 = vpack.c.bf16 %v2163_v22, %v2159_v37  ;;  %v2010_v3 = vadd.f32 %v2009_v25, %v1817_v50  ;;  %v6795_v5 = vpack.c.bf16 %v2281_v7, %v2277_v29  ;;  %v1825_v37 = vadd.f32 %v6670_v4, %v6712_v35  ;;  %v6821_v50 = vld [vmem:[%s5818_s1 + $0x200] ss:$12 sps:$4 sm:$0xff]  }
 0x238   : > { %v2011_v16 = vpop.f32.mrf.mxu0  ;;  %v2166_v22 = vmax.f32 %v2008_v32, 0.0  ;;  %v6841_v32 = vld [vmem:[%s5818_s1 + $0x1e8] ss:$12 sps:$4 sm:$0xff]  }
 0x239   : > { %v6780_v6 = vpop.f32.mrf.mxu1  ;;  %v2012_v38 = vadd.f32 %v2011_v16, %v1819_v9  ;;  %3309 = vmatprep.mubr.bf16.mxu0 %v6771_v24  ;;  %v2167_v62 = vmax.f32 %v2010_v3, 0.0  ;;  %v2276_v9 = vmax.f32 %v1762_v54, 0.0  ;;  %v6848_v54 = vld [vmem:[%s5818_s1 + $0x290] ss:$12 sps:$4 sm:$0xff]  }
 0x23a   : > { %v2013_v49 = vpop.f32.mrf.mxu0  ;;  %3310 = vmatmul.mubr.bf16.vlgmr.msra.gmra.mxu0 %v6778_v12 }
 0x23b   : > { %v6791_v60 = vpop.f32.mrf.mxu1  ;;  %v2014_v2 = vadd.f32 %v2013_v49, %v1821_v33  ;;  %4811 = vmatpush3.bf16.msra.mxu0 %v6774_v45  ;;  %v2170_v61 = vmax.f32 %v2012_v38, 0.0  ;;  %v6834_v33 = vpack.c.bf16 %v2280_v59, %v2276_v9 }
 0x23c   : > { %v2017_v1 = vpop.f32.mrf.mxu0  ;;  %4812 = vmatprep.subr.bf16.mxu0 %v6783_v52 }
 0x23d   : > { %v6801_v27 = vpop.f32.mrf.mxu1  ;;  %3257 = vmatmul.mubr.bf16.gmra.mxu1 %v6788_v17  ;;  %v2171_v40 = vmax.f32 %v2014_v2, 0.0  ;;  %v6823_v7 = vpack.c.bf16 %v2170_v61, %v2166_v22  ;;  %v2018_v29 = vadd.f32 %v2017_v1, %v1825_v37  ;;  %v1837_v22 = vadd.f32 %v6701_v42, %v6720_v31 }
 0x23e   : > { %3266 = vmatprep.mubr.bf16.mxu1 %v6795_v5  ;;  %v2019_v43 = vpop.f32.mrf.mxu0  ;;  %v1841_v42 = vadd.f32 %v6717_v63, %v6720_v31 }
 0x23f   : > { %v6811_v23 = vpop.f32.mrf.mxu1  ;;  %v6817_v25 = vpack.c.bf16 %v2171_v40, %v2167_v62  ;;  %4813 = vmatpush3.bf16.msra.mxu0 %v6798_v44  ;;  %v2020_v47 = vadd.f32 %v2019_v43, %v1827_v21  ;;  %v1835_v62 = vadd.f32 %v6694_v34, %v6712_v35  ;;  %v2174_v40 = vmax.f32 %v2018_v29, 0.0 }
 0x240   : > { %v2021_v58 = vpop.f32.mrf.mxu0  ;;  %4814 = vmatprep.subr.bf16.mxu0 %v6806_v20  ;;  %v1839_v43 = vadd.f32 %v6706_v41, %v6712_v35 }
 0x241   : > { %v6825_v4 = vpop.f32.mrf.mxu1  ;;  %v2022_v16 = vadd.f32 %v2021_v58, %v1829_v48  ;;  %3319 = vmatprep.mubr.bf16.mxu0 %v6817_v25  ;;  %v2175_v61 = vmax.f32 %v2020_v47, 0.0  ;;  %v6863_v48 = vld [vmem:[%s5818_s1 + $0x1d0] ss:$12 sps:$4 sm:$0xff]   ;;  %v6871_v58 = vld [vmem:[%s5818_s1 + $0x278] ss:$12 sps:$4 sm:$0xff]  }
 0x242   : > { %v2023_v38 = vpop.f32.mrf.mxu0  ;;  %3320 = vmatmul.mubr.bf16.gmra.mxu0 %v6823_v7 }
 0x243   : > { %v6836_v3 = vpop.f32.mrf.mxu1  ;;  %v2024_v53 = vadd.f32 %v2023_v38, %v1831_v28  ;;  %4815 = vmatpush3.bf16.msra.mxu0 %v6821_v50  ;;  %v2178_v49 = vmax.f32 %v2022_v16, 0.0 }
 0x244   : > { %v2027_v2 = vpop.f32.mrf.mxu0  ;;  %4816 = vmatprep.subr.bf16.mxu0 %v6829_v30 }
 0x245   : > { %v6843_v11 = vpop.f32.mrf.mxu1  ;;  %3267 = vmatmul.mubr.bf16.gmra.mxu1 %v6834_v33  ;;  %v2179_v1 = vmax.f32 %v2024_v53, 0.0  ;;  %v2028_v47 = vadd.f32 %v2027_v2, %v1835_v62  ;;  %v6881_v53 = vld [vmem:[%s5818_s1 + $0x1b8] ss:$12 sps:$4 sm:$0xff]   ;;  %v6888_v2 = vld [vmem:[%s5818_s1 + $0x260] ss:$12 sps:$4 sm:$0xff]  }
 0x246   : > { %3502 = vmatprep.mubr.bf16.mxu1 %v6382_v46  ;;  %v2029_v59 = vpop.f32.mrf.mxu0  ;;  %v6865_v46 = vpack.c.bf16 %v2178_v49, %v2174_v40  ;;  %v1845_v40 = vadd.f32 %v6726_v57, %v6712_v35 }
 0x247   : > { %v6853_v37 = vpop.f32.mrf.mxu1  ;;  %v6859_v21 = vpack.c.bf16 %v2179_v1, %v2175_v61  ;;  %4817 = vmatpush3.bf16.msra.mxu0 %v6841_v32  ;;  %v2030_v41 = vadd.f32 %v2029_v59, %v1837_v22  ;;  %v2182_v59 = vmax.f32 %v2028_v47, 0.0 }
 0x248   : > { %v2031_v9 = vpop.f32.mrf.mxu0  ;;  %4818 = vmatprep.subr.bf16.mxu0 %v6848_v54 }
 0x249   : > { %v6867_v34 = vpop.f32.mrf.mxu1  ;;  %v2032_v28 = vadd.f32 %v2031_v9, %v1839_v43  ;;  %3329 = vmatprep.mubr.bf16.mxu0 %v6859_v21  ;;  %v2183_v1 = vmax.f32 %v2030_v41, 0.0  ;;  %v1849_v9 = vadd.f32 %v6745_v18, %v6712_v35 }
 0x24a   : > { %v2033_v29 = vpop.f32.mrf.mxu0  ;;  %3330 = vmatmul.mubr.bf16.gmra.mxu0 %v6865_v46 }
 0x24b   : > { %v6876_v16 = vpop.f32.mrf.mxu1  ;;  %v2034_v38 = vadd.f32 %v2033_v29, %v1841_v42  ;;  %4819 = vmatpush3.bf16.msra.mxu0 %v6863_v48  ;;  %v2186_v49 = vmax.f32 %v2032_v28, 0.0 }
 0x24c   : > { %v2037_v63 = vpop.f32.mrf.mxu0  ;;  %4820 = vmatprep.subr.bf16.mxu0 %v6871_v58 }
 0x24d   : > { %v6883_v61 = vpop.f32.mrf.mxu1  ;;  %3503 = vmatmul.mubr.bf16.vlgmr.msra.gmra.mxu1 %v6402_v19  ;;  %v2187_v62 = vmax.f32 %v2034_v38, 0.0  ;;  %v1847_v19 = vadd.f32 %v6734_v8, %v6720_v31  ;;  %v1851_v8 = vadd.f32 %v6751_v15, %v6720_v31  ;;  %v2038_v47 = vadd.f32 %v2037_v63, %v1845_v40 }
 0x24e   : > { %3510 = vmatprep.mubr.bf16.mxu1 %v6409_v39  ;;  %4930 = vmatpush3.bf16.msra.mxu1 %v6774_v45  ;;  %v2039_v43 = vpop.f32.mrf.mxu0  ;;  %v6905_v39 = vld [vmem:[%s5818_s1 + $0x1a0] ss:$12 sps:$4 sm:$0xff]   ;;  %v6907_v45 = vpack.c.bf16 %v2186_v49, %v2182_v59 }
 0x24f   : > { %v6894_v22 = vpop.f32.mrf.mxu1  ;;  %4923 = vmatprep.subr.bf16.mxu1 %v6783_v52  ;;  %v6901_v42 = vpack.c.bf16 %v2187_v62, %v2183_v1  ;;  %4821 = vmatpush3.bf16.msra.mxu0 %v6881_v53  ;;  %v6913_v52 = vld [vmem:[%s5818_s1 + $0x248] ss:$12 sps:$4 sm:$0xff]   ;;  %v2040_v18 = vadd.f32 %v2039_v43, %v1847_v19  ;;  %v2190_v40 = vmax.f32 %v2038_v47, 0.0 }
 0x250   : > { %v2041_v41 = vpop.f32.mrf.mxu0  ;;  %4822 = vmatprep.subr.bf16.mxu0 %v6888_v2  ;;  %v6925_v1 = vld [vmem:[%s5818_s1 + $0x188] ss:$12 sps:$4 sm:$0xff]  }
 0x251   : > { %v6909_v57 = vpop.f32.mrf.mxu1  ;;  %v2042_v28 = vadd.f32 %v2041_v41, %v1849_v9  ;;  %3339 = vmatprep.mubr.bf16.mxu0 %v6901_v42  ;;  %v1859_v9 = vadd.f32 %v6780_v6, %v6712_v35 }
 0x252   : > { %4931 = vmatpush3.bf16.msra.mxu1 %v6798_v44  ;;  %v2043_v38 = vpop.f32.mrf.mxu0  ;;  %3340 = vmatmul.mubr.bf16.gmra.mxu0 %v6907_v45  ;;  %v2191_v44 = vmax.f32 %v2040_v18, 0.0 }
 0x253   : > { %v6919_v29 = vpop.f32.mrf.mxu1  ;;  %4924 = vmatprep.subr.bf16.mxu1 %v6806_v20  ;;  %v2044_v49 = vadd.f32 %v2043_v38, %v1851_v8  ;;  %4823 = vmatpush3.bf16.msra.mxu0 %v6905_v39  ;;  %v2194_v15 = vmax.f32 %v2042_v28, 0.0  ;;  %v1855_v20 = vadd.f32 %v6757_v0, %v6712_v35  ;;  %v1861_v8 = vadd.f32 %v6791_v60, %v6720_v31 }
 0x254   : > { %v2047_v59 = vpop.f32.mrf.mxu0  ;;  %4824 = vmatprep.subr.bf16.mxu0 %v6913_v52 }
 0x255   : > { %v6927_v62 = vpop.f32.mrf.mxu1  ;;  %3511 = vmatmul.mubr.bf16.gmra.mxu1 %v6433_v13  ;;  %v2195_v63 = vmax.f32 %v2044_v49, 0.0  ;;  %v1857_v13 = vadd.f32 %v6765_v26, %v6720_v31  ;;  %v2048_v26 = vadd.f32 %v2047_v59, %v1855_v20  ;;  %v1867_v20 = vadd.f32 %v6811_v23, %v6720_v31 }
 0x256   : > { %3518 = vmatprep.mubr.bf16.mxu1 %v6440_v10  ;;  %4932 = vmatpush3.bf16.msra.mxu1 %v6821_v50  ;;  %v2049_v19 = vpop.f32.mrf.mxu0  ;;  %v6945_v10 = vpack.c.bf16 %v2194_v15, %v2190_v40 }
 0x257   : > { %v6935_v43 = vpop.f32.mrf.mxu1  ;;  %4925 = vmatprep.subr.bf16.mxu1 %v6829_v30  ;;  %v6942_v41 = vpack.c.bf16 %v2195_v63, %v2191_v44  ;;  %4825 = vmatpush3.bf16.msra.mxu0 %v6925_v1  ;;  %v2050_v18 = vadd.f32 %v2049_v19, %v1857_v13  ;;  %v2198_v59 = vmax.f32 %v2048_v26, 0.0 }
 0x258   : > { %v2051_v0 = vpop.f32.mrf.mxu0 }
 0x259   : > { %v6947_v50 = vpop.f32.mrf.mxu1  ;;  %v2052_v30 = vadd.f32 %v2051_v0, %v1859_v9  ;;  %3349 = vmatprep.mubr.bf16.mxu0 %v6942_v41  ;;  %v2199_v60 = vmax.f32 %v2050_v18, 0.0 }
 0x25a   : > { %4933 = vmatpush3.bf16.msra.mxu1 %v6841_v32  ;;  %v2053_v28 = vpop.f32.mrf.mxu0  ;;  %3350 = vmatmul.mubr.bf16.gmra.mxu0 %v6945_v10  ;;  %v1865_v32 = vadd.f32 %v6801_v27, %v6712_v35  ;;  %v1871_v27 = vadd.f32 %v6836_v3, %v6720_v31 }
 0x25b   : > { %v6953_v6 = vpop.f32.mrf.mxu1  ;;  %4926 = vmatprep.subr.bf16.mxu1 %v6848_v54  ;;  %v2054_v47 = vadd.f32 %v2053_v28, %v1861_v8  ;;  %v2202_v38 = vmax.f32 %v2052_v30, 0.0  ;;  %v7694_v28 = vld [vmem:[#allocation21_spill] sm:$0xff] }
 0x25c   : > { %v2057_v15 = vpop.f32.mrf.mxu0 }
 0x25d   : > { %v6957_v49 = vpop.f32.mrf.mxu1  ;;  %3519 = vmatmul.mubr.bf16.gmra.mxu1 %v6464_v55  ;;  %v2203_v44 = vmax.f32 %v2054_v47, 0.0  ;;  %v1869_v55 = vadd.f32 %v6825_v4, %v6712_v35  ;;  %v2058_v23 = vadd.f32 %v2057_v15, %v1865_v32  ;;  %v1877_v15 = vadd.f32 %v6853_v37, %v6720_v31 }
 0x25e   : > { %3526 = vmatprep.mubr.bf16.mxu1 %v6471_v56  ;;  %4934 = vmatpush3.bf16.msra.mxu1 %v6863_v48  ;;  %v2059_v54 = vpop.f32.mrf.mxu0  ;;  %v6973_v56 = vpack.c.bf16 %v2202_v38, %v2198_v59 }
 0x25f   : > { %v6964_v63 = vpop.f32.mrf.mxu1  ;;  %4927 = vmatprep.subr.bf16.mxu1 %v6871_v58  ;;  %v6971_v40 = vpack.c.bf16 %v2203_v44, %v2199_v60  ;;  %v2060_v13 = vadd.f32 %v2059_v54, %v1867_v20  ;;  %v2206_v47 = vmax.f32 %v2058_v23, 0.0  ;;  %v7696_v23 = vld [vmem:[#allocation23_spill] sm:$0xff] }
 0x260   : > { %v2061_v19 = vpop.f32.mrf.mxu0 }
 0x261   : > { %v6975_v48 = vpop.f32.mrf.mxu1  ;;  %v2062_v9 = vadd.f32 %v2061_v19, %v1869_v55  ;;  %3359 = vmatprep.mubr.bf16.mxu0 %v6971_v40  ;;  %v2207_v3 = vmax.f32 %v2060_v13, 0.0  ;;  %v7695_v13 = vld [vmem:[#allocation22_spill] sm:$0xff] }
 0x262   : > { %4935 = vmatpush3.bf16.msra.mxu1 %v6881_v53  ;;  %v2063_v4 = vpop.f32.mrf.mxu0  ;;  %3360 = vmatmul.mubr.bf16.gmra.mxu0 %v6973_v56  ;;  %v1875_v53 = vadd.f32 %v6843_v11, %v6712_v35  ;;  %v1881_v11 = vadd.f32 %v6876_v16, %v6720_v31 }
 0x263   : > { %v6981_v58 = vpop.f32.mrf.mxu1  ;;  %4928 = vmatprep.subr.bf16.mxu1 %v6888_v2  ;;  %v2064_v0 = vadd.f32 %v2063_v4, %v1871_v27  ;;  %v2210_v8 = vmax.f32 %v2062_v9, 0.0 }
 0x264   : > { %v2067_v30 = vpop.f32.mrf.mxu0 }
 0x265   : > { %v6985_v18 = vpop.f32.mrf.mxu1  ;;  %3527 = vmatmul.mubr.bf16.gmra.mxu1 %v6495_v51  ;;  %v2211_v26 = vmax.f32 %v2064_v0, 0.0  ;;  %v1879_v51 = vadd.f32 %v6867_v34, %v6712_v35  ;;  %v7001_v44 = vpack.c.bf16 %v2210_v8, %v2206_v47  ;;  %v2068_v37 = vadd.f32 %v2067_v30, %v1875_v53 }
 0x266   : > { %3534 = vmatprep.mubr.bf16.mxu1 %v7694_v28  ;;  %4936 = vmatpush3.bf16.msra.mxu1 %v6905_v39  ;;  %v2069_v2 = vpop.f32.mrf.mxu0  ;;  %v1887_v30 = vadd.f32 %v6894_v22, %v6720_v31 }
 0x267   : > { %v6992_v38 = vpop.f32.mrf.mxu1  ;;  %4929 = vmatprep.subr.bf16.mxu1 %v6913_v52  ;;  %v6999_v60 = vpack.c.bf16 %v2211_v26, %v2207_v3  ;;  %v2070_v59 = vadd.f32 %v2069_v2, %v1877_v15  ;;  %v2214_v4 = vmax.f32 %v2068_v37, 0.0  ;;  %v1889_v3 = vadd.f32 %v6909_v57, %v6712_v35  ;;  %v7697_v37 = vld [vmem:[#allocation24_spill] sm:$0xff] }
 0x268   : > { %v2071_v32 = vpop.f32.mrf.mxu0 }
 0x269   : > { %v7003_v39 = vpop.f32.mrf.mxu1  ;;  %v2072_v54 = vadd.f32 %v2071_v32, %v1879_v51  ;;  %3369 = vmatprep.mubr.bf16.mxu0 %v6999_v60  ;;  %v2215_v16 = vmax.f32 %v2070_v59, 0.0 }
 0x26a   : > { %4937 = vmatpush3.bf16.msra.mxu1 %v6925_v1  ;;  %v2073_v34 = vpop.f32.mrf.mxu0  ;;  %3370 = vmatmul.mubr.bf16.gmra.mxu0 %v7001_v44  ;;  %v1885_v1 = vadd.f32 %v6883_v61, %v6712_v35  ;;  %v1891_v61 = vadd.f32 %v6919_v29, %v6720_v31  ;;  %v7698_v29 = vld [vmem:[#allocation25_spill] sm:$0xff] }
 0x26b   : > { %v7009_v52 = vpop.f32.mrf.mxu1  ;;  %v2074_v20 = vadd.f32 %v2073_v34, %v1881_v11  ;;  %v2218_v55 = vmax.f32 %v2072_v54, 0.0 }
 0x26c   : > { %v2077_v27 = vpop.f32.mrf.mxu0 }
 0x26d   : > { %v7012_v19 = vpop.f32.mrf.mxu1  ;;  %3535 = vmatmul.mubr.bf16.gmra.mxu1 %v7695_v13  ;;  %v2219_v9 = vmax.f32 %v2074_v20, 0.0  ;;  %v7026_v28 = vpack.c.bf16 %v2218_v55, %v2214_v4  ;;  %v2078_v51 = vadd.f32 %v2077_v27, %v1885_v1  ;;  %v1895_v55 = vadd.f32 %v6927_v62, %v6712_v35 }
 0x26e   : > { %3542 = vmatprep.mubr.bf16.mxu1 %v7696_v23  ;;  %v2079_v8 = vpop.f32.mrf.mxu0  ;;  %v1899_v23 = vadd.f32 %v6947_v50, %v6712_v35  ;;  %v1901_v62 = vadd.f32 %v6953_v6, %v6720_v31  ;;  %v7700_v6 = vld [vmem:[#allocation27_spill] sm:$0xff] }
 0x26f   : > { %v7018_v0 = vpop.f32.mrf.mxu1  ;;  %v7024_v26 = vpack.c.bf16 %v2219_v9, %v2215_v16  ;;  %v2080_v2 = vadd.f32 %v2079_v8, %v1887_v30  ;;  %v2222_v27 = vmax.f32 %v2078_v51, 0.0  ;;  %v1897_v9 = vadd.f32 %v6935_v43, %v6720_v31 }
 0x270   : > { %v2081_v47 = vpop.f32.mrf.mxu0 }
 0x271   : > { %v7028_v53 = vpop.f32.mrf.mxu1  ;;  %v2082_v15 = vadd.f32 %v2081_v47, %v1889_v3  ;;  %3379 = vmatprep.mubr.bf16.mxu0 %v7024_v26  ;;  %v2223_v34 = vmax.f32 %v2080_v2, 0.0 }
 0x272   : > { %v2083_v22 = vpop.f32.mrf.mxu0  ;;  %3380 = vmatmul.mubr.bf16.gmra.mxu0 %v7026_v28 }
 0x273   : > { %v7033_v32 = vpop.f32.mrf.mxu1  ;;  %v2084_v57 = vadd.f32 %v2083_v22, %v1891_v61  ;;  %v2226_v11 = vmax.f32 %v2082_v15, 0.0 }
 0x274   : > { %v2087_v54 = vpop.f32.mrf.mxu0 }
 0x275   : > { %v7036_v59 = vpop.f32.mrf.mxu1  ;;  %3543 = vmatmul.mubr.bf16.gmra.mxu1 %v7697_v37  ;;  %v2227_v20 = vmax.f32 %v2084_v57, 0.0  ;;  %v7050_v4 = vpack.c.bf16 %v2226_v11, %v2222_v27  ;;  %v2088_v61 = vadd.f32 %v2087_v54, %v1895_v55  ;;  %v7699_v57 = vld [vmem:[#allocation26_spill] sm:$0xff]  ;;  %v1907_v55 = vadd.f32 %v6964_v63, %v6720_v31 }
 0x276   : > { %3550 = vmatprep.mubr.bf16.mxu1 %v7698_v29  ;;  %v2089_v16 = vpop.f32.mrf.mxu0  ;;  %v1909_v27 = vadd.f32 %v6975_v48, %v6712_v35 }
 0x277   : > { %v7042_v13 = vpop.f32.mrf.mxu1  ;;  %v7048_v1 = vpack.c.bf16 %v2227_v20, %v2223_v34  ;;  %v2090_v3 = vadd.f32 %v2089_v16, %v1897_v9  ;;  %v1905_v34 = vadd.f32 %v6957_v49, %v6712_v35  ;;  %v2230_v54 = vmax.f32 %v2088_v61, 0.0 }
 0x278   : > { %v2091_v30 = vpop.f32.mrf.mxu0  ;;  %v1911_v49 = vadd.f32 %v6981_v58, %v6720_v31  ;;  %v7702_v58 = vld [vmem:[#allocation29_spill] sm:$0xff] }
 0x279   : > { %v7052_v8 = vpop.f32.mrf.mxu1  ;;  %v2092_v47 = vadd.f32 %v2091_v30, %v1899_v23  ;;  %3389 = vmatprep.mubr.bf16.mxu0 %v7048_v1  ;;  %v2231_v11 = vmax.f32 %v2090_v3, 0.0 }
 0x27a   : > { %v2093_v43 = vpop.f32.mrf.mxu0  ;;  %3390 = vmatmul.mubr.bf16.gmra.mxu0 %v7050_v4 }
 0x27b   : > { %v7057_v2 = vpop.f32.mrf.mxu1  ;;  %v2094_v50 = vadd.f32 %v2093_v43, %v1901_v62  ;;  %v2234_v15 = vmax.f32 %v2092_v47, 0.0 }
 0x27c   : > { %v2097_v22 = vpop.f32.mrf.mxu0 }
 0x27d   : > { %v7060_v51 = vpop.f32.mrf.mxu1  ;;  %3551 = vmatmul.mubr.bf16.gmra.mxu1 %v7699_v57  ;;  %v2235_v37 = vmax.f32 %v2094_v50, 0.0  ;;  %v7074_v9 = vpack.c.bf16 %v2234_v15, %v2230_v54  ;;  %v2098_v47 = vadd.f32 %v2097_v22, %v1905_v34  ;;  %v7701_v57 = vld [vmem:[#allocation28_spill] sm:$0xff] }
 0x27e   : > { %3558 = vmatprep.mubr.bf16.mxu1 %v7700_v6  ;;  %v2099_v29 = vpop.f32.mrf.mxu0  ;;  %v1915_v6 = vadd.f32 %v6985_v18, %v6712_v35  ;;  %v1921_v18 = vadd.f32 %v7009_v52, %v6720_v31  ;;  %v7706_v52 = vld [vmem:[#allocation31_spill] sm:$0xff] }
 0x27f   : > { %v7066_v20 = vpop.f32.mrf.mxu1  ;;  %v7072_v16 = vpack.c.bf16 %v2235_v37, %v2231_v11  ;;  %v2100_v62 = vadd.f32 %v2099_v29, %v1907_v55  ;;  %v2238_v22 = vmax.f32 %v2098_v47, 0.0  ;;  %v1917_v29 = vadd.f32 %v6992_v38, %v6720_v31 }
 0x280   : > { %v2101_v30 = vpop.f32.mrf.mxu0  ;;  %v1919_v55 = vadd.f32 %v7003_v39, %v6712_v35 }
 0x281   : > { %v7076_v23 = vpop.f32.mrf.mxu1  ;;  %v2102_v3 = vadd.f32 %v2101_v30, %v1909_v27  ;;  %3399 = vmatprep.mubr.bf16.mxu0 %v7072_v16  ;;  %v2239_v11 = vmax.f32 %v2100_v62, 0.0 }
 0x282   : > { %v2103_v63 = vpop.f32.mrf.mxu0  ;;  %3400 = vmatmul.mubr.bf16.gmra.mxu0 %v7074_v9 }
 0x283   : > { %v7081_v61 = vpop.f32.mrf.mxu1  ;;  %v2104_v48 = vadd.f32 %v2103_v63, %v1911_v49  ;;  %v2242_v43 = vmax.f32 %v2102_v3, 0.0 }
 0x284   : > { %v2107_v15 = vpop.f32.mrf.mxu0 }
 0x285   : > { %v7084_v50 = vpop.f32.mrf.mxu1  ;;  %3559 = vmatmul.mubr.bf16.gmra.mxu1 %v7701_v57  ;;  %v2243_v37 = vmax.f32 %v2104_v48, 0.0  ;;  %v7098_v30 = vpack.c.bf16 %v2242_v43, %v2238_v22  ;;  %v2108_v63 = vadd.f32 %v2107_v15, %v1915_v6 }
 0x286   : > { %3566 = vmatprep.mubr.bf16.mxu1 %v7702_v58  ;;  %v2109_v54 = vpop.f32.mrf.mxu0 }
 0x287   : > { %v7090_v34 = vpop.f32.mrf.mxu1  ;;  %v7096_v27 = vpack.c.bf16 %v2243_v37, %v2239_v11  ;;  %7704 = vst [vmem:[#allocation22_spill] sm:$0xff] %v7098_v30  ;;  %v2110_v3 = vadd.f32 %v2109_v54, %v1917_v29  ;;  %v7705_v37 = vld [vmem:[#allocation30_spill] sm:$0xff]  ;;  %v1925_v54 = vadd.f32 %v7012_v19, %v6712_v35  ;;  %v2246_v15 = vmax.f32 %v2108_v63, 0.0 }
 0x288   : > { %v2111_v62 = vpop.f32.mrf.mxu0  ;;  %v1931_v19 = vadd.f32 %v7033_v32, %v6720_v31  ;;  %v7710_v32 = vld [vmem:[#allocation33_spill] sm:$0xff] }
 0x289   : > { %7703 = vst [vmem:[#allocation21_spill] sm:$0xff] %v7096_v27  ;;  %v7100_v49 = vpop.f32.mrf.mxu1  ;;  %v2112_v47 = vadd.f32 %v2111_v62, %v1919_v55  ;;  %3409 = vmatprep.mubr.bf16.mxu0 %v7096_v27  ;;  %v2247_v58 = vmax.f32 %v2110_v3, 0.0  ;;  %v1927_v55 = vadd.f32 %v7018_v0, %v6720_v31  ;;  %v1929_v62 = vadd.f32 %v7028_v53, %v6712_v35 }
 0x28a   : > { %v2113_v38 = vpop.f32.mrf.mxu0  ;;  %3410 = vmatmul.mubr.bf16.gmra.mxu0 %v7098_v30 }
 0x28b   : > { %v7105_v48 = vpop.f32.mrf.mxu1  ;;  %v2114_v39 = vadd.f32 %v2113_v38, %v1921_v18  ;;  %v2250_v57 = vmax.f32 %v2112_v47, 0.0 }
 0x28c   : > { %v2117_v43 = vpop.f32.mrf.mxu0 }
 0x28d   : > { %v7108_v11 = vpop.f32.mrf.mxu1  ;;  %3567 = vmatmul.mubr.bf16.gmra.mxu1 %v7705_v37  ;;  %v2251_v22 = vmax.f32 %v2114_v39, 0.0  ;;  %v7122_v47 = vpack.c.bf16 %v2250_v57, %v2246_v15  ;;  %v2118_v37 = vadd.f32 %v2117_v43, %v1925_v54  ;;  %v7709_v15 = vld [vmem:[#allocation32_spill] sm:$0xff] }
 0x28e   : > { %3574 = vmatprep.mubr.bf16.mxu1 %v7706_v52  ;;  %v2119_v6 = vpop.f32.mrf.mxu0 }
 0x28f   : > { %v7114_v29 = vpop.f32.mrf.mxu1  ;;  %v7120_v18 = vpack.c.bf16 %v2251_v22, %v2247_v58  ;;  %7708 = vst [vmem:[#allocation24_spill] sm:$0xff] %v7122_v47  ;;  %v2120_v63 = vadd.f32 %v2119_v6, %v1927_v55  ;;  %v1935_v6 = vadd.f32 %v7036_v59, %v6712_v35  ;;  %v2254_v43 = vmax.f32 %v2118_v37, 0.0 }
 0x290   : > { %v2121_v3 = vpop.f32.mrf.mxu0  ;;  %v1941_v59 = vadd.f32 %v7057_v2, %v6720_v31  ;;  %v7714_v2 = vld [vmem:[#allocation35_spill] sm:$0xff] }
 0x291   : > { %7707 = vst [vmem:[#allocation23_spill] sm:$0xff] %v7120_v18  ;;  %v7124_v38 = vpop.f32.mrf.mxu1  ;;  %v2122_v39 = vadd.f32 %v2121_v3, %v1929_v62  ;;  %3419 = vmatprep.mubr.bf16.mxu0 %v7120_v18  ;;  %v2255_v30 = vmax.f32 %v2120_v63, 0.0  ;;  %v1937_v62 = vadd.f32 %v7042_v13, %v6720_v31  ;;  %v1939_v3 = vadd.f32 %v7052_v8, %v6712_v35 }
 0x292   : > { %v2123_v52 = vpop.f32.mrf.mxu0  ;;  %3420 = vmatmul.mubr.bf16.gmra.mxu0 %v7122_v47 }
 0x293   : > { %v7129_v0 = vpop.f32.mrf.mxu1  ;;  %v2124_v53 = vadd.f32 %v2123_v52, %v1931_v19  ;;  %v2258_v58 = vmax.f32 %v2122_v39, 0.0 }
 0x294   : > { %v2127_v57 = vpop.f32.mrf.mxu0 }
 0x295   : > { %v7132_v22 = vpop.f32.mrf.mxu1  ;;  %3575 = vmatmul.mubr.bf16.gmra.mxu1 %v7709_v15  ;;  %v2259_v27 = vmax.f32 %v2124_v53, 0.0  ;;  %v7146_v39 = vpack.c.bf16 %v2258_v58, %v2254_v43  ;;  %v2128_v15 = vadd.f32 %v2127_v57, %v1935_v6  ;;  %v7713_v43 = vld [vmem:[#allocation34_spill] sm:$0xff] }
 0x296   : > { %3582 = vmatprep.mubr.bf16.mxu1 %v7710_v32  ;;  %v2129_v54 = vpop.f32.mrf.mxu0 }
 0x297   : > { %v7138_v55 = vpop.f32.mrf.mxu1  ;;  %v7144_v19 = vpack.c.bf16 %v2259_v27, %v2255_v30  ;;  %7712 = vst [vmem:[#allocation26_spill] sm:$0xff] %v7146_v39  ;;  %v2130_v37 = vadd.f32 %v2129_v54, %v1937_v62  ;;  %v1945_v54 = vadd.f32 %v7060_v51, %v6712_v35  ;;  %v2262_v57 = vmax.f32 %v2128_v15, 0.0 }
 0x298   : > { %v2131_v63 = vpop.f32.mrf.mxu0  ;;  %v1951_v51 = vadd.f32 %v7081_v61, %v6720_v31  ;;  %v7718_v61 = vld [vmem:[#allocation37_spill] sm:$0xff] }
 0x299   : > { %7711 = vst [vmem:[#allocation25_spill] sm:$0xff] %v7144_v19  ;;  %v7148_v52 = vpop.f32.mrf.mxu1  ;;  %v2132_v53 = vadd.f32 %v2131_v63, %v1939_v3  ;;  %3429 = vmatprep.mubr.bf16.mxu0 %v7144_v19  ;;  %v2263_v47 = vmax.f32 %v2130_v37, 0.0  ;;  %v1947_v3 = vadd.f32 %v7066_v20, %v6720_v31  ;;  %v1949_v63 = vadd.f32 %v7076_v23, %v6712_v35 }
 0x29a   : > { %v2133_v32 = vpop.f32.mrf.mxu0  ;;  %3430 = vmatmul.mubr.bf16.gmra.mxu0 %v7146_v39 }
 0x29b   : > { %v7153_v13 = vpop.f32.mrf.mxu1  ;;  %v2134_v8 = vadd.f32 %v2133_v32, %v1941_v59  ;;  %v2266_v27 = vmax.f32 %v2132_v53, 0.0 }
 0x29c   : > { %v2137_v30 = vpop.f32.mrf.mxu0 }
 0x29d   : > { %v7156_v58 = vpop.f32.mrf.mxu1  ;;  %3583 = vmatmul.mubr.bf16.gmra.mxu1 %v7713_v43  ;;  %v2267_v18 = vmax.f32 %v2134_v8, 0.0  ;;  %v7170_v53 = vpack.c.bf16 %v2266_v27, %v2262_v57  ;;  %v2138_v43 = vadd.f32 %v2137_v30, %v1945_v54  ;;  %v7717_v57 = vld [vmem:[#allocation36_spill] sm:$0xff] }
 0x29e   : > { %3590 = vmatprep.mubr.bf16.mxu1 %v7714_v2  ;;  %v2139_v6 = vpop.f32.mrf.mxu0 }
 0x29f   : > { %v7162_v62 = vpop.f32.mrf.mxu1  ;;  %v7168_v59 = vpack.c.bf16 %v2267_v18, %v2263_v47  ;;  %7716 = vst [vmem:[#allocation28_spill] sm:$0xff] %v7170_v53  ;;  %v2140_v15 = vadd.f32 %v2139_v6, %v1947_v3  ;;  %v1955_v6 = vadd.f32 %v7084_v50, %v6712_v35  ;;  %v2270_v30 = vmax.f32 %v2138_v43, 0.0 }
 0x2a0   : > { %v2141_v37 = vpop.f32.mrf.mxu0 }
 0x2a1   : > { %7715 = vst [vmem:[#allocation27_spill] sm:$0xff] %v7168_v59  ;;  %v7172_v32 = vpop.f32.mrf.mxu1  ;;  %v2142_v8 = vadd.f32 %v2141_v37, %v1949_v63  ;;  %3439 = vmatprep.mubr.bf16.mxu0 %v7168_v59  ;;  %v2271_v39 = vmax.f32 %v2140_v15, 0.0  ;;  %v1957_v63 = vadd.f32 %v7090_v34, %v6720_v31  ;;  %v1959_v37 = vadd.f32 %v7100_v49, %v6712_v35  ;;  %v7720_v35 = vld [vmem:[#allocation38_spill] sm:$0xff] }
 0x2a2   : > { %v2143_v2 = vpop.f32.mrf.mxu0  ;;  %3440 = vmatmul.mubr.bf16.gmra.mxu0 %v7170_v53 }
 0x2a3   : > { %v7177_v20 = vpop.f32.mrf.mxu1  ;;  %v2144_v23 = vadd.f32 %v2143_v2, %v1951_v51  ;;  %v2274_v18 = vmax.f32 %v2142_v8, 0.0 }
 0x2a4   : > { %v2147_v47 = vpop.f32.mrf.mxu0 }
 0x2a5   : > { %v7180_v27 = vpop.f32.mrf.mxu1  ;;  %3591 = vmatmul.mubr.bf16.gmra.mxu1 %v7717_v57  ;;  %v2275_v19 = vmax.f32 %v2144_v23, 0.0  ;;  %v2438_v8 = vpack.c.bf16 %v2274_v18, %v2270_v30  ;;  %v1961_v23 = vadd.f32 %v7105_v48, %v6720_v31  ;;  %v2148_v43 = vadd.f32 %v2147_v47, %v1955_v6 }
 0x2a6   : > { %3598 = vmatprep.mubr.bf16.mxu1 %v7718_v61  ;;  %v2149_v54 = vpop.f32.mrf.mxu0 }
 0x2a7   : > { %v7186_v3 = vpop.f32.mrf.mxu1  ;;  %v2439_v51 = vpack.c.bf16 %v2275_v19, %v2271_v39  ;;  %v2150_v57 = vadd.f32 %v2149_v54, %v1957_v63  ;;  %v7721_v39 = vld [vmem:[#allocation39_spill] sm:$0xff]  ;;  %v2278_v18 = vmax.f32 %v2148_v43, 0.0 }
 0x2a8   : > { %7719 = vst [vmem:[#allocation29_spill] sm:$0xff] %v7186_v3  ;;  %v2151_v2 = vpop.f32.mrf.mxu0 }
 0x2a9   : > { %v7192_v15 = vpop.f32.mrf.mxu1  ;;  %v2152_v50 = vadd.f32 %v2151_v2, %v1959_v37  ;;  %3449 = vmatprep.mubr.bf16.mxu0 %v2439_v51  ;;  %v2279_v49 = vmax.f32 %v2150_v57, 0.0 }
 0x2aa   : > { %v2153_v61 = vpop.f32.mrf.mxu0  ;;  %3450 = vmatmul.mubr.bf16.gmra.mxu0 %v2438_v8 }
 0x2ab   : > { %v7196_v53 = vpop.f32.mrf.mxu1  ;;  %v2154_v34 = vadd.f32 %v2153_v61, %v1961_v23  ;;  %v2282_v59 = vmax.f32 %v2152_v50, 0.0 }
 0x2ad   : > { %v7198_v3 = vpop.f32.mrf.mxu1  ;;  %3599 = vmatmul.mubr.bf16.gmra.mxu1 %v7720_v35  ;;  %v2283_v19 = vmax.f32 %v2154_v34, 0.0  ;;  %v2442_v30 = vpack.c.bf16 %v2282_v59, %v2278_v18 }
 0x2ae   : > { %3606 = vmatprep.mubr.bf16.mxu1 %v7721_v39 }
 0x2af   : > { %v7202_v31 = vpop.f32.mrf.mxu1  ;;  %v2443_v48 = vpack.c.bf16 %v2283_v19, %v2279_v49 }
 0x2b1   : > { %v7204_v47 = vpop.f32.mrf.mxu1  ;;  %3459 = vmatprep.mubr.bf16.mxu0 %v2443_v48 }
 0x2b2   : > { %3460 = vmatmul.mubr.bf16.gmra.mxu0 %v2442_v30 }
 0x2b3   : > { %v7206_v6 = vpop.f32.mrf.mxu1  ;;  %3663 = vmatprep.mubr.bf16.mxu0 %v6771_v24 }
 0x2b5   : > { %v7209_v54 = vpop.f32.mrf.mxu1  ;;  %3607 = vmatmul.mubr.bf16.gmra.mxu1 %v6748_v14 }
 0x2b6   : > { %3614 = vmatprep.mubr.bf16.mxu1 %v6754_v36 }
 0x2b7   : > { %v7213_v63 = vpop.f32.mrf.mxu1 }
 0x2b9   : > { %v7215_v37 = vpop.f32.mrf.mxu1 }
 0x2ba   : > { %3664 = vmatmul.mubr.bf16.vlgmr.msra.gmra.mxu0 %v6778_v12 }
 0x2bb   : > { %v7217_v2 = vpop.f32.mrf.mxu1  ;;  %3671 = vmatprep.mubr.bf16.mxu0 %v6817_v25 }
 0x2bd   : > { %v7221_v59 = vpop.f32.mrf.mxu1  ;;  %3615 = vmatmul.mubr.bf16.gmra.mxu1 %v6788_v17 }
 0x2be   : > { %3622 = vmatprep.mubr.bf16.mxu1 %v6795_v5 }
 0x2bf   : > { %v7225_v24 = vpop.f32.mrf.mxu1 }
 0x2c1   : > { %v7227_v14 = vpop.f32.mrf.mxu1 }
 0x2c2   : > { %3672 = vmatmul.mubr.bf16.gmra.mxu0 %v6823_v7 }
 0x2c3   : > { %v7229_v36 = vpop.f32.mrf.mxu1  ;;  %3679 = vmatprep.mubr.bf16.mxu0 %v6859_v21 }
 0x2c5   : > { %v7233_v23 = vpop.f32.mrf.mxu1  ;;  %3623 = vmatmul.mubr.bf16.gmra.mxu1 %v6834_v33 }
 0x2c6   : > { %3775 = vmatprep.mubr.bf16.mxu1 %v2439_v51 }
 0x2c7   : > { %v7236_v12 = vpop.f32.mrf.mxu1 }
 0x2c9   : > { %v7238_v17 = vpop.f32.mrf.mxu1 }
 0x2ca   : > { %3680 = vmatmul.mubr.bf16.gmra.mxu0 %v6865_v46 }
 0x2cb   : > { %v7240_v5 = vpop.f32.mrf.mxu1  ;;  %3687 = vmatprep.mubr.bf16.mxu0 %v6901_v42 }
 0x2cd   : > { %v7244_v25 = vpop.f32.mrf.mxu1  ;;  %3776 = vmatmul.mubr.bf16.vlgmr.msra.gmra.mxu1 %v2438_v8 }
 0x2ce   : > { %3783 = vmatprep.mubr.bf16.mxu1 %v2443_v48 }
 0x2cf   : > { %v7246_v7 = vpop.f32.mrf.mxu1 }
 0x2d1   : > { %v7248_v21 = vpop.f32.mrf.mxu1 }
 0x2d2   : > { %3688 = vmatmul.mubr.bf16.gmra.mxu0 %v6907_v45 }
 0x2d3   : > { %v7250_v33 = vpop.f32.mrf.mxu1  ;;  %3695 = vmatprep.mubr.bf16.mxu0 %v6942_v41 }
 0x2d5   : > { %v7254_v51 = vpop.f32.mrf.mxu1  ;;  %3784 = vmatmul.mubr.bf16.gmra.mxu1 %v2442_v30 }
 0x2d7   : > { %v7256_v46 = vpop.f32.mrf.mxu1 }
 0x2d9   : > { %v7258_v42 = vpop.f32.mrf.mxu1 }
 0x2da   : > { %3696 = vmatmul.mubr.bf16.gmra.mxu0 %v6945_v10 }
 0x2db   : > { %v7260_v57 = vpop.f32.mrf.mxu1  ;;  %3703 = vmatprep.mubr.bf16.mxu0 %v6971_v40 }
 0x2dd   : > { %v7264_v8 = vpop.f32.mrf.mxu1 }
 0x2df   : > { %v7266_v50 = vpop.f32.mrf.mxu1 }
 0x2e1   : > { %v7268_v45 = vpop.f32.mrf.mxu1 }
 0x2e2   : > { %3704 = vmatmul.mubr.bf16.gmra.mxu0 %v6973_v56 }
 0x2e3   : > { %v7270_v41 = vpop.f32.mrf.mxu1  ;;  %3711 = vmatprep.mubr.bf16.mxu0 %v6999_v60 }
 0x2e5   : > { %v7274_v43 = vpop.f32.mrf.mxu1 }
 0x2e7   : > { %v7276_v61 = vpop.f32.mrf.mxu1 }
 0x2e9   : > { %v7278_v34 = vpop.f32.mrf.mxu1 }
 0x2ea   : > { %3712 = vmatmul.mubr.bf16.gmra.mxu0 %v7001_v44 }
 0x2eb   : > { %v7280_v10 = vpop.f32.mrf.mxu1  ;;  %3719 = vmatprep.mubr.bf16.mxu0 %v7024_v26  ;;  %v2284_v26 = vld [vmem:[#allocation2 + $0x2b0] sm:$0xff] }
 0x2ed   : > { %v7284_v40 = vpop.f32.mrf.mxu1 }
 0x2ee   : > { %7722 = vst [vmem:[#allocation30_spill] sm:$0xff] %v7284_v40 }
 0x2ef   : > { %v7286_v35 = vpop.f32.mrf.mxu1 }
 0x2f0   : > { %7723 = vst [vmem:[#allocation31_spill] sm:$0xff] %v7286_v35 }
 0x2f1   : > { %v7288_v49 = vpop.f32.mrf.mxu1 }
 0x2f2   : > { %7724 = vst [vmem:[#allocation32_spill] sm:$0xff] %v7288_v49  ;;  %3720 = vmatmul.mubr.bf16.gmra.mxu0 %v7026_v28  ;;  %v2285_v28 = vld [vmem:[#allocation2 + $0xd0] sm:$0xff] }
 0x2f3   : > { %v7290_v56 = vpop.f32.mrf.mxu1  ;;  %3727 = vmatprep.mubr.bf16.mxu0 %v7048_v1 }
 0x2f4   : > { %7725 = vst [vmem:[#allocation33_spill] sm:$0xff] %v7290_v56 }
 0x2f5   : > { %v7294_v60 = vpop.f32.mrf.mxu1 }
 0x2f6   : > { %7726 = vst [vmem:[#allocation34_spill] sm:$0xff] %v7294_v60 }
 0x2f7   : > { %v7296_v19 = vpop.f32.mrf.mxu1 }
 0x2f8   : > { %7727 = vst [vmem:[#allocation35_spill] sm:$0xff] %v7296_v19 }
 0x2f9   : > { %v7298_v39 = vpop.f32.mrf.mxu1 }
 0x2fa   : > { %7728 = vst [vmem:[#allocation36_spill] sm:$0xff] %v7298_v39  ;;  %v3311_v18 = vpop.f32.mrf.mxu0  ;;  %3728 = vmatmul.mubr.bf16.gmra.mxu0 %v7050_v4  ;;  %v2287_v39 = vld [vmem:[#allocation2 + $0x48] sm:$0xff] }
 0x2fb   : > { %v7300_v44 = vpop.f32.mrf.mxu1  ;;  %v3312_v48 = vadd.f32 %v3311_v18, %v7108_v11  ;;  %3735 = vmatprep.mubr.bf16.mxu0 %v7072_v16  ;;  %v2288_v11 = vld [vmem:[#allocation2 + $0x30] sm:$0xff] }
 0x2fc   : > { %7729 = vst [vmem:[#allocation37_spill] sm:$0xff] %v7300_v44  ;;  %v3313_v1 = vpop.f32.mrf.mxu0 }
 0x2fd   : > { %v7305_v30 = vpop.f32.mrf.mxu1  ;;  %v3792_v56 = vadd.f32 %v3312_v48, %v2284_v26  ;;  %v3314_v60 = vadd.f32 %v3313_v1, %v7114_v29  ;;  %v2290_v26 = vld [vmem:[#allocation2 + $0xf8] sm:$0xff] }
 0x2fe   : > { %7730 = vst [vmem:[#allocation38_spill] sm:$0xff] %v7305_v30  ;;  %v3315_v49 = vpop.f32.mrf.mxu0 }
 0x2ff   : > { %v7308_v19 = vpop.f32.mrf.mxu1  ;;  %3888 = vst [vmem:[#allocation2 + $0x2b0] sm:$0xff] %v3792_v56  ;;  %v3793_v44 = vadd.f32 %v3314_v60, %v2285_v28  ;;  %v3316_v35 = vadd.f32 %v3315_v49, %v7124_v38  ;;  %v7731_v60 = vld [vmem:[#allocation21_spill] sm:$0xff] }
 0x300   : > { %v3317_v18 = vpop.f32.mrf.mxu0  ;;  %v2291_v49 = vld [vmem:[#allocation2 + $0x78] sm:$0xff] }
 0x301   : > { %v7311_v4 = vpop.f32.mrf.mxu1  ;;  %3889 = vst [vmem:[#allocation2 + $0xd0] sm:$0xff] %v3793_v44  ;;  %v3795_v16 = vadd.f32 %v3316_v35, %v2287_v39  ;;  %v3318_v30 = vadd.f32 %v3317_v18, %v7129_v0  ;;  %v2293_v44 = vld [vmem:[#allocation2 + $0xe0] sm:$0xff] }
 0x302   : > { %v3321_v29 = vpop.f32.mrf.mxu0  ;;  %3736 = vmatmul.mubr.bf16.gmra.mxu0 %v7074_v9 }
 0x303   : > { %v7314_v40 = vpop.f32.mrf.mxu1  ;;  %3891 = vst [vmem:[#allocation2 + $0x48] sm:$0xff] %v3795_v16  ;;  %v3796_v48 = vadd.f32 %v3318_v30, %v2288_v11  ;;  %v3322_v56 = vadd.f32 %v3321_v29, %v7132_v22  ;;  %3743 = vmatprep.mubr.bf16.mxu0 %v7731_v60  ;;  %v2294_v22 = vld [vmem:[#allocation2 + $0x2f8] sm:$0xff] }
 0x304   : > { %v3323_v28 = vpop.f32.mrf.mxu0 }
 0x305   : > { %v7319_v38 = vpop.f32.mrf.mxu1  ;;  %3892 = vst [vmem:[#allocation2 + $0x30] sm:$0xff] %v3796_v48  ;;  %v3798_v35 = vadd.f32 %v3322_v56, %v2290_v26  ;;  %v3324_v0 = vadd.f32 %v3323_v28, %v7138_v55  ;;  %v2296_v26 = vld [vmem:[#allocation2 + $0x2a0] sm:$0xff] }
 0x306   : > { %v3325_v1 = vpop.f32.mrf.mxu0  ;;  %v7732_v56 = vld [vmem:[#allocation22_spill] sm:$0xff]  ;;  %v7733_v28 = vld [vmem:[#allocation23_spill] sm:$0xff] }
 0x307   : > { %v7322_v39 = vpop.f32.mrf.mxu1  ;;  %3894 = vst [vmem:[#allocation2 + $0xf8] sm:$0xff] %v3798_v35  ;;  %v3799_v9 = vadd.f32 %v3324_v0, %v2291_v49  ;;  %v3326_v30 = vadd.f32 %v3325_v1, %v7148_v52  ;;  %v2297_v52 = vld [vmem:[#allocation2 + $0x168] sm:$0xff] }
 0x308   : > { %v3327_v18 = vpop.f32.mrf.mxu0 }
 0x309   : > { %v7325_v11 = vpop.f32.mrf.mxu1  ;;  %3895 = vst [vmem:[#allocation2 + $0x78] sm:$0xff] %v3799_v9  ;;  %v3801_v16 = vadd.f32 %v3326_v30, %v2293_v44  ;;  %v3328_v29 = vadd.f32 %v3327_v18, %v7153_v13  ;;  %v2299_v13 = vld [vmem:[#allocation2 + $0x40] sm:$0xff] }
 0x30a   : > { %v3331_v55 = vpop.f32.mrf.mxu0  ;;  %3744 = vmatmul.mubr.bf16.gmra.mxu0 %v7732_v56 }
 0x30b   : > { %v7328_v48 = vpop.f32.mrf.mxu1  ;;  %3897 = vst [vmem:[#allocation2 + $0xe0] sm:$0xff] %v3801_v16  ;;  %v3802_v60 = vadd.f32 %v3328_v29, %v2294_v22  ;;  %v3332_v49 = vadd.f32 %v3331_v55, %v7156_v58  ;;  %3751 = vmatprep.mubr.bf16.mxu0 %v7733_v28  ;;  %v2300_v22 = vld [vmem:[#allocation2] sm:$0xff] }
 0x30c   : > { %v3333_v35 = vpop.f32.mrf.mxu0 }
 0x30d   : > { %v4714_v0 = vpop.f32.mrf.mxu1  ;;  %3898 = vst [vmem:[#allocation2 + $0x2f8] sm:$0xff] %v3802_v60  ;;  %v3804_v1 = vadd.f32 %v3332_v49, %v2296_v26  ;;  %v3334_v44 = vadd.f32 %v3333_v35, %v7162_v62  ;;  %v2302_v60 = vld [vmem:[#allocation2 + $0xe8] sm:$0xff] }
 0x30e   : > { %v3335_v9 = vpop.f32.mrf.mxu0  ;;  %v7734_v62 = vld [vmem:[#allocation24_spill] sm:$0xff] }
 0x30f   : > { %v4715_v30 = vpop.f32.mrf.mxu1  ;;  %3900 = vst [vmem:[#allocation2 + $0x2a0] sm:$0xff] %v3804_v1  ;;  %v3805_v18 = vadd.f32 %v3334_v44, %v2297_v52  ;;  %v3336_v56 = vadd.f32 %v3335_v9, %v7172_v32  ;;  %v7735_v32 = vld [vmem:[#allocation25_spill] sm:$0xff] }
 0x310   : > { %v7335_v16 = vadd.f32 %v4715_v30, %v4714_v0  ;;  %v3337_v58 = vpop.f32.mrf.mxu0  ;;  %v2303_v0 = vld [vmem:[#allocation2 + $0x68] sm:$0xff]  ;;  %v7736_v30 = vld [vmem:[#allocation29_spill] sm:$0xff] }
 0x311   : > { %v4717_v29 = vpop.f32.mrf.mxu1  ;;  %3901 = vst [vmem:[#allocation2 + $0x168] sm:$0xff] %v3805_v18  ;;  %v3807_v55 = vadd.f32 %v3336_v56, %v2299_v13  ;;  %v3338_v28 = vadd.f32 %v3337_v58, %v7177_v20  ;;  %v2305_v18 = vld [vmem:[#allocation2 + $0xa8] sm:$0xff] }
 0x312   : > { %v3341_v26 = vpop.f32.mrf.mxu0  ;;  %3752 = vmatmul.mubr.bf16.gmra.mxu0 %v7734_v62 }
 0x313   : > { %v4718_v49 = vpop.f32.mrf.mxu1  ;;  %3903 = vst [vmem:[#allocation2 + $0x40] sm:$0xff] %v3807_v55  ;;  %v3808_v35 = vadd.f32 %v3338_v28, %v2300_v22  ;;  %v3342_v52 = vadd.f32 %v3341_v26, %v7180_v27  ;;  %3759 = vmatprep.mubr.bf16.mxu0 %v7735_v32  ;;  %v2306_v27 = vld [vmem:[#allocation2 + $0x20] sm:$0xff] }
 0x314   : > { %v7340_v1 = vadd.f32 %v4718_v49, %v4717_v29  ;;  %v3343_v44 = vpop.f32.mrf.mxu0  ;;  %v7737_v32 = vld [vmem:[#allocation26_spill] sm:$0xff] }
 0x315   : > { %v4720_v9 = vpop.f32.mrf.mxu1  ;;  %3904 = vst [vmem:[#allocation2] sm:$0xff] %v3808_v35  ;;  %v3810_v13 = vadd.f32 %v3342_v52, %v2302_v60  ;;  %v3344_v20 = vadd.f32 %v3343_v44, %v7736_v30  ;;  %v2308_v35 = vld [vmem:[#allocation2 + $0x220] sm:$0xff] }
 0x316   : > { %v3345_v56 = vpop.f32.mrf.mxu0 }
 0x317   : > { %v4721_v58 = vpop.f32.mrf.mxu1  ;;  %3906 = vst [vmem:[#allocation2 + $0xe8] sm:$0xff] %v3810_v13  ;;  %v3811_v62 = vadd.f32 %v3344_v20, %v2303_v0  ;;  %v3346_v22 = vadd.f32 %v3345_v56, %v7192_v15  ;;  %v7738_v15 = vld [vmem:[#allocation27_spill] sm:$0xff]  ;;  %v2311_v56 = vld [vmem:[#allocation2 + $0x130] sm:$0xff] }
 0x318   : > { %v7345_v55 = vadd.f32 %v4721_v58, %v4720_v9  ;;  %v3347_v29 = vpop.f32.mrf.mxu0  ;;  %v2309_v9 = vld [vmem:[#allocation2 + $0x258] sm:$0xff] }
 0x319   : > { %v4723_v28 = vpop.f32.mrf.mxu1  ;;  %3907 = vst [vmem:[#allocation2 + $0x68] sm:$0xff] %v3811_v62  ;;  %v3813_v26 = vadd.f32 %v3346_v22, %v2305_v18  ;;  %v3348_v49 = vadd.f32 %v3347_v29, %v7196_v53 }
 0x31a   : > { %v3351_v60 = vpop.f32.mrf.mxu0  ;;  %3760 = vmatmul.mubr.bf16.gmra.mxu0 %v7737_v32 }
 0x31b   : > { %v4724_v52 = vpop.f32.mrf.mxu1  ;;  %3909 = vst [vmem:[#allocation2 + $0xa8] sm:$0xff] %v3813_v26  ;;  %v3814_v44 = vadd.f32 %v3348_v49, %v2306_v27  ;;  %v3352_v0 = vadd.f32 %v3351_v60, %v7198_v3  ;;  %3767 = vmatprep.mubr.bf16.mxu0 %v7738_v15  ;;  %v2312_v3 = vld [vmem:[#allocation2 + $0x158] sm:$0xff] }
 0x31c   : > { %v7350_v13 = vadd.f32 %v4724_v52, %v4723_v28  ;;  %v3353_v30 = vpop.f32.mrf.mxu0  ;;  %v2314_v52 = vld [vmem:[#allocation2 + $0x2e0] sm:$0xff] }
 0x31d   : > { %v4726_v20 = vpop.f32.mrf.mxu1  ;;  %3910 = vst [vmem:[#allocation2 + $0x20] sm:$0xff] %v3814_v44  ;;  %v3816_v18 = vadd.f32 %v3352_v0, %v2308_v35  ;;  %v3354_v53 = vadd.f32 %v3353_v30, %v7202_v31  ;;  %v7739_v31 = vld [vmem:[#allocation28_spill] sm:$0xff] }
 0x31e   : > { %v3355_v58 = vpop.f32.mrf.mxu0 }
 0x31f   : > { %v4727_v62 = vpop.f32.mrf.mxu1  ;;  %3912 = vst [vmem:[#allocation2 + $0x220] sm:$0xff] %v3816_v18  ;;  %v3817_v22 = vadd.f32 %v3354_v53, %v2309_v9  ;;  %v3356_v27 = vadd.f32 %v3355_v58, %v7204_v47  ;;  %v2315_v47 = vld [vmem:[#allocation2 + $0x1a8] sm:$0xff]  ;;  %v2317_v53 = vld [vmem:[#allocation2 + $0x80] sm:$0xff] }
 0x320   : > { %v7355_v29 = vadd.f32 %v4727_v62, %v4726_v20  ;;  %v3357_v28 = vpop.f32.mrf.mxu0 }
 0x321   : > { %v4729_v26 = vpop.f32.mrf.mxu1  ;;  %3913 = vst [vmem:[#allocation2 + $0x258] sm:$0xff] %v3817_v22  ;;  %v3819_v49 = vadd.f32 %v3356_v27, %v2311_v56  ;;  %v3358_v60 = vadd.f32 %v3357_v28, %v7206_v6  ;;  %v2318_v27 = vld [vmem:[#allocation2 + $0x188] sm:$0xff] }
 0x322   : > { %v3361_v35 = vpop.f32.mrf.mxu0  ;;  %3768 = vmatmul.mubr.bf16.gmra.mxu0 %v7739_v31  ;;  %v2321_v31 = vld [vmem:[#allocation2 + $0x190] sm:$0xff] }
 0x323   : > { %v4730_v32 = vpop.f32.mrf.mxu1  ;;  %3915 = vst [vmem:[#allocation2 + $0x130] sm:$0xff] %v3819_v49  ;;  %v3820_v44 = vadd.f32 %v3358_v60, %v2312_v3  ;;  %v3362_v0 = vadd.f32 %v3361_v35, %v7209_v54  ;;  %v2320_v49 = vld [vmem:[#allocation2 + $0x38] sm:$0xff] }
 0x324   : > { %v7360_v15 = vadd.f32 %v4730_v32, %v4729_v26  ;;  %v3363_v9 = vpop.f32.mrf.mxu0 }
 0x325   : > { %v4732_v30 = vpop.f32.mrf.mxu1  ;;  %3916 = vst [vmem:[#allocation2 + $0x158] sm:$0xff] %v3820_v44  ;;  %v3822_v20 = vadd.f32 %v3362_v0, %v2314_v52  ;;  %v3364_v18 = vadd.f32 %v3363_v9, %v7213_v63  ;;  %v2323_v9 = vld [vmem:[#allocation2 + $0x250] sm:$0xff] }
 0x326   : > { %v3365_v6 = vpop.f32.mrf.mxu0 }
 0x327   : > { %v4733_v56 = vpop.f32.mrf.mxu1  ;;  %3918 = vst [vmem:[#allocation2 + $0x2e0] sm:$0xff] %v3822_v20  ;;  %v3823_v58 = vadd.f32 %v3364_v18, %v2315_v47  ;;  %v3366_v62 = vadd.f32 %v3365_v6, %v7215_v37  ;;  %v2324_v6 = vld [vmem:[#allocation2 + $0x1c8] sm:$0xff] }
 0x328   : > { %v7364_v22 = vadd.f32 %v4733_v56, %v4732_v30  ;;  %v3367_v54 = vpop.f32.mrf.mxu0 }
 0x329   : > { %v4735_v3 = vpop.f32.mrf.mxu1  ;;  %3919 = vst [vmem:[#allocation2 + $0x1a8] sm:$0xff] %v3823_v58  ;;  %v3825_v28 = vadd.f32 %v3366_v62, %v2317_v53  ;;  %v3368_v26 = vadd.f32 %v3367_v54, %v7217_v2 }
 0x32a   : > { %v3371_v60 = vpop.f32.mrf.mxu0 }
 0x32b   : > { %v4736_v52 = vpop.f32.mrf.mxu1  ;;  %3921 = vst [vmem:[#allocation2 + $0x80] sm:$0xff] %v3825_v28  ;;  %v3826_v63 = vadd.f32 %v3368_v26, %v2318_v27  ;;  %v3372_v35 = vadd.f32 %v3371_v60, %v7221_v59  ;;  %v2326_v27 = vld [vmem:[#allocation2 + $0x100] sm:$0xff] }
 0x32c   : > { %v7368_v32 = vadd.f32 %v4736_v52, %v4735_v3  ;;  %v3373_v37 = vpop.f32.mrf.mxu0 }
 0x32d   : > { %v4738_v44 = vpop.f32.mrf.mxu1  ;;  %3922 = vst [vmem:[#allocation2 + $0x188] sm:$0xff] %v3826_v63  ;;  %v3828_v0 = vadd.f32 %v3372_v35, %v2320_v49  ;;  %v3374_v47 = vadd.f32 %v3373_v37, %v7225_v24  ;;  %v2327_v49 = vld [vmem:[#allocation2 + $0xb8] sm:$0xff]  ;;  %v2329_v35 = vld [vmem:[#allocation2 + $0x60] sm:$0xff] }
 0x32e   : > { %v3375_v30 = vpop.f32.mrf.mxu0 }
 0x32f   : > { %v4739_v20 = vpop.f32.mrf.mxu1  ;;  %3924 = vst [vmem:[#allocation2 + $0x38] sm:$0xff] %v3828_v0  ;;  %v3829_v2 = vadd.f32 %v3374_v47, %v2321_v31  ;;  %v3376_v18 = vadd.f32 %v3375_v30, %v7227_v14  ;;  %v2330_v47 = vld [vmem:[#allocation2 + $0x210] sm:$0xff] }
 0x330   : > { %v7372_v53 = vadd.f32 %v4739_v20, %v4738_v44  ;;  %v3377_v59 = vpop.f32.mrf.mxu0 }
 0x331   : > { %v4741_v56 = vpop.f32.mrf.mxu1  ;;  %3925 = vst [vmem:[#allocation2 + $0x190] sm:$0xff] %v3829_v2  ;;  %v3831_v58 = vadd.f32 %v3376_v18, %v2323_v9  ;;  %v3378_v62 = vadd.f32 %v3377_v59, %v7229_v36  ;;  %v2332_v2 = vld [vmem:[#allocation2 + $0x1e8] sm:$0xff] }
 0x332   : > { %v3381_v54 = vpop.f32.mrf.mxu0 }
 0x333   : > { %v4742_v3 = vpop.f32.mrf.mxu1  ;;  %3927 = vst [vmem:[#allocation2 + $0x250] sm:$0xff] %v3831_v58  ;;  %v3832_v24 = vadd.f32 %v3378_v62, %v2324_v6  ;;  %v3382_v28 = vadd.f32 %v3381_v54, %v7233_v23  ;;  %v2333_v58 = vld [vmem:[#allocation2 + $0x2d0] sm:$0xff] }
 0x334   : > { %v7376_v26 = vadd.f32 %v4742_v3, %v4741_v56  ;;  %v3383_v14 = vpop.f32.mrf.mxu0  ;;  %v2335_v3 = vld [vmem:[#allocation2 + $0x28] sm:$0xff] }
 0x335   : > { %v4744_v60 = vpop.f32.mrf.mxu1  ;;  %3928 = vst [vmem:[#allocation2 + $0x1c8] sm:$0xff] %v3832_v24  ;;  %v3834_v52 = vadd.f32 %v3382_v28, %v2326_v27  ;;  %v3384_v63 = vadd.f32 %v3383_v14, %v7236_v12 }
 0x336   : > { %v3385_v31 = vpop.f32.mrf.mxu0 }
 0x337   : > { %v4745_v37 = vpop.f32.mrf.mxu1  ;;  %3930 = vst [vmem:[#allocation2 + $0x100] sm:$0xff] %v3834_v52  ;;  %v3835_v36 = vadd.f32 %v3384_v63, %v2327_v49  ;;  %v3386_v44 = vadd.f32 %v3385_v31, %v7238_v17  ;;  %v2338_v31 = vld [vmem:[#allocation2 + $0x58] sm:$0xff] }
 0x338   : > { %v7380_v0 = vadd.f32 %v4745_v37, %v4744_v60  ;;  %v3387_v23 = vpop.f32.mrf.mxu0  ;;  %v2336_v60 = vld [vmem:[#allocation2 + $0x138] sm:$0xff] }
 0x339   : > { %v4747_v9 = vpop.f32.mrf.mxu1  ;;  %3931 = vst [vmem:[#allocation2 + $0xb8] sm:$0xff] %v3835_v36  ;;  %v3837_v30 = vadd.f32 %v3386_v44, %v2329_v35  ;;  %v3388_v20 = vadd.f32 %v3387_v23, %v7240_v5  ;;  %v2339_v23 = vld [vmem:[#allocation2 + $0x1c0] sm:$0xff] }
 0x33a   : > { %v3391_v18 = vpop.f32.mrf.mxu0 }
 0x33b   : > { %v4748_v6 = vpop.f32.mrf.mxu1  ;;  %3933 = vst [vmem:[#allocation2 + $0x60] sm:$0xff] %v3837_v30  ;;  %v3838_v12 = vadd.f32 %v3388_v20, %v2330_v47  ;;  %v3392_v59 = vadd.f32 %v3391_v18, %v7244_v25 }
 0x33c   : > { %v7384_v56 = vadd.f32 %v4748_v6, %v4747_v9  ;;  %v3393_v17 = vpop.f32.mrf.mxu0 }
 0x33d   : > { %v4750_v62 = vpop.f32.mrf.mxu1  ;;  %3934 = vst [vmem:[#allocation2 + $0x210] sm:$0xff] %v3838_v12  ;;  %v3840_v27 = vadd.f32 %v3392_v59, %v2332_v2  ;;  %v3394_v54 = vadd.f32 %v3393_v17, %v7246_v7  ;;  %v2341_v2 = vld [vmem:[#allocation2 + $0x70] sm:$0xff] }
 0x33e   : > { %v3395_v24 = vpop.f32.mrf.mxu0 }
 0x33f   : > { %v4751_v28 = vpop.f32.mrf.mxu1  ;;  %3936 = vst [vmem:[#allocation2 + $0x1e8] sm:$0xff] %v3840_v27  ;;  %v3841_v5 = vadd.f32 %v3394_v54, %v2333_v58  ;;  %v3396_v49 = vadd.f32 %v3395_v24, %v7248_v21  ;;  %v2342_v58 = vld [vmem:[#allocation2 + $0x18] sm:$0xff]  ;;  %v2344_v54 = vld [vmem:[#allocation2 + $0x240] sm:$0xff] }
 0x340   : > { %v7388_v14 = vadd.f32 %v4751_v28, %v4750_v62  ;;  %v3397_v25 = vpop.f32.mrf.mxu0 }
 0x341   : > { %v4753_v52 = vpop.f32.mrf.mxu1  ;;  %3937 = vst [vmem:[#allocation2 + $0x2d0] sm:$0xff] %v3841_v5  ;;  %v3843_v63 = vadd.f32 %v3396_v49, %v2335_v3  ;;  %v3398_v35 = vadd.f32 %v3397_v25, %v7250_v33  ;;  %v2345_v49 = vld [vmem:[#allocation2 + $0x180] sm:$0xff] }
 0x342   : > { %v3401_v37 = vpop.f32.mrf.mxu0 }
 0x343   : > { %v4754_v36 = vpop.f32.mrf.mxu1  ;;  %3939 = vst [vmem:[#allocation2 + $0x28] sm:$0xff] %v3843_v63  ;;  %v3844_v7 = vadd.f32 %v3398_v35, %v2336_v60  ;;  %v3402_v44 = vadd.f32 %v3401_v37, %v7254_v51  ;;  %v2347_v63 = vld [vmem:[#allocation2 + $0x1a0] sm:$0xff] }
 0x344   : > { %v7392_v47 = vadd.f32 %v4754_v36, %v4753_v52  ;;  %v3403_v21 = vpop.f32.mrf.mxu0 }
 0x345   : > { %v4756_v9 = vpop.f32.mrf.mxu1  ;;  %3940 = vst [vmem:[#allocation2 + $0x138] sm:$0xff] %v3844_v7  ;;  %v3846_v30 = vadd.f32 %v3402_v44, %v2338_v31  ;;  %v3404_v20 = vadd.f32 %v3403_v21, %v7256_v46  ;;  %v2348_v7 = vld [vmem:[#allocation2 + $0xa0] sm:$0xff] }
 0x346   : > { %v3405_v18 = vpop.f32.mrf.mxu0 }
 0x347   : > { %v4757_v6 = vpop.f32.mrf.mxu1  ;;  %3942 = vst [vmem:[#allocation2 + $0x58] sm:$0xff] %v3846_v30  ;;  %v3847_v33 = vadd.f32 %v3404_v20, %v2339_v23  ;;  %v3406_v12 = vadd.f32 %v3405_v18, %v7258_v42 }
 0x348   : > { %v7396_v59 = vadd.f32 %v4757_v6, %v4756_v9  ;;  %v3407_v51 = vpop.f32.mrf.mxu0  ;;  %v2350_v9 = vld [vmem:[#allocation2 + $0x8] sm:$0xff]  ;;  %v2351_v6 = vld [vmem:[#allocation2 + $0x2c0] sm:$0xff] }
 0x349   : > { %v4759_v17 = vpop.f32.mrf.mxu1  ;;  %3943 = vst [vmem:[#allocation2 + $0x1c0] sm:$0xff] %v3847_v33  ;;  %v3849_v62 = vadd.f32 %v3406_v12, %v2341_v2  ;;  %v3408_v27 = vadd.f32 %v3407_v51, %v7260_v57  ;;  %v2353_v51 = vld [vmem:[#allocation2 + $0x290] sm:$0xff] }
 0x34a   : > { %v3411_v3 = vpop.f32.mrf.mxu0 }
 0x34b   : > { %v4760_v24 = vpop.f32.mrf.mxu1  ;;  %3945 = vst [vmem:[#allocation2 + $0x70] sm:$0xff] %v3849_v62  ;;  %v3850_v46 = vadd.f32 %v3408_v27, %v2342_v58  ;;  %v3412_v28 = vadd.f32 %v3411_v3, %v7264_v8  ;;  %v2354_v3 = vld [vmem:[#allocation2 + $0x2a8] sm:$0xff] }
 0x34c   : > { %v7400_v5 = vadd.f32 %v4760_v24, %v4759_v17  ;;  %v3413_v42 = vpop.f32.mrf.mxu0 }
 0x34d   : > { %v4762_v60 = vpop.f32.mrf.mxu1  ;;  %3946 = vst [vmem:[#allocation2 + $0x18] sm:$0xff] %v3850_v46  ;;  %v3852_v25 = vadd.f32 %v3412_v28, %v2344_v54  ;;  %v3414_v52 = vadd.f32 %v3413_v42, %v7266_v50 }
 0x34e   : > { %v3415_v35 = vpop.f32.mrf.mxu0 }
 0x34f   : > { %v4763_v31 = vpop.f32.mrf.mxu1  ;;  %3948 = vst [vmem:[#allocation2 + $0x240] sm:$0xff] %v3852_v25  ;;  %v3853_v57 = vadd.f32 %v3414_v52, %v2345_v49  ;;  %v3416_v37 = vadd.f32 %v3415_v35, %v7268_v45  ;;  %v2356_v49 = vld [vmem:[#allocation2 + $0x1e0] sm:$0xff]  ;;  %v2357_v35 = vld [vmem:[#allocation2 + $0x150] sm:$0xff] }
 0x350   : > { %v7404_v36 = vadd.f32 %v4763_v31, %v4762_v60  ;;  %v3417_v8 = vpop.f32.mrf.mxu0  ;;  %v7740_v25 = vld [vmem:[#allocation30_spill] sm:$0xff] }
 0x351   : > { %v4765_v44 = vpop.f32.mrf.mxu1  ;;  %3949 = vst [vmem:[#allocation2 + $0x180] sm:$0xff] %v3853_v57  ;;  %v3855_v23 = vadd.f32 %v3416_v37, %v2347_v63  ;;  %v3418_v21 = vadd.f32 %v3417_v8, %v7270_v41  ;;  %v7741_v37 = vld [vmem:[#allocation31_spill] sm:$0xff]  ;;  %v2359_v8 = vld [vmem:[#allocation2 + $0x1d0] sm:$0xff] }
 0x352   : > { %v3421_v30 = vpop.f32.mrf.mxu0 }
 0x353   : > { %v4766_v20 = vpop.f32.mrf.mxu1  ;;  %3951 = vst [vmem:[#allocation2 + $0x1a0] sm:$0xff] %v3855_v23  ;;  %v3856_v50 = vadd.f32 %v3418_v21, %v2348_v7  ;;  %v3422_v2 = vadd.f32 %v3421_v30, %v7274_v43  ;;  %v7742_v21 = vld [vmem:[#allocation32_spill] sm:$0xff] }
 0x354   : > { %v7408_v18 = vadd.f32 %v4766_v20, %v4765_v44  ;;  %v3423_v45 = vpop.f32.mrf.mxu0  ;;  %v2360_v20 = vld [vmem:[#allocation2 + $0x140] sm:$0xff] }
 0x355   : > { %v4768_v33 = vpop.f32.mrf.mxu1  ;;  %3952 = vst [vmem:[#allocation2 + $0xa0] sm:$0xff] %v3856_v50  ;;  %v3858_v12 = vadd.f32 %v3422_v2, %v2350_v9  ;;  %v3424_v58 = vadd.f32 %v3423_v45, %v7276_v61  ;;  %v7743_v45 = vld [vmem:[#allocation33_spill] sm:$0xff] }
 0x356   : > { %v3425_v17 = vpop.f32.mrf.mxu0 }
 0x357   : > { %v4769_v62 = vpop.f32.mrf.mxu1  ;;  %3954 = vst [vmem:[#allocation2 + $0x8] sm:$0xff] %v3858_v12  ;;  %v3859_v41 = vadd.f32 %v3424_v58, %v2351_v6  ;;  %v3426_v27 = vadd.f32 %v3425_v17, %v7278_v34  ;;  %v2362_v12 = vld [vmem:[#allocation2 + $0x160] sm:$0xff] }
 0x358   : > { %v7412_v54 = vadd.f32 %v4769_v62, %v4768_v33  ;;  %v3427_v43 = vpop.f32.mrf.mxu0  ;;  %v7744_v62 = vld [vmem:[#allocation34_spill] sm:$0xff] }
 0x359   : > { %v4771_v24 = vpop.f32.mrf.mxu1  ;;  %3955 = vst [vmem:[#allocation2 + $0x2c0] sm:$0xff] %v3859_v41  ;;  %v3861_v46 = vadd.f32 %v3426_v27, %v2353_v51  ;;  %v3428_v28 = vadd.f32 %v3427_v43, %v7280_v10 }
 0x35a   : > { %v3431_v42 = vpop.f32.mrf.mxu0 }
 0x35b   : > { %v4772_v60 = vpop.f32.mrf.mxu1  ;;  %3957 = vst [vmem:[#allocation2 + $0x290] sm:$0xff] %v3861_v46  ;;  %v3862_v61 = vadd.f32 %v3428_v28, %v2354_v3  ;;  %v3432_v52 = vadd.f32 %v3431_v42, %v7740_v25  ;;  %v2363_v3 = vld [vmem:[#allocation2 + $0x2d8] sm:$0xff]  ;;  %v7745_v28 = vld [vmem:[#allocation35_spill] sm:$0xff]  ;;  %v2365_v42 = vld [vmem:[#allocation2 + $0x170] sm:$0xff] }
 0x35c   : > { %v7416_v63 = vadd.f32 %v4772_v60, %v4771_v24  ;;  %v3433_v34 = vpop.f32.mrf.mxu0 }
 0x35d   : > { %v4774_v31 = vpop.f32.mrf.mxu1  ;;  %3958 = vst [vmem:[#allocation2 + $0x2a8] sm:$0xff] %v3862_v61  ;;  %v3864_v57 = vadd.f32 %v3432_v52, %v2356_v49  ;;  %v3434_v7 = vadd.f32 %v3433_v34, %v7741_v37  ;;  %v7746_v52 = vld [vmem:[#allocation36_spill] sm:$0xff] }
 0x35e   : > { %v3435_v44 = vpop.f32.mrf.mxu0 }
 0x35f   : > { %v4775_v23 = vpop.f32.mrf.mxu1  ;;  %3960 = vst [vmem:[#allocation2 + $0x1e0] sm:$0xff] %v3864_v57  ;;  %v3865_v10 = vadd.f32 %v3434_v7, %v2357_v35  ;;  %v3436_v9 = vadd.f32 %v3435_v44, %v7742_v21 }
 0x360   : > { %v7420_v30 = vadd.f32 %v4775_v23, %v4774_v31  ;;  %v3437_v50 = vpop.f32.mrf.mxu0  ;;  %v2366_v31 = vld [vmem:[#allocation2 + $0x90] sm:$0xff]  ;;  %v2368_v23 = vld [vmem:[#allocation2 + $0x200] sm:$0xff] }
 0x361   : > { %v4777_v2 = vpop.f32.mrf.mxu1  ;;  %3961 = vst [vmem:[#allocation2 + $0x150] sm:$0xff] %v3865_v10  ;;  %v3867_v6 = vadd.f32 %v3436_v9, %v2359_v8  ;;  %v3438_v33 = vadd.f32 %v3437_v50, %v7743_v45  ;;  %v7747_v8 = vld [vmem:[#allocation37_spill] sm:$0xff] }
 0x362   : > { %v3441_v58 = vpop.f32.mrf.mxu0 }
 0x363   : > { %v4778_v51 = vpop.f32.mrf.mxu1  ;;  %3963 = vst [vmem:[#allocation2 + $0x1d0] sm:$0xff] %v3867_v6  ;;  %v3868_v17 = vadd.f32 %v3438_v33, %v2360_v20  ;;  %v3442_v41 = vadd.f32 %v3441_v58, %v7744_v62  ;;  %v7748_v20 = vld [vmem:[#allocation38_spill] sm:$0xff] }
 0x364   : > { %v7424_v27 = vadd.f32 %v4778_v51, %v4777_v2  ;;  %v3443_v43 = vpop.f32.mrf.mxu0  ;;  %v2369_v6 = vld [vmem:[#allocation2 + $0xd8] sm:$0xff]  ;;  %v2371_v51 = vld [vmem:[#allocation2 + $0x2e8] sm:$0xff] }
 0x365   : > { %v4780_v24 = vpop.f32.mrf.mxu1  ;;  %3964 = vst [vmem:[#allocation2 + $0x140] sm:$0xff] %v3868_v17  ;;  %v3870_v46 = vadd.f32 %v3442_v41, %v2362_v12  ;;  %v3444_v49 = vadd.f32 %v3443_v43, %v7745_v28 }
 0x366   : > { %v3445_v60 = vpop.f32.mrf.mxu0 }
 0x367   : > { %v4781_v61 = vpop.f32.mrf.mxu1  ;;  %3966 = vst [vmem:[#allocation2 + $0x160] sm:$0xff] %v3870_v46  ;;  %v3871_v25 = vadd.f32 %v3444_v49, %v2363_v3  ;;  %v3446_v35 = vadd.f32 %v3445_v60, %v7746_v52  ;;  %v2374_v60 = vld [vmem:[#allocation2 + $0x88] sm:$0xff] }
 0x368   : > { %v7428_v34 = vadd.f32 %v4781_v61, %v4780_v24  ;;  %v3447_v57 = vpop.f32.mrf.mxu0  ;;  %v2372_v24 = vld [vmem:[#allocation2 + $0x260] sm:$0xff] }
 0x369   : > { %v4783_v37 = vpop.f32.mrf.mxu1  ;;  %3967 = vst [vmem:[#allocation2 + $0x2d8] sm:$0xff] %v3871_v25  ;;  %v3873_v7 = vadd.f32 %v3446_v35, %v2365_v42  ;;  %v3448_v44 = vadd.f32 %v3447_v57, %v7747_v8  ;;  %v2377_v8 = vld [vmem:[#allocation2 + $0x198] sm:$0xff] }
 0x36a   : > { %v3451_v10 = vpop.f32.mrf.mxu0 }
 0x36b   : > { %v4784_v21 = vpop.f32.mrf.mxu1  ;;  %3969 = vst [vmem:[#allocation2 + $0x170] sm:$0xff] %v3873_v7  ;;  %v3874_v9 = vadd.f32 %v3448_v44, %v2366_v31  ;;  %v3452_v50 = vadd.f32 %v3451_v10, %v7748_v20  ;;  %v2375_v31 = vld [vmem:[#allocation2 + $0x110] sm:$0xff] }
 0x36c   : > { %v7432_v2 = vadd.f32 %v4784_v21, %v4783_v37  ;;  %v3453_v45 = vpop.f32.mrf.mxu0 }
 0x36d   : > { %v4786_v33 = vpop.f32.mrf.mxu1  ;;  %3970 = vst [vmem:[#allocation2 + $0x90] sm:$0xff] %v3874_v9  ;;  %v3876_v12 = vadd.f32 %v3452_v50, %v2368_v23  ;;  %v3454_v58 = vadd.f32 %v3453_v45, %v7308_v19  ;;  %v2378_v9 = vld [vmem:[#allocation2 + $0x148] sm:$0xff] }
 0x36e   : > { %v3455_v17 = vpop.f32.mrf.mxu0 }
 0x36f   : > { %v4787_v62 = vpop.f32.mrf.mxu1  ;;  %3972 = vst [vmem:[#allocation2 + $0x200] sm:$0xff] %v3876_v12  ;;  %v3877_v41 = vadd.f32 %v3454_v58, %v2369_v6  ;;  %v3456_v3 = vadd.f32 %v3455_v17, %v7311_v4 }
 0x370   : > { %v7436_v43 = vadd.f32 %v4787_v62, %v4786_v33  ;;  %v3457_v46 = vpop.f32.mrf.mxu0 }
 0x371   : > { %v4789_v28 = vpop.f32.mrf.mxu1  ;;  %3973 = vst [vmem:[#allocation2 + $0xd8] sm:$0xff] %v3877_v41  ;;  %v3879_v49 = vadd.f32 %v3456_v3, %v2371_v51  ;;  %v3458_v42 = vadd.f32 %v3457_v46, %v7314_v40 }
 0x372   : > { %v3461_v61 = vpop.f32.mrf.mxu0 }
 0x373   : > { %v4790_v25 = vpop.f32.mrf.mxu1  ;;  %3975 = vst [vmem:[#allocation2 + $0x2e8] sm:$0xff] %v3879_v49  ;;  %v3880_v19 = vadd.f32 %v3458_v42, %v2372_v24  ;;  %v3462_v52 = vadd.f32 %v3461_v61, %v7319_v38 }
 0x374   : > { %v7440_v35 = vadd.f32 %v4790_v25, %v4789_v28  ;;  %v3463_v4 = vpop.f32.mrf.mxu0 }
 0x375   : > { %v4792_v57 = vpop.f32.mrf.mxu1  ;;  %3976 = vst [vmem:[#allocation2 + $0x260] sm:$0xff] %v3880_v19  ;;  %v3882_v37 = vadd.f32 %v3462_v52, %v2374_v60  ;;  %v3464_v7 = vadd.f32 %v3463_v4, %v7322_v39  ;;  %v2292_v4 = vld [vmem:[#allocation2 + $0x128] sm:$0xff] }
 0x376   : > { %v3465_v44 = vpop.f32.mrf.mxu0 }
 0x377   : > { %v4793_v23 = vpop.f32.mrf.mxu1  ;;  %3978 = vst [vmem:[#allocation2 + $0x88] sm:$0xff] %v3882_v37  ;;  %v3883_v40 = vadd.f32 %v3464_v7, %v2375_v31  ;;  %v3466_v10 = vadd.f32 %v3465_v44, %v7325_v11  ;;  %v2286_v11 = vld [vmem:[#allocation2 + $0x10] sm:$0xff] }
 0x378   : > { %v7444_v21 = vadd.f32 %v4793_v23, %v4792_v57  ;;  %v3467_v38 = vpop.f32.mrf.mxu0 }
 0x379   : > { %v4795_v20 = vpop.f32.mrf.mxu1  ;;  %3979 = vst [vmem:[#allocation2 + $0x110] sm:$0xff] %v3883_v40  ;;  %v3885_v50 = vadd.f32 %v3466_v10, %v2377_v8  ;;  %v3468_v6 = vadd.f32 %v3467_v38, %v7328_v48  ;;  %v2289_v48 = vld [vmem:[#allocation2 + $0xf0] sm:$0xff]  ;;  %v2295_v40 = vld [vmem:[#allocation2 + $0x2b8] sm:$0xff] }
 0x37a   : > { %v4826_v33 = vpop.f32.mrf.mxu0 }
 0x37b   : > { %v4796_v45 = vpop.f32.mrf.mxu1  ;;  %3981 = vst [vmem:[#allocation2 + $0x198] sm:$0xff] %v3885_v50  ;;  %v3886_v39 = vadd.f32 %v3468_v6, %v2378_v9 }
 0x37c   : > { %v7447_v12 = vadd.f32 %v4796_v45, %v4795_v20  ;;  %v4827_v51 = vpop.f32.mrf.mxu0  ;;  %v2298_v45 = vld [vmem:[#allocation2 + $0x178] sm:$0xff] }
 0x37d   : > { %v4798_v58 = vpop.f32.mrf.mxu1  ;;  %3982 = vst [vmem:[#allocation2 + $0x148] sm:$0xff] %v3886_v39  ;;  %v4828_v17 = vadd.f32 %v4827_v51, %v4826_v33 }
 0x37e   : > { %v4829_v41 = vpop.f32.mrf.mxu0 }
 0x37f   : > { %v4799_v62 = vpop.f32.mrf.mxu1  ;;  %v3666_v3 = vadd.f32 %v4828_v17, %v7335_v16 }
 0x380   : > { %v4830_v46 = vpop.f32.mrf.mxu0  ;;  %v4800_v51 = vadd.f32 %v4799_v62, %v4798_v58  ;;  %v2373_v58 = vld [vmem:[#allocation2 + $0x268] sm:$0xff] }
 0x381   : > { %v4801_v24 = vpop.f32.mrf.mxu1  ;;  %v3794_v28 = vadd.f32 %v3666_v3, %v2286_v11  ;;  %v4831_v49 = vadd.f32 %v4830_v46, %v4829_v41  ;;  %v2370_v11 = vld [vmem:[#allocation2 + $0x1d8] sm:$0xff] }
 0x382   : > { %v4832_v60 = vpop.f32.mrf.mxu0 }
 0x383   : > { %v4802_v42 = vpop.f32.mrf.mxu1  ;;  %3890 = vst [vmem:[#allocation2 + $0x10] sm:$0xff] %v3794_v28  ;;  %v3669_v61 = vadd.f32 %v4831_v49, %v7340_v1 }
 0x384   : > { %v4833_v19 = vpop.f32.mrf.mxu0 }
 0x385   : > { %v4804_v25 = vpop.f32.mrf.mxu1  ;;  %v3797_v52 = vadd.f32 %v3669_v61, %v2289_v48  ;;  %v4834_v31 = vadd.f32 %v4833_v19, %v4832_v60  ;;  %v2301_v48 = vld [vmem:[#allocation2 + $0x248] sm:$0xff]  ;;  %v4803_v61 = vadd.f32 %v4802_v42, %v4801_v24 }
 0x386   : > { %v4835_v37 = vpop.f32.mrf.mxu0 }
 0x387   : > { %v4805_v57 = vpop.f32.mrf.mxu1  ;;  %3893 = vst [vmem:[#allocation2 + $0xf0] sm:$0xff] %v3797_v52  ;;  %v3674_v16 = vadd.f32 %v4834_v31, %v7345_v55 }
 0x388   : > { %v4836_v8 = vpop.f32.mrf.mxu0 }
 0x389   : > { %v4807_v7 = vpop.f32.mrf.mxu1  ;;  %v3800_v44 = vadd.f32 %v3674_v16, %v2292_v4  ;;  %v4837_v23 = vadd.f32 %v4836_v8, %v4835_v37  ;;  %v2304_v8 = vld [vmem:[#allocation2 + $0x228] sm:$0xff] }
 0x38a   : > { %v4838_v9 = vpop.f32.mrf.mxu0 }
 0x38b   : > { %v4808_v10 = vpop.f32.mrf.mxu1  ;;  %3896 = vst [vmem:[#allocation2 + $0x128] sm:$0xff] %v3800_v44  ;;  %v3677_v1 = vadd.f32 %v4837_v23, %v7350_v13 }
 0x38c   : > { %v4839_v38 = vpop.f32.mrf.mxu0 }
 0x38d   : > { %v4910_v20 = vpop.f32.mrf.mxu1  ;;  %v3803_v50 = vadd.f32 %v3677_v1, %v2295_v40  ;;  %v4840_v6 = vadd.f32 %v4839_v38, %v4838_v9  ;;  %v4806_v40 = vadd.f32 %v4805_v57, %v4804_v25  ;;  %v2376_v1 = vld [vmem:[#allocation2 + $0x108] sm:$0xff] }
 0x38e   : > { %v4841_v33 = vpop.f32.mrf.mxu0 }
 0x38f   : > { %v4911_v39 = vpop.f32.mrf.mxu1  ;;  %3899 = vst [vmem:[#allocation2 + $0x2b8] sm:$0xff] %v3803_v50  ;;  %v3682_v55 = vadd.f32 %v4840_v6, %v7355_v29 }
 0x390   : > { %v4912_v17 = vadd.f32 %v4911_v39, %v4910_v20  ;;  %v4842_v41 = vpop.f32.mrf.mxu0 }
 0x391   : > { %v4913_v3 = vpop.f32.mrf.mxu1  ;;  %v3806_v46 = vadd.f32 %v3682_v55, %v2298_v45  ;;  %v4843_v49 = vadd.f32 %v4842_v41, %v4841_v33  ;;  %v2307_v45 = vld [vmem:[#allocation2 + $0x1b0] sm:$0xff] }
 0x392   : > { %v3778_v28 = vadd.f32 %v4912_v17, %v4800_v51  ;;  %v4844_v13 = vpop.f32.mrf.mxu0  ;;  %v4809_v51 = vadd.f32 %v4808_v10, %v4807_v7  ;;  %v2379_v17 = vld [vmem:[#allocation2 + $0x118] sm:$0xff] }
 0x393   : > { %v4914_v60 = vpop.f32.mrf.mxu1  ;;  %3902 = vst [vmem:[#allocation2 + $0x178] sm:$0xff] %v3806_v46  ;;  %v3685_v52 = vadd.f32 %v4843_v49, %v7360_v15  ;;  %v2310_v46 = vld [vmem:[#allocation2 + $0x238] sm:$0xff] }
 0x394   : > { %v3878_v19 = vadd.f32 %v3778_v28, %v2370_v11  ;;  %v4915_v31 = vadd.f32 %v4914_v60, %v4913_v3  ;;  %v4845_v62 = vpop.f32.mrf.mxu0  ;;  %v2313_v60 = vld [vmem:[#allocation2 + $0x98] sm:$0xff] }
 0x395   : > { %v4916_v4 = vpop.f32.mrf.mxu1  ;;  %v3809_v29 = vadd.f32 %v3685_v52, %v2301_v48  ;;  %v4846_v16 = vadd.f32 %v4845_v62, %v4844_v13 }
 0x396   : > { %3974 = vst [vmem:[#allocation2 + $0x1d8] sm:$0xff] %v3878_v19  ;;  %v3781_v37 = vadd.f32 %v4915_v31, %v4803_v61  ;;  %v4847_v44 = vpop.f32.mrf.mxu0 }
 0x397   : > { %v4917_v23 = vpop.f32.mrf.mxu1  ;;  %3905 = vst [vmem:[#allocation2 + $0x248] sm:$0xff] %v3809_v29  ;;  %v3690_v24 = vadd.f32 %v4846_v16, %v7364_v22  ;;  %v2319_v16 = vld [vmem:[#allocation2 + $0x208] sm:$0xff] }
 0x398   : > { %v3881_v9 = vadd.f32 %v3781_v37, %v2373_v58  ;;  %v4918_v42 = vadd.f32 %v4917_v23, %v4916_v4  ;;  %v4848_v38 = vpop.f32.mrf.mxu0  ;;  %v2316_v58 = vld [vmem:[#allocation2 + $0x1b8] sm:$0xff] }
 0x399   : > { %v4919_v15 = vpop.f32.mrf.mxu1  ;;  %v3812_v20 = vadd.f32 %v3690_v24, %v2304_v8  ;;  %v4849_v6 = vadd.f32 %v4848_v38, %v4847_v44 }
 0x39a   : > { %3977 = vst [vmem:[#allocation2 + $0x268] sm:$0xff] %v3881_v9  ;;  %v3786_v50 = vadd.f32 %v4918_v42, %v4806_v40  ;;  %v4850_v33 = vpop.f32.mrf.mxu0 }
 0x39b   : > { %v4920_v39 = vpop.f32.mrf.mxu1  ;;  %3908 = vst [vmem:[#allocation2 + $0x228] sm:$0xff] %v3812_v20  ;;  %v3693_v25 = vadd.f32 %v4849_v6, %v7368_v32 }
 0x39c   : > { %v3884_v55 = vadd.f32 %v3786_v50, %v2376_v1  ;;  %v4921_v57 = vadd.f32 %v4920_v39, %v4919_v15  ;;  %v4851_v11 = vpop.f32.mrf.mxu0 }
 0x39d   : > { %v3815_v22 = vadd.f32 %v3693_v25, %v2307_v45  ;;  %v4852_v3 = vadd.f32 %v4851_v11, %v4850_v33 }
 0x39e   : > { %3980 = vst [vmem:[#allocation2 + $0x108] sm:$0xff] %v3884_v55  ;;  %v3789_v41 = vadd.f32 %v4921_v57, %v4809_v51  ;;  %v4853_v28 = vpop.f32.mrf.mxu0 }
 0x39f   : > { %3911 = vst [vmem:[#allocation2 + $0x1b0] sm:$0xff] %v3815_v22  ;;  %v3698_v48 = vadd.f32 %v4852_v3, %v7372_v53 }
 0x3a0   : > { %v3887_v49 = vadd.f32 %v3789_v41, %v2379_v17  ;;  %v4854_v13 = vpop.f32.mrf.mxu0 }
 0x3a1   : > { %v3818_v7 = vadd.f32 %v3698_v48, %v2310_v46  ;;  %v4855_v10 = vadd.f32 %v4854_v13, %v4853_v28 }
 0x3a2   : > { %3983 = vst [vmem:[#allocation2 + $0x118] sm:$0xff] %v3887_v49  ;;  %v4856_v61 = vpop.f32.mrf.mxu0 }
 0x3a3   : > { %3914 = vst [vmem:[#allocation2 + $0x238] sm:$0xff] %v3818_v7  ;;  %v3701_v32 = vadd.f32 %v4855_v10, %v7376_v26  ;;  %v2322_v26 = vld [vmem:[#allocation2 + $0x218] sm:$0xff] }
 0x3a4   : > { %v4857_v19 = vpop.f32.mrf.mxu0 }
 0x3a5   : > { %v3821_v52 = vadd.f32 %v3701_v32, %v2313_v60  ;;  %v4858_v31 = vadd.f32 %v4857_v19, %v4856_v61 }
 0x3a6   : > { %v4859_v62 = vpop.f32.mrf.mxu0 }
 0x3a7   : > { %3917 = vst [vmem:[#allocation2 + $0x98] sm:$0xff] %v3821_v52  ;;  %v3706_v4 = vadd.f32 %v4858_v31, %v7380_v0  ;;  %v2325_v0 = vld [vmem:[#allocation2 + $0x280] sm:$0xff] }
 0x3a8   : > { %v4860_v29 = vpop.f32.mrf.mxu0 }
 0x3a9   : > { %v3824_v37 = vadd.f32 %v3706_v4, %v2316_v58  ;;  %v4861_v53 = vadd.f32 %v4860_v29, %v4859_v62 }
 0x3aa   : > { %v4862_v8 = vpop.f32.mrf.mxu0 }
 0x3ab   : > { %3920 = vst [vmem:[#allocation2 + $0x1b8] sm:$0xff] %v3824_v37  ;;  %v3709_v44 = vadd.f32 %v4861_v53, %v7384_v56  ;;  %v2328_v56 = vld [vmem:[#allocation2 + $0x288] sm:$0xff] }
 0x3ac   : > { %v4863_v23 = vpop.f32.mrf.mxu0 }
 0x3ad   : > { %v3827_v40 = vadd.f32 %v3709_v44, %v2319_v16  ;;  %v4864_v9 = vadd.f32 %v4863_v23, %v4862_v8 }
 0x3ae   : > { %v4865_v24 = vpop.f32.mrf.mxu0 }
 0x3af   : > { %3923 = vst [vmem:[#allocation2 + $0x208] sm:$0xff] %v3827_v40  ;;  %v3714_v42 = vadd.f32 %v4864_v9, %v7388_v14  ;;  %v2331_v14 = vld [vmem:[#allocation2 + $0x50] sm:$0xff] }
 0x3b0   : > { %v4866_v1 = vpop.f32.mrf.mxu0 }
 0x3b1   : > { %v3830_v38 = vadd.f32 %v3714_v42, %v2322_v26  ;;  %v4867_v15 = vadd.f32 %v4866_v1, %v4865_v24 }
 0x3b2   : > { %v4868_v20 = vpop.f32.mrf.mxu0 }
 0x3b3   : > { %3926 = vst [vmem:[#allocation2 + $0x218] sm:$0xff] %v3830_v38  ;;  %v3717_v50 = vadd.f32 %v4867_v15, %v7392_v47  ;;  %v2334_v47 = vld [vmem:[#allocation2 + $0x1f0] sm:$0xff] }
 0x3b4   : > { %v4869_v6 = vpop.f32.mrf.mxu0 }
 0x3b5   : > { %v3833_v45 = vadd.f32 %v3717_v50, %v2325_v0  ;;  %v4870_v33 = vadd.f32 %v4869_v6, %v4868_v20 }
 0x3b6   : > { %v4871_v39 = vpop.f32.mrf.mxu0 }
 0x3b7   : > { %3929 = vst [vmem:[#allocation2 + $0x280] sm:$0xff] %v3833_v45  ;;  %v3722_v51 = vadd.f32 %v4870_v33, %v7396_v59  ;;  %v2337_v59 = vld [vmem:[#allocation2 + $0xc8] sm:$0xff] }
 0x3b8   : > { %v4872_v55 = vpop.f32.mrf.mxu0 }
 0x3b9   : > { %v3836_v25 = vadd.f32 %v3722_v51, %v2328_v56  ;;  %v4873_v57 = vadd.f32 %v4872_v55, %v4871_v39 }
 0x3ba   : > { %v4874_v17 = vpop.f32.mrf.mxu0 }
 0x3bb   : > { %3932 = vst [vmem:[#allocation2 + $0x288] sm:$0xff] %v3836_v25  ;;  %v3725_v11 = vadd.f32 %v4873_v57, %v7400_v5  ;;  %v2340_v5 = vld [vmem:[#allocation2 + $0x298] sm:$0xff] }
 0x3bc   : > { %v4875_v22 = vpop.f32.mrf.mxu0 }
 0x3bd   : > { %v3839_v41 = vadd.f32 %v3725_v11, %v2331_v14  ;;  %v4876_v3 = vadd.f32 %v4875_v22, %v4874_v17 }
 0x3be   : > { %v4877_v46 = vpop.f32.mrf.mxu0 }
 0x3bf   : > { %3935 = vst [vmem:[#allocation2 + $0x50] sm:$0xff] %v3839_v41  ;;  %v3730_v28 = vadd.f32 %v4876_v3, %v7404_v36  ;;  %v2343_v36 = vld [vmem:[#allocation2 + $0x120] sm:$0xff] }
 0x3c0   : > { %v4878_v49 = vpop.f32.mrf.mxu0 }
 0x3c1   : > { %v3842_v48 = vadd.f32 %v3730_v28, %v2334_v47  ;;  %v4879_v13 = vadd.f32 %v4878_v49, %v4877_v46 }
 0x3c2   : > { %v4880_v7 = vpop.f32.mrf.mxu0 }
 0x3c3   : > { %3938 = vst [vmem:[#allocation2 + $0x1f0] sm:$0xff] %v3842_v48  ;;  %v3733_v10 = vadd.f32 %v4879_v13, %v7408_v18  ;;  %v2346_v18 = vld [vmem:[#allocation2 + $0x1f8] sm:$0xff] }
 0x3c4   : > { %v4881_v60 = vpop.f32.mrf.mxu0 }
 0x3c5   : > { %v3845_v61 = vadd.f32 %v3733_v10, %v2337_v59  ;;  %v4882_v32 = vadd.f32 %v4881_v60, %v4880_v7 }
 0x3c6   : > { %v4883_v19 = vpop.f32.mrf.mxu0 }
 0x3c7   : > { %3941 = vst [vmem:[#allocation2 + $0xc8] sm:$0xff] %v3845_v61  ;;  %v3738_v52 = vadd.f32 %v4882_v32, %v7412_v54  ;;  %v2349_v54 = vld [vmem:[#allocation2 + $0x278] sm:$0xff] }
 0x3c8   : > { %v4884_v31 = vpop.f32.mrf.mxu0 }
 0x3c9   : > { %v3848_v58 = vadd.f32 %v3738_v52, %v2340_v5  ;;  %v4885_v62 = vadd.f32 %v4884_v31, %v4883_v19 }
 0x3ca   : > { %v4886_v4 = vpop.f32.mrf.mxu0 }
 0x3cb   : > { %3944 = vst [vmem:[#allocation2 + $0x298] sm:$0xff] %v3848_v58  ;;  %v3741_v29 = vadd.f32 %v4885_v62, %v7416_v63  ;;  %v2352_v63 = vld [vmem:[#allocation2 + $0x270] sm:$0xff] }
 0x3cc   : > { %v4887_v37 = vpop.f32.mrf.mxu0 }
 0x3cd   : > { %v3851_v53 = vadd.f32 %v3741_v29, %v2343_v36  ;;  %v4888_v16 = vadd.f32 %v4887_v37, %v4886_v4 }
 0x3ce   : > { %v4889_v8 = vpop.f32.mrf.mxu0 }
 0x3cf   : > { %3947 = vst [vmem:[#allocation2 + $0x120] sm:$0xff] %v3851_v53  ;;  %v3746_v44 = vadd.f32 %v4888_v16, %v7420_v30  ;;  %v2355_v30 = vld [vmem:[#allocation2 + $0x2f0] sm:$0xff] }
 0x3d0   : > { %v4890_v23 = vpop.f32.mrf.mxu0 }
 0x3d1   : > { %v3854_v40 = vadd.f32 %v3746_v44, %v2346_v18  ;;  %v4891_v9 = vadd.f32 %v4890_v23, %v4889_v8 }
 0x3d2   : > { %v4892_v26 = vpop.f32.mrf.mxu0 }
 0x3d3   : > { %3950 = vst [vmem:[#allocation2 + $0x1f8] sm:$0xff] %v3854_v40  ;;  %v3749_v24 = vadd.f32 %v4891_v9, %v7424_v27  ;;  %v2358_v27 = vld [vmem:[#allocation2 + $0x2c8] sm:$0xff] }
 0x3d4   : > { %v4893_v42 = vpop.f32.mrf.mxu0 }
 0x3d5   : > { %v3857_v1 = vadd.f32 %v3749_v24, %v2349_v54  ;;  %v4894_v38 = vadd.f32 %v4893_v42, %v4892_v26 }
 0x3d6   : > { %v4895_v15 = vpop.f32.mrf.mxu0 }
 0x3d7   : > { %3953 = vst [vmem:[#allocation2 + $0x278] sm:$0xff] %v3857_v1  ;;  %v3754_v0 = vadd.f32 %v4894_v38, %v7428_v34  ;;  %v2361_v34 = vld [vmem:[#allocation2 + $0x230] sm:$0xff] }
 0x3d8   : > { %v4896_v20 = vpop.f32.mrf.mxu0 }
 0x3d9   : > { %v3860_v50 = vadd.f32 %v3754_v0, %v2352_v63  ;;  %v4897_v6 = vadd.f32 %v4896_v20, %v4895_v15 }
 0x3da   : > { %v4898_v45 = vpop.f32.mrf.mxu0 }
 0x3db   : > { %3956 = vst [vmem:[#allocation2 + $0x270] sm:$0xff] %v3860_v50  ;;  %v3757_v33 = vadd.f32 %v4897_v6, %v7432_v2  ;;  %v2364_v2 = vld [vmem:[#allocation2 + $0xc0] sm:$0xff] }
 0x3dc   : > { %v4899_v56 = vpop.f32.mrf.mxu0 }
 0x3dd   : > { %v3863_v39 = vadd.f32 %v3757_v33, %v2355_v30  ;;  %v4900_v51 = vadd.f32 %v4899_v56, %v4898_v45 }
 0x3de   : > { %v4901_v55 = vpop.f32.mrf.mxu0 }
 0x3df   : > { %3959 = vst [vmem:[#allocation2 + $0x2f0] sm:$0xff] %v3863_v39  ;;  %v3762_v25 = vadd.f32 %v4900_v51, %v7436_v43  ;;  %v2367_v43 = vld [vmem:[#allocation2 + $0xb0] sm:$0xff] }
 0x3e0   : > { %v4902_v57 = vpop.f32.mrf.mxu0 }
 0x3e1   : > { %v3866_v14 = vadd.f32 %v3762_v25, %v2358_v27  ;;  %v4903_v17 = vadd.f32 %v4902_v57, %v4901_v55 }
 0x3e2   : > { %v4904_v11 = vpop.f32.mrf.mxu0 }
 0x3e3   : > { %3962 = vst [vmem:[#allocation2 + $0x2c8] sm:$0xff] %v3866_v14  ;;  %v3765_v22 = vadd.f32 %v4903_v17, %v7440_v35 }
 0x3e4   : > { %v4905_v41 = vpop.f32.mrf.mxu0 }
 0x3e5   : > { %v3869_v3 = vadd.f32 %v3765_v22, %v2361_v34  ;;  %v4906_v47 = vadd.f32 %v4905_v41, %v4904_v11 }
 0x3e6   : > { %v4907_v46 = vpop.f32.mrf.mxu0 }
 0x3e7   : > { %3965 = vst [vmem:[#allocation2 + $0x230] sm:$0xff] %v3869_v3  ;;  %v3770_v28 = vadd.f32 %v4906_v47, %v7444_v21 }
 0x3e8   : > { %v4908_v49 = vpop.f32.mrf.mxu0 }
 0x3e9   : > { %v3872_v48 = vadd.f32 %v3770_v28, %v2364_v2  ;;  %v4909_v13 = vadd.f32 %v4908_v49, %v4907_v46 }
 0x3eb   : > { %3968 = vst [vmem:[#allocation2 + $0xc0] sm:$0xff] %v3872_v48  ;;  %v3773_v59 = vadd.f32 %v4909_v13, %v7447_v12  ;;  %3987 = sbr.rel (%p4691_p6) target bundleno = 1065 (0x429), region = 68 }
 0x3ed   : > { %v3875_v7 = vadd.f32 %v3773_v59, %v2367_v43 }
 0x3ef   : > { %3971 = vst [vmem:[#allocation2 + $0xb0] sm:$0xff] %v3875_v7 }
 0x3f0   : > { %v3988_v35 = vld [vmem:[#allocation2 + $0x2b0] sm:$0xff]  ;;  %v4084_v10 = vld [vmem:[#allocation11] sm:$0x7]  ;;  %v3994_v4 = vld [vmem:[#allocation2 + $0xf8] sm:$0xff] }
 0x3f1   : > { %v3989_v60 = vld [vmem:[#allocation2 + $0xd0] sm:$0xff]  ;;  %v3991_v58 = vld [vmem:[#allocation2 + $0x48] sm:$0xff]  ;;  %v3995_v29 = vld [vmem:[#allocation2 + $0x78] sm:$0xff] }
 0x3f2   : > { %v7749_v61 = vld [vmem:[#allocation20_spill] sm:$0xff]  ;;  %v3997_v44 = vld [vmem:[#allocation2 + $0xe0] sm:$0xff]  ;;  %v3998_v23 = vld [vmem:[#allocation2 + $0x2f8] sm:$0xff] }
 0x3f3   : > { %v7750_v32 = vsub.s32 0, %v7749_v61  ;;  %v7751_v21 = vsub.s32 1, %v7749_v61  ;;  %v3990_v52 = vld [vmem:[#allocation2 + $0x10] sm:$0xff]  ;;  %v7752_v31 = vsub.s32 2, %v7749_v61  ;;  %v3996_v8 = vld [vmem:[#allocation2 + $0x128] sm:$0xff]  ;;  %v3999_v24 = vld [vmem:[#allocation2 + $0x2b8] sm:$0xff] }
 0x3f4   : > { %v3992_v62 = vld [vmem:[#allocation2 + $0x30] sm:$0xff]  ;;  %v4000_v42 = vld [vmem:[#allocation2 + $0x2a0] sm:$0xff]  ;;  %v4001_v1 = vld [vmem:[#allocation2 + $0x168] sm:$0xff] }
 0x3f5   : > { %v7480_v5 = vrot.slane %v4084_v10, %v7750_v32  ;;  %v7484_v19 = vrot.slane %v4084_v10, %v7751_v21  ;;  %v7488_v12 = vrot.slane %v4084_v10, %v7752_v31  ;;  %v3993_v36 = vld [vmem:[#allocation2 + $0xf0] sm:$0xff]  ;;  %v4002_v20 = vld [vmem:[#allocation2 + $0x178] sm:$0xff]  ;;  %v4003_v50 = vld [vmem:[#allocation2 + $0x40] sm:$0xff] }
 0x3f6   : > { %v4004_v6 = vld [vmem:[#allocation2] sm:$0xff]  ;;  %v4005_v39 = vld [vmem:[#allocation2 + $0x248] sm:$0xff]  ;;  %v4011_v47 = vld [vmem:[#allocation2 + $0x1b0] sm:$0xff] }
 0x3f7   : > { %v4101_v37 = vadd.f32 %v7480_v5, %v3988_v35  ;;  %v4102_v53 = vadd.f32 %v7484_v19, %v3989_v60  ;;  %v4103_v16 = vadd.f32 %v7488_v12, %v3990_v52  ;;  %v4104_v18 = vadd.f32 %v7480_v5, %v3991_v58  ;;  %v4006_v51 = vld [vmem:[#allocation2 + $0xe8] sm:$0xff]  ;;  %v4010_v11 = vld [vmem:[#allocation2 + $0x20] sm:$0xff]  ;;  %v4013_v46 = vld [vmem:[#allocation2 + $0x258] sm:$0xff] }
 0x3f8   : > { %v4105_v40 = vadd.f32 %v7484_v19, %v3992_v62  ;;  %v4106_v9 = vadd.f32 %v7488_v12, %v3993_v36  ;;  %v4107_v54 = vadd.f32 %v7480_v5, %v3994_v4  ;;  %v4108_v26 = vadd.f32 %v7484_v19, %v3995_v29  ;;  %v4007_v27 = vld [vmem:[#allocation2 + $0x68] sm:$0xff]  ;;  %v4012_v2 = vld [vmem:[#allocation2 + $0x220] sm:$0xff]  ;;  %v4014_v13 = vld [vmem:[#allocation2 + $0x238] sm:$0xff] }
 0x3f9   : > { %4197 = vst [vmem:[#allocation12] sm:$0xff] %v4101_v37  ;;  %4198 = vst [vmem:[#allocation12 + $0x8] sm:$0xff] %v4102_v53  ;;  %v4109_v38 = vadd.f32 %v7488_v12, %v3996_v8  ;;  %v4110_v63 = vadd.f32 %v7480_v5, %v3997_v44  ;;  %v4111_v15 = vadd.f32 %v7484_v19, %v3998_v23  ;;  %v4008_v17 = vld [vmem:[#allocation2 + $0x228] sm:$0xff]  ;;  %v4015_v43 = vld [vmem:[#allocation2 + $0x130] sm:$0xff] }
 0x3fa   : > { %4199 = vst [vmem:[#allocation12 + $0x10] sm:$0xff] %v4103_v16  ;;  %4200 = vst [vmem:[#allocation12 + $0x18] sm:$0xff] %v4104_v18  ;;  %v4112_v0 = vadd.f32 %v7488_v12, %v3999_v24  ;;  %v4113_v30 = vadd.f32 %v7480_v5, %v4000_v42  ;;  %v4114_v45 = vadd.f32 %v7484_v19, %v4001_v1  ;;  %v4009_v34 = vld [vmem:[#allocation2 + $0xa8] sm:$0xff]  ;;  %v4016_v59 = vld [vmem:[#allocation2 + $0x158] sm:$0xff] }
 0x3fb   : > { %4201 = vst [vmem:[#allocation12 + $0x20] sm:$0xff] %v4105_v40  ;;  %4202 = vst [vmem:[#allocation12 + $0x28] sm:$0xff] %v4106_v9  ;;  %v4115_v33 = vadd.f32 %v7488_v12, %v4002_v20  ;;  %v4116_v56 = vadd.f32 %v7480_v5, %v4003_v50  ;;  %v4117_v55 = vadd.f32 %v7484_v19, %v4004_v6  ;;  %v4017_v60 = vld [vmem:[#allocation2 + $0x98] sm:$0xff]  ;;  %v4018_v61 = vld [vmem:[#allocation2 + $0x2e0] sm:$0xff] }
 0x3fc   : > { %4203 = vst [vmem:[#allocation12 + $0x30] sm:$0xff] %v4107_v54  ;;  %4204 = vst [vmem:[#allocation12 + $0x38] sm:$0xff] %v4108_v26  ;;  %v4118_v25 = vadd.f32 %v7488_v12, %v4005_v39  ;;  %v4119_v57 = vadd.f32 %v7480_v5, %v4006_v51  ;;  %v4120_v14 = vadd.f32 %v7484_v19, %v4007_v27  ;;  %v4019_v32 = vld [vmem:[#allocation2 + $0x1a8] sm:$0xff]  ;;  %v4020_v58 = vld [vmem:[#allocation2 + $0x1b8] sm:$0xff] }
 0x3fd   : > { %4205 = vst [vmem:[#allocation12 + $0x40] sm:$0xff] %v4109_v38  ;;  %4206 = vst [vmem:[#allocation12 + $0x48] sm:$0xff] %v4110_v63  ;;  %v4121_v22 = vadd.f32 %v7488_v12, %v4008_v17  ;;  %v4122_v41 = vadd.f32 %v7480_v5, %v4009_v34  ;;  %v4123_v3 = vadd.f32 %v7484_v19, %v4010_v11  ;;  %v4021_v62 = vld [vmem:[#allocation2 + $0x80] sm:$0xff]  ;;  %v4022_v36 = vld [vmem:[#allocation2 + $0x188] sm:$0xff] }
 0x3fe   : > { %4207 = vst [vmem:[#allocation12 + $0x50] sm:$0xff] %v4111_v15  ;;  %4208 = vst [vmem:[#allocation12 + $0x58] sm:$0xff] %v4112_v0  ;;  %v4124_v28 = vadd.f32 %v7488_v12, %v4011_v47  ;;  %v4125_v49 = vadd.f32 %v7480_v5, %v4012_v2  ;;  %v4126_v48 = vadd.f32 %v7484_v19, %v4013_v46  ;;  %v4023_v53 = vld [vmem:[#allocation2 + $0x208] sm:$0xff]  ;;  %v4024_v16 = vld [vmem:[#allocation2 + $0x38] sm:$0xff] }
 0x3ff   : > { %4209 = vst [vmem:[#allocation12 + $0x60] sm:$0xff] %v4113_v30  ;;  %4210 = vst [vmem:[#allocation12 + $0x68] sm:$0xff] %v4114_v45  ;;  %v4127_v7 = vadd.f32 %v7488_v12, %v4014_v13  ;;  %v4128_v35 = vadd.f32 %v7480_v5, %v4015_v43  ;;  %v4129_v10 = vadd.f32 %v7484_v19, %v4016_v59  ;;  %v4025_v18 = vld [vmem:[#allocation2 + $0x190] sm:$0xff]  ;;  %v4026_v40 = vld [vmem:[#allocation2 + $0x218] sm:$0xff] }
 0x400   : > { %4211 = vst [vmem:[#allocation12 + $0x70] sm:$0xff] %v4115_v33  ;;  %4212 = vst [vmem:[#allocation12 + $0x78] sm:$0xff] %v4116_v56  ;;  %v4130_v21 = vadd.f32 %v7488_v12, %v4017_v60  ;;  %v4131_v52 = vadd.f32 %v7480_v5, %v4018_v61  ;;  %v4132_v31 = vadd.f32 %v7484_v19, %v4019_v32  ;;  %v4027_v9 = vld [vmem:[#allocation2 + $0x250] sm:$0xff]  ;;  %v4028_v54 = vld [vmem:[#allocation2 + $0x1c8] sm:$0xff] }
 0x401   : > { %4213 = vst [vmem:[#allocation12 + $0x80] sm:$0xff] %v4117_v55  ;;  %4214 = vst [vmem:[#allocation12 + $0x88] sm:$0xff] %v4118_v25  ;;  %v4133_v4 = vadd.f32 %v7488_v12, %v4020_v58  ;;  %v4134_v29 = vadd.f32 %v7480_v5, %v4021_v62  ;;  %v4135_v37 = vadd.f32 %v7484_v19, %v4022_v36  ;;  %v4029_v1 = vld [vmem:[#allocation2 + $0x280] sm:$0xff]  ;;  %v4031_v63 = vld [vmem:[#allocation2 + $0xb8] sm:$0xff] }
 0x402   : > { %4215 = vst [vmem:[#allocation12 + $0x90] sm:$0xff] %v4119_v57  ;;  %4216 = vst [vmem:[#allocation12 + $0x98] sm:$0xff] %v4120_v14  ;;  %v4136_v8 = vadd.f32 %v7488_v12, %v4023_v53  ;;  %v4137_v44 = vadd.f32 %v7480_v5, %v4024_v16  ;;  %v4138_v23 = vadd.f32 %v7484_v19, %v4025_v18  ;;  %v4030_v38 = vld [vmem:[#allocation2 + $0x100] sm:$0xff]  ;;  %v4032_v50 = vld [vmem:[#allocation2 + $0x288] sm:$0xff] }
 0x403   : > { %4217 = vst [vmem:[#allocation12 + $0xa0] sm:$0xff] %v4121_v22  ;;  %4218 = vst [vmem:[#allocation12 + $0xa8] sm:$0xff] %v4122_v41  ;;  %v4139_v26 = vadd.f32 %v7488_v12, %v4026_v40  ;;  %v4140_v24 = vadd.f32 %v7480_v5, %v4027_v9  ;;  %v4141_v42 = vadd.f32 %v7484_v19, %v4028_v54  ;;  %v4033_v6 = vld [vmem:[#allocation2 + $0x60] sm:$0xff]  ;;  %v4034_v30 = vld [vmem:[#allocation2 + $0x210] sm:$0xff] }
 0x404   : > { %4219 = vst [vmem:[#allocation12 + $0xb0] sm:$0xff] %v4123_v3  ;;  %4220 = vst [vmem:[#allocation12 + $0xb8] sm:$0xff] %v4124_v28  ;;  %v4142_v15 = vadd.f32 %v7488_v12, %v4029_v1  ;;  %v4143_v0 = vadd.f32 %v7480_v5, %v4030_v38  ;;  %v4144_v20 = vadd.f32 %v7484_v19, %v4031_v63  ;;  %v4035_v39 = vld [vmem:[#allocation2 + $0x50] sm:$0xff]  ;;  %v4036_v51 = vld [vmem:[#allocation2 + $0x1e8] sm:$0xff] }
 0x405   : > { %4221 = vst [vmem:[#allocation12 + $0xc0] sm:$0xff] %v4125_v49  ;;  %4222 = vst [vmem:[#allocation12 + $0xc8] sm:$0xff] %v4126_v48  ;;  %v4145_v45 = vadd.f32 %v7488_v12, %v4032_v50  ;;  %v4146_v33 = vadd.f32 %v7480_v5, %v4033_v6  ;;  %v4147_v56 = vadd.f32 %v7484_v19, %v4034_v30  ;;  %v4037_v27 = vld [vmem:[#allocation2 + $0x2d0] sm:$0xff]  ;;  %v4039_v17 = vld [vmem:[#allocation2 + $0x28] sm:$0xff] }
 0x406   : > { %4223 = vst [vmem:[#allocation12 + $0xd0] sm:$0xff] %v4127_v7  ;;  %4224 = vst [vmem:[#allocation12 + $0xd8] sm:$0xff] %v4128_v35  ;;  %v4148_v55 = vadd.f32 %v7488_v12, %v4035_v39  ;;  %v4149_v25 = vadd.f32 %v7480_v5, %v4036_v51  ;;  %v4150_v57 = vadd.f32 %v7484_v19, %v4037_v27  ;;  %v4038_v14 = vld [vmem:[#allocation2 + $0x1f0] sm:$0xff]  ;;  %v4040_v34 = vld [vmem:[#allocation2 + $0x138] sm:$0xff] }
 0x407   : > { %4225 = vst [vmem:[#allocation12 + $0xe0] sm:$0xff] %v4129_v10  ;;  %4226 = vst [vmem:[#allocation12 + $0xe8] sm:$0xff] %v4130_v21  ;;  %v4151_v11 = vadd.f32 %v7488_v12, %v4038_v14  ;;  %v4152_v22 = vadd.f32 %v7480_v5, %v4039_v17  ;;  %v4153_v41 = vadd.f32 %v7484_v19, %v4040_v34  ;;  %v4041_v3 = vld [vmem:[#allocation2 + $0xc8] sm:$0xff]  ;;  %v4042_v47 = vld [vmem:[#allocation2 + $0x58] sm:$0xff] }
 0x408   : > { %4227 = vst [vmem:[#allocation12 + $0xf0] sm:$0xff] %v4131_v52  ;;  %4228 = vst [vmem:[#allocation12 + $0xf8] sm:$0xff] %v4132_v31  ;;  %v4043_v2 = vld [vmem:[#allocation2 + $0x1c0] sm:$0xff]  ;;  %v4154_v46 = vadd.f32 %v7488_v12, %v4041_v3  ;;  %v4155_v28 = vadd.f32 %v7480_v5, %v4042_v47  ;;  %v4044_v48 = vld [vmem:[#allocation2 + $0x298] sm:$0xff] }
 0x409   : > { %4229 = vst [vmem:[#allocation12 + $0x100] sm:$0xff] %v4133_v4  ;;  %4230 = vst [vmem:[#allocation12 + $0x108] sm:$0xff] %v4134_v29  ;;  %v4156_v49 = vadd.f32 %v7484_v19, %v4043_v2  ;;  %v4045_v13 = vld [vmem:[#allocation2 + $0x70] sm:$0xff]  ;;  %v4046_v43 = vld [vmem:[#allocation2 + $0x18] sm:$0xff]  ;;  %v4157_v59 = vadd.f32 %v7488_v12, %v4044_v48 }
 0x40a   : > { %4231 = vst [vmem:[#allocation12 + $0x110] sm:$0xff] %v4135_v37  ;;  %4232 = vst [vmem:[#allocation12 + $0x118] sm:$0xff] %v4136_v8  ;;  %v4158_v7 = vadd.f32 %v7480_v5, %v4045_v13  ;;  %v4159_v35 = vadd.f32 %v7484_v19, %v4046_v43  ;;  %v4047_v10 = vld [vmem:[#allocation2 + $0x120] sm:$0xff]  ;;  %v4050_v31 = vld [vmem:[#allocation2 + $0x1f8] sm:$0xff] }
 0x40b   : > { %4233 = vst [vmem:[#allocation12 + $0x120] sm:$0xff] %v4137_v44  ;;  %4234 = vst [vmem:[#allocation12 + $0x128] sm:$0xff] %v4138_v23  ;;  %v4048_v60 = vld [vmem:[#allocation2 + $0x240] sm:$0xff]  ;;  %v4160_v32 = vadd.f32 %v7488_v12, %v4047_v10  ;;  %v4163_v36 = vadd.f32 %v7488_v12, %v4050_v31  ;;  %v4053_v37 = vld [vmem:[#allocation2 + $0x278] sm:$0xff] }
 0x40c   : > { %4235 = vst [vmem:[#allocation12 + $0x130] sm:$0xff] %v4139_v26  ;;  %4236 = vst [vmem:[#allocation12 + $0x138] sm:$0xff] %v4140_v24  ;;  %v4049_v61 = vld [vmem:[#allocation2 + $0x180] sm:$0xff]  ;;  %v4161_v21 = vadd.f32 %v7480_v5, %v4048_v60  ;;  %v4054_v53 = vld [vmem:[#allocation2 + $0x8] sm:$0xff]  ;;  %v4166_v18 = vadd.f32 %v7488_v12, %v4053_v37 }
 0x40d   : > { %4237 = vst [vmem:[#allocation12 + $0x140] sm:$0xff] %v4141_v42  ;;  %4238 = vst [vmem:[#allocation12 + $0x148] sm:$0xff] %v4142_v15  ;;  %v4162_v52 = vadd.f32 %v7484_v19, %v4049_v61  ;;  %v4051_v58 = vld [vmem:[#allocation2 + $0x1a0] sm:$0xff]  ;;  %v4167_v8 = vadd.f32 %v7480_v5, %v4054_v53  ;;  %v4056_v23 = vld [vmem:[#allocation2 + $0x270] sm:$0xff] }
 0x40e   : > { %4239 = vst [vmem:[#allocation12 + $0x150] sm:$0xff] %v4143_v0  ;;  %4240 = vst [vmem:[#allocation12 + $0x158] sm:$0xff] %v4144_v20  ;;  %v4052_v62 = vld [vmem:[#allocation2 + $0xa0] sm:$0xff]  ;;  %v4164_v4 = vadd.f32 %v7480_v5, %v4051_v58  ;;  %v4057_v40 = vld [vmem:[#allocation2 + $0x290] sm:$0xff]  ;;  %v4169_v54 = vadd.f32 %v7488_v12, %v4056_v23 }
 0x40f   : > { %4241 = vst [vmem:[#allocation12 + $0x160] sm:$0xff] %v4145_v45  ;;  %4242 = vst [vmem:[#allocation12 + $0x168] sm:$0xff] %v4146_v33  ;;  %v4165_v29 = vadd.f32 %v7484_v19, %v4052_v62  ;;  %v4055_v16 = vld [vmem:[#allocation2 + $0x2c0] sm:$0xff]  ;;  %v4058_v9 = vld [vmem:[#allocation2 + $0x2a8] sm:$0xff]  ;;  %v4170_v26 = vadd.f32 %v7480_v5, %v4057_v40 }
 0x410   : > { %4243 = vst [vmem:[#allocation12 + $0x170] sm:$0xff] %v4147_v56  ;;  %4244 = vst [vmem:[#allocation12 + $0x178] sm:$0xff] %v4148_v55  ;;  %v4168_v44 = vadd.f32 %v7484_v19, %v4055_v16  ;;  %v4171_v24 = vadd.f32 %v7484_v19, %v4058_v9  ;;  %v4059_v42 = vld [vmem:[#allocation2 + $0x2f0] sm:$0xff]  ;;  %v4060_v1 = vld [vmem:[#allocation2 + $0x1e0] sm:$0xff] }
 0x411   : > { %4245 = vst [vmem:[#allocation12 + $0x180] sm:$0xff] %v4149_v25  ;;  %4246 = vst [vmem:[#allocation12 + $0x188] sm:$0xff] %v4150_v57  ;;  %v4061_v38 = vld [vmem:[#allocation2 + $0x150] sm:$0xff]  ;;  %v4172_v63 = vadd.f32 %v7488_v12, %v4059_v42  ;;  %v4173_v15 = vadd.f32 %v7480_v5, %v4060_v1  ;;  %v4062_v20 = vld [vmem:[#allocation2 + $0x2c8] sm:$0xff] }
 0x412   : > { %4247 = vst [vmem:[#allocation12 + $0x190] sm:$0xff] %v4151_v11  ;;  %4248 = vst [vmem:[#allocation12 + $0x198] sm:$0xff] %v4152_v22  ;;  %v4174_v0 = vadd.f32 %v7484_v19, %v4061_v38  ;;  %v4063_v50 = vld [vmem:[#allocation2 + $0x1d0] sm:$0xff]  ;;  %v4064_v6 = vld [vmem:[#allocation2 + $0x140] sm:$0xff]  ;;  %v4175_v30 = vadd.f32 %v7488_v12, %v4062_v20 }
 0x413   : > { %4249 = vst [vmem:[#allocation12 + $0x1a0] sm:$0xff] %v4153_v41  ;;  %4250 = vst [vmem:[#allocation12 + $0x1a8] sm:$0xff] %v4154_v46  ;;  %v4176_v45 = vadd.f32 %v7480_v5, %v4063_v50  ;;  %v4177_v33 = vadd.f32 %v7484_v19, %v4064_v6  ;;  %v4065_v56 = vld [vmem:[#allocation2 + $0x230] sm:$0xff]  ;;  %v4066_v39 = vld [vmem:[#allocation2 + $0x160] sm:$0xff] }
 0x414   : > { %4251 = vst [vmem:[#allocation12 + $0x1b0] sm:$0xff] %v4155_v28  ;;  %4252 = vst [vmem:[#allocation12 + $0x1b8] sm:$0xff] %v4156_v49  ;;  %v4067_v51 = vld [vmem:[#allocation2 + $0x2d8] sm:$0xff]  ;;  %v4178_v27 = vadd.f32 %v7488_v12, %v4065_v56  ;;  %v4179_v55 = vadd.f32 %v7480_v5, %v4066_v39  ;;  %v4068_v57 = vld [vmem:[#allocation2 + $0xc0] sm:$0xff] }
 0x415   : > { %4253 = vst [vmem:[#allocation12 + $0x1c0] sm:$0xff] %v4157_v59  ;;  %4254 = vst [vmem:[#allocation12 + $0x1c8] sm:$0xff] %v4158_v7  ;;  %v4180_v25 = vadd.f32 %v7484_v19, %v4067_v51  ;;  %v4069_v14 = vld [vmem:[#allocation2 + $0x170] sm:$0xff]  ;;  %v4181_v34 = vadd.f32 %v7488_v12, %v4068_v57  ;;  %v4072_v3 = vld [vmem:[#allocation2 + $0x200] sm:$0xff] }
 0x416   : > { %4255 = vst [vmem:[#allocation12 + $0x1d0] sm:$0xff] %v4159_v35  ;;  %4256 = vst [vmem:[#allocation12 + $0x1d8] sm:$0xff] %v4160_v32  ;;  %v4070_v17 = vld [vmem:[#allocation2 + $0x90] sm:$0xff]  ;;  %v4182_v11 = vadd.f32 %v7480_v5, %v4069_v14  ;;  %v4073_v47 = vld [vmem:[#allocation2 + $0xd8] sm:$0xff]  ;;  %v4185_v46 = vadd.f32 %v7480_v5, %v4072_v3 }
 0x417   : > { %4257 = vst [vmem:[#allocation12 + $0x1e0] sm:$0xff] %v4161_v21  ;;  %4258 = vst [vmem:[#allocation12 + $0x1e8] sm:$0xff] %v4162_v52  ;;  %v4183_v22 = vadd.f32 %v7484_v19, %v4070_v17  ;;  %v4071_v41 = vld [vmem:[#allocation2 + $0xb0] sm:$0xff]  ;;  %v4186_v28 = vadd.f32 %v7484_v19, %v4073_v47  ;;  %v4074_v49 = vld [vmem:[#allocation2 + $0x1d8] sm:$0xff] }
 0x418   : > { %4259 = vst [vmem:[#allocation12 + $0x1f0] sm:$0xff] %v4163_v36  ;;  %4260 = vst [vmem:[#allocation12 + $0x1f8] sm:$0xff] %v4164_v4  ;;  %v4184_v2 = vadd.f32 %v7488_v12, %v4071_v41  ;;  %v4075_v48 = vld [vmem:[#allocation2 + $0x2e8] sm:$0xff]  ;;  %v4076_v13 = vld [vmem:[#allocation2 + $0x260] sm:$0xff]  ;;  %v4187_v43 = vadd.f32 %v7488_v12, %v4074_v49 }
 0x419   : > { %4261 = vst [vmem:[#allocation12 + $0x200] sm:$0xff] %v4165_v29  ;;  %4262 = vst [vmem:[#allocation12 + $0x208] sm:$0xff] %v4166_v18  ;;  %v4188_v59 = vadd.f32 %v7480_v5, %v4075_v48  ;;  %v4189_v7 = vadd.f32 %v7484_v19, %v4076_v13  ;;  %v4077_v35 = vld [vmem:[#allocation2 + $0x268] sm:$0xff]  ;;  %v4079_v60 = vld [vmem:[#allocation2 + $0x110] sm:$0xff] }
 0x41a   : > { %4263 = vst [vmem:[#allocation12 + $0x210] sm:$0xff] %v4167_v8  ;;  %4264 = vst [vmem:[#allocation12 + $0x218] sm:$0xff] %v4168_v44  ;;  %v4078_v10 = vld [vmem:[#allocation2 + $0x88] sm:$0xff]  ;;  %v4190_v61 = vadd.f32 %v7488_v12, %v4077_v35  ;;  %v4192_v21 = vadd.f32 %v7484_v19, %v4079_v60  ;;  %v4081_v31 = vld [vmem:[#allocation2 + $0x198] sm:$0xff] }
 0x41b   : > { %4265 = vst [vmem:[#allocation12 + $0x220] sm:$0xff] %v4169_v54  ;;  %4266 = vst [vmem:[#allocation12 + $0x228] sm:$0xff] %v4170_v26  ;;  %v4191_v32 = vadd.f32 %v7480_v5, %v4078_v10  ;;  %v4080_v52 = vld [vmem:[#allocation2 + $0x108] sm:$0xff]  ;;  %v4194_v36 = vadd.f32 %v7480_v5, %v4081_v31  ;;  %v4083_v29 = vld [vmem:[#allocation2 + $0x118] sm:$0xff] }
 0x41c   : > { %4267 = vst [vmem:[#allocation12 + $0x230] sm:$0xff] %v4171_v24  ;;  %4268 = vst [vmem:[#allocation12 + $0x238] sm:$0xff] %v4172_v63  ;;  %v4082_v58 = vld [vmem:[#allocation2 + $0x148] sm:$0xff]  ;;  %v4193_v62 = vadd.f32 %v7488_v12, %v4080_v52  ;;  %v4196_v37 = vadd.f32 %v7488_v12, %v4083_v29 }
 0x41d   : > { %4269 = vst [vmem:[#allocation12 + $0x240] sm:$0xff] %v4173_v15  ;;  %4270 = vst [vmem:[#allocation12 + $0x248] sm:$0xff] %v4174_v0  ;;  %v4195_v4 = vadd.f32 %v7484_v19, %v4082_v58 }
 0x41e   : > { %4271 = vst [vmem:[#allocation12 + $0x250] sm:$0xff] %v4175_v30  ;;  %4272 = vst [vmem:[#allocation12 + $0x258] sm:$0xff] %v4176_v45 }
 0x41f   : > { %4273 = vst [vmem:[#allocation12 + $0x260] sm:$0xff] %v4177_v33  ;;  %4274 = vst [vmem:[#allocation12 + $0x268] sm:$0xff] %v4178_v27 }
 0x420   : > { %4275 = vst [vmem:[#allocation12 + $0x270] sm:$0xff] %v4179_v55  ;;  %4276 = vst [vmem:[#allocation12 + $0x278] sm:$0xff] %v4180_v25 }
 0x421   : > { %4277 = vst [vmem:[#allocation12 + $0x280] sm:$0xff] %v4181_v34  ;;  %4278 = vst [vmem:[#allocation12 + $0x288] sm:$0xff] %v4182_v11 }
 0x422   : > { %4279 = vst [vmem:[#allocation12 + $0x290] sm:$0xff] %v4183_v22  ;;  %4280 = vst [vmem:[#allocation12 + $0x298] sm:$0xff] %v4184_v2 }
 0x423   : > { %4281 = vst [vmem:[#allocation12 + $0x2a0] sm:$0xff] %v4185_v46  ;;  %4282 = vst [vmem:[#allocation12 + $0x2a8] sm:$0xff] %v4186_v28 }
 0x424   : > { %4283 = vst [vmem:[#allocation12 + $0x2b0] sm:$0xff] %v4187_v43  ;;  %4284 = vst [vmem:[#allocation12 + $0x2b8] sm:$0xff] %v4188_v59 }
 0x425   : > { %4285 = vst [vmem:[#allocation12 + $0x2c0] sm:$0xff] %v4189_v7  ;;  %4286 = vst [vmem:[#allocation12 + $0x2c8] sm:$0xff] %v4190_v61 }
 0x426   : > { %4287 = vst [vmem:[#allocation12 + $0x2d0] sm:$0xff] %v4191_v32  ;;  %4288 = vst [vmem:[#allocation12 + $0x2d8] sm:$0xff] %v4192_v21 }
 0x427   : > { %4289 = vst [vmem:[#allocation12 + $0x2e0] sm:$0xff] %v4193_v62  ;;  %4290 = vst [vmem:[#allocation12 + $0x2e8] sm:$0xff] %v4194_v36 }
 0x428   : > { %4291 = vst [vmem:[#allocation12 + $0x2f0] sm:$0xff] %v4195_v4  ;;  %4292 = vst [vmem:[#allocation12 + $0x2f8] sm:$0xff] %v4196_v37 }
 0x429 PF: > { %p4982_p2 = scmp.eq.s32.totalorder %s5684_s24, 2  ;;  %s5622_s21 = smov [#allocation12]  }
 0x42a   : > { %s4303_s26 = sshll.u32 %s5622_s21, 4  ;;  %s4304_s26 = int_to_ptr.vmem [resolvable:$true] %s4303_s26 }
 0x42b   : > { %s5518_s13 = scalar_lea.vmem %s4304_s26, 12288  ;;  %p5525_p13 = scmp.lt.s32.totalorder %s4304_s26, %s4304_s26 }
 0x42c   : > { %p5519_p5 = scmp.ne.s32.totalorder %s4304_s26, %s5518_s13  ;;  %p5526_p4 = scmp.lt.s32.totalorder %s5518_s13, %s5518_s13 }
 0x42e   : > { %p5520_p7 = pnand %p5519_p5, %p4982_p2  ;;  %p5527_p3 = por %p5526_p4, %p5525_p13 }
 0x430   : > { %p5521_p9 = pneg %p5520_p7 }
 0x432   : > { %p5528_p0 = pnand %p5527_p3, %p5521_p9 }
 0x434   : > { %5531 = shalt.err (!%p5528_p0)
}
 0x435   : > { %s5623_s30 = smov 384   ;;  %s5624_s29 = smov 24  }
 0x436   : > { %4957 = dma.vmem_to_hbm [thread:$0]  (%p4982_p2), %s4304_s26, 12288, %s7621_s5, [#allocation5], %s5623_s30, %s5623_s30, %s5624_s29  }
 0x437   : > { %5583 = dma.done.wait (%p4982_p2), [#allocation5], 12288  }
 0x438   : > { %5585 = vsyncadd (%p4982_p2), [#allocation5], 4294955008 }
 0x439 PF: > { %s23_s23 = sadd.s32 1, %s5608_s23   ;;  %s7753_s4 = sld [smem:[#allocation19_spill]] }
 0x43a   : > { %p20_p10 = scmp.ge.s32.totalorder %s23_s23, 5   ;;  %s7754_s12 = sld [smem:[#allocation18_spill]] }
 0x43b   : > { %s7755_s18 = smov %s5592_s19  ;;  %s7756_s19 = smov %s5596_s20 }
 0x43c   : > { %s7758_s21 = smov %s5604_s22  ;;  %22 = sbr.rel (!%p20_p10) target bundleno = 11 (0xb), region = 120 }
 0x43f   : > { %s7757_s20 = smov %s7753_s4 }
 0x440   : > { %s7759_s22 = smov %s7754_s12 }
 0x441   :  { %4319 = vsyncpa [#allocation4], 1 }
 0x442   :  { %4321 = vsyncpa [#allocation4 + $0x1], 1 }
 0x443   :  { %4322 = vsyncpa [#allocation7], 1 }
 0x444   :  { %4324 = vsyncpa [#allocation7 + $0x1], 1 }
 0x445   :  { %4325 = vsyncpa [#allocation10], 1 }
 0x446   :  { %4327 = vsyncpa [#allocation10 + $0x1], 1 }
 0x447   :  { %4328 = vsyncpa [#allocation5], 1 }
 0x448   :  { %4330 = vsyncpa [#allocation5 + $0x1], 1 }

</bundles_post_ra>
